<compile_context>
chip_gen: v5e
topology: v5e:2x2
jax: 0.10.0
libtpu: 0.0.40
codegen_flags: <defaults>
</compile_context>

<pallas_src>
import jax
import jax.numpy as jnp
from jax import lax
from jax.experimental import pallas as pl
from jax.experimental.pallas import tpu as pltpu

OBS_DIM = 13
ACTION_DIM = 2
HIDDEN = 128
MLP_H = 64
ACT_PAD = 128          # lane-dense padded action-head width


def _rppo_kernel(obs_ref, hc0_ref, whh_ref, wihb_ref, mlp_ref, head_ref,
                 act_ref, hcn_ref, gx_ref, f2_ref):
    SB, D = obs_ref.shape
    H = hc0_ref.shape[1]
    B = hc0_ref.shape[0] // 2
    S = SB // B
    M = mlp_ref.shape[1]                       # MLP hidden width (64)

    # ---- Hoisted input projection for ALL time steps (off the serial chain) ----
    # gates_x[t*B:(t+1)*B] = x_t @ W_ih^T + (b_ih + b_hh), gate order [i,f,o,g].
    # Parked in VMEM scratch so it does not pin vregs across the unrolled loop.
    gx_ref[...] = (jnp.dot(obs_ref[...], wihb_ref[0:D, :],
                           preferred_element_type=jnp.float32)
                   + wihb_ref[D:D + 1, :])

    # Small biases hoisted; large weights are read at their use sites so the
    # MXU streams them straight from the input VMEM buffers (no spill pressure).
    b1 = mlp_ref[H + M:H + M + 1, :]
    b2 = mlp_ref[H + M + 1:H + M + 2, :]

    h = hc0_ref[0:B, :]                        # (B, H) carried in vregs
    c = hc0_ref[B:2 * B, :]

    # ---- Fully-unrolled recurrence (S is small & static) ----
    for t in range(S):
        # Serial path: bf16 operands on the MXU, f32 accumulation.
        gates = gx_ref[t * B:(t + 1) * B, :] + jnp.dot(
            h.astype(jnp.bfloat16), whh_ref[...],
            preferred_element_type=jnp.float32)              # (B, 4H)
        # gate layout [i | f | o | g]; sigmoid as a single tanh EUP pass
        sig = 0.5 * jnp.tanh(0.5 * gates[:, 0:3 * H]) + 0.5
        i_g = sig[:, 0:H]
        f_g = sig[:, H:2 * H]
        o_g = sig[:, 2 * H:3 * H]
        g_g = jnp.tanh(gates[:, 3 * H:4 * H])
        c = f_g * c + i_g * g_g
        h = o_g * jnp.tanh(c)

        # Per-step MLP extractor (independent of later steps -> MXU filler);
        # f2 stashed in VMEM, the tiny action head is hoisted off the MRF path.
        f1 = jnp.maximum(
            jnp.dot(h, mlp_ref[0:H, :], preferred_element_type=jnp.float32)
            + b1, 0.0)
        f2_ref[t * B:(t + 1) * B, :] = jnp.maximum(
            jnp.dot(f1, mlp_ref[H:H + M, :],
                    preferred_element_type=jnp.float32) + b2, 0.0)

    # Final hidden state, packed [h_n ; c_n], single output buffer.
    hcn_ref[0:B, :] = h
    hcn_ref[B:2 * B, :] = c

    # ---- Hoisted action head: one (S*B, 64) @ (64, 128) matmul and a single
    # lane-dense store (columns >= ACTION_DIM are zero padding). ----
    act_ref[...] = jnp.tanh(
        jnp.dot(f2_ref[...], head_ref[0:M, :],
                preferred_element_type=jnp.float32)
        + head_ref[M:M + 1, :])


def _permute_gates(x):
    """Reorder the last axis from PyTorch LSTM [i,f,g,o] to kernel [i,f,o,g]."""
    i, f, g, o = jnp.split(x, 4, axis=-1)
    return jnp.concatenate([i, f, o, g], axis=-1)


def pack_params(p):
    """Pack the 12 small parameter tensors into 4 kernel input buffers
    (fewer kernel-entry DMAs). Pure layout change, done once at prep time."""
    # recurrent weight: gate-permuted, bf16 operands for the serial MXU matmul
    whh = _permute_gates(p['w_hh_T']).astype(jnp.bfloat16)            # (H, 4H) bf16
    # input-projection weight + combined LSTM bias (f32), stacked on sublanes
    wih_b = jnp.concatenate([_permute_gates(p['w_ih_T']),
                             _permute_gates(p['b_lstm'])], axis=0)    # (OBS_DIM+1, 4H)
    # MLP extractor: [W1 (128,64) ; W2 (64,64) ; b1 ; b2] stacked on sublanes
    mlp_w = jnp.concatenate([p['w1_T'], p['w2_T'], p['b1'], p['b2']], axis=0)
    # action head padded to a lane-dense 128-wide output: [W3 (64,128) ; b3 (1,128)]
    w3 = jnp.pad(p['w3_T'], ((0, 0), (0, ACT_PAD - ACTION_DIM)))
    b3 = jnp.pad(p['b3'], ((0, 0), (0, ACT_PAD - ACTION_DIM)))
    head_w = jnp.concatenate([w3, b3], axis=0)                        # (65, 128)
    return {'whh': whh, 'wih_b': wih_b, 'mlp_w': mlp_w, 'head_w': head_w}


def recurrent_ppo_forward(kparams, obs, hidden_states):
    """obs: (B, S, OBS_DIM) f32 (batch_first, as in PyTorch);
    hidden_states: (h0, c0), each (1, B, HIDDEN) f32.
    Returns (actions (B, S, ACTION_DIM), (h_n (1,B,HIDDEN), c_n (1,B,HIDDEN)))."""
    h0, c0 = hidden_states
    B, S, _ = obs.shape

    # time-major flattened rows: row t*B + b  <->  obs[b, t, :]
    obs_flat = jnp.transpose(obs, (1, 0, 2)).reshape(S * B, OBS_DIM)
    hc0 = jnp.concatenate([h0[0], c0[0]], axis=0)                     # (2B, H)

    vmem = pl.BlockSpec(memory_space=pltpu.MemorySpace.VMEM)
    out_shapes = (
        jax.ShapeDtypeStruct((S * B, ACT_PAD), jnp.float32),          # padded actions
        jax.ShapeDtypeStruct((2 * B, HIDDEN), jnp.float32),           # [h_n ; c_n]
    )
    acts_flat, hcn = pl.pallas_call(
        _rppo_kernel,
        out_shape=out_shapes,
        in_specs=[vmem] * 6,
        out_specs=(vmem, vmem),
        scratch_shapes=[pltpu.VMEM((S * B, 4 * HIDDEN), jnp.float32),  # gates_x park
                        pltpu.VMEM((S * B, MLP_H), jnp.float32)],      # f2 stash
    )(obs_flat, hc0, kparams['whh'], kparams['wih_b'],
      kparams['mlp_w'], kparams['head_w'])

    actions = acts_flat[:, :ACTION_DIM].reshape(S, B, ACTION_DIM).transpose(1, 0, 2)
    return actions, (hcn[None, 0:B], hcn[None, B:2 * B])


def init_params(key):
    """Deterministic synthetic parameters with PyTorch-equivalent shapes
    (stored pre-transposed for x @ W^T style matmuls, canonical [i,f,g,o] order)."""
    ks = jax.random.split(key, 10)
    s = 0.1
    w_ih = s * jax.random.normal(ks[0], (4 * HIDDEN, OBS_DIM), jnp.float32)   # torch weight_ih_l0
    w_hh = s * jax.random.normal(ks[1], (4 * HIDDEN, HIDDEN), jnp.float32)    # torch weight_hh_l0
    b_ih = s * jax.random.normal(ks[2], (4 * HIDDEN,), jnp.float32)
    b_hh = s * jax.random.normal(ks[3], (4 * HIDDEN,), jnp.float32)
    w1 = s * jax.random.normal(ks[4], (MLP_H, HIDDEN), jnp.float32)
    b1 = s * jax.random.normal(ks[5], (MLP_H,), jnp.float32)
    w2 = s * jax.random.normal(ks[6], (MLP_H, MLP_H), jnp.float32)
    b2 = s * jax.random.normal(ks[7], (MLP_H,), jnp.float32)
    w3 = s * jax.random.normal(ks[8], (ACTION_DIM, MLP_H), jnp.float32)
    b3 = s * jax.random.normal(ks[9], (ACTION_DIM,), jnp.float32)
    # TODO(synk): log_std parameter exists in the module but is unused by forward(); omitted.
    return {
        'w_ih_T': w_ih.T, 'w_hh_T': w_hh.T, 'b_lstm': (b_ih + b_hh)[None, :],
        'w1_T': w1.T, 'b1': b1[None, :],
        'w2_T': w2.T, 'b2': b2[None, :],
        'w3_T': w3.T, 'b3': b3[None, :],
    }


def reference_forward(params, obs, hidden_states):
    """Pure-JAX f32 reference (mirrors PyTorch semantics, canonical gate order)."""
    hp = lax.Precision.HIGHEST
    h, c = hidden_states[0][0], hidden_states[1][0]
    B, S, _ = obs.shape
    H = HIDDEN
    outs = []
    for t in range(S):
        x = obs[:, t, :]
        gates = (jnp.dot(x, params['w_ih_T'], precision=hp)
                 + jnp.dot(h, params['w_hh_T'], precision=hp)
                 + params['b_lstm'])
        i_g = jax.nn.sigmoid(gates[:, 0:H])
        f_g = jax.nn.sigmoid(gates[:, H:2 * H])
        g_g = jnp.tanh(gates[:, 2 * H:3 * H])
        o_g = jax.nn.sigmoid(gates[:, 3 * H:4 * H])
        c = f_g * c + i_g * g_g
        h = o_g * jnp.tanh(c)
        outs.append(h)
    lstm_out = jnp.stack(outs, axis=1)                                # (B, S, H)
    f1 = jnp.maximum(jnp.dot(lstm_out, params['w1_T'], precision=hp) + params['b1'], 0.0)
    f2 = jnp.maximum(jnp.dot(f1, params['w2_T'], precision=hp) + params['b2'], 0.0)
    actions = jnp.tanh(jnp.dot(f2, params['w3_T'], precision=hp) + params['b3'])
    return actions, (h[None], c[None])


if __name__ == "__main__":
    key = jax.random.PRNGKey(0)
    k_obs, k_h, k_c, k_par = jax.random.split(key, 4)

    B, S = 2, 8
    obs = jax.random.normal(k_obs, (B, S, OBS_DIM), jnp.float32)
    h0 = jax.random.normal(k_h, (1, B, HIDDEN), jnp.float32)
    c0 = jax.random.normal(k_c, (1, B, HIDDEN), jnp.float32)
    params = init_params(k_par)
    kparams = pack_params(params)          # one-time param-prep packing

    actions, (hn, cn) = jax.jit(recurrent_ppo_forward)(kparams, obs, (h0, c0))
    jax.block_until_ready((actions, hn, cn))

    # Correctness check against the pure-f32 JAX reference.  Tolerance is 2e-2
    # because the recurrent h @ W_hh matmul uses bf16 operands (f32 accumulation)
    # per the performance review; observed error stays well inside this bound
    # thanks to sigmoid/tanh gate squashing.
    ref_actions, (ref_hn, ref_cn) = reference_forward(params, obs, (h0, c0))
    assert actions.shape == (B, S, ACTION_DIM)
    assert hn.shape == (1, B, HIDDEN) and cn.shape == (1, B, HIDDEN)
    assert jnp.allclose(actions, ref_actions, atol=2e-2, rtol=2e-2)
    assert jnp.allclose(hn, ref_hn, atol=2e-2, rtol=2e-2)
    assert jnp.allclose(cn, ref_cn, atol=2e-2, rtol=2e-2)

    print("KERNEL_OK")
</pallas_src>

<mosaic_0001>
module attributes {stable_mosaic.version = 11 : i64} {
  func.func @_rppo_kernel(%arg0: memref<16x13xf32, #tpu.memory_space<vmem>>, %arg1: memref<4x128xf32, #tpu.memory_space<vmem>>, %arg2: memref<128x512xbf16, #tpu.memory_space<vmem>>, %arg3: memref<14x512xf32, #tpu.memory_space<vmem>>, %arg4: memref<194x64xf32, #tpu.memory_space<vmem>>, %arg5: memref<65x128xf32, #tpu.memory_space<vmem>>, %arg6: memref<16x128xf32, #tpu.memory_space<vmem>>, %arg7: memref<4x128xf32, #tpu.memory_space<vmem>>, %arg8: memref<16x512xf32, #tpu.memory_space<vmem>>, %arg9: memref<16x64xf32, #tpu.memory_space<vmem>>) attributes {dimension_semantics = [], scalar_prefetch = 0 : i64, scratch_operands = 2 : i64, tpu.core_type = #tpu.core_type<tc>} {
    %c0 = arith.constant 0 : index
    %c0_0 = arith.constant 0 : index
    %0 = vector.load %arg0[%c0, %c0_0] : memref<16x13xf32, #tpu.memory_space<vmem>>, vector<16x13xf32>
    %c0_1 = arith.constant 0 : index
    %c0_2 = arith.constant 0 : index
    %1 = vector.load %arg3[%c0_1, %c0_2] : memref<14x512xf32, #tpu.memory_space<vmem>>, vector<13x512xf32>
    %cst = arith.constant dense<0.000000e+00> : vector<16x512xf32>
    %2 = tpu.matmul %0, %1, %cst {dimension_numbers = #tpu.dot_dimension_numbers<[1], [0], [0], [1], [0, 0, 1, 1], [], []>} : vector<16x13xf32>, vector<13x512xf32>, vector<16x512xf32> -> vector<16x512xf32>
    %c13 = arith.constant 13 : index
    %c0_3 = arith.constant 0 : index
    %3 = vector.load %arg3[%c13, %c0_3] : memref<14x512xf32, #tpu.memory_space<vmem>>, vector<1x512xf32>
    %4 = vector.broadcast %3 : vector<1x512xf32> to vector<16x512xf32>
    %5 = arith.addf %2, %4 : vector<16x512xf32>
    %c0_4 = arith.constant 0 : index
    %c0_5 = arith.constant 0 : index
    %6 = vector.load %arg8[%c0_4, %c0_5] : memref<16x512xf32, #tpu.memory_space<vmem>>, vector<16x512xf32>
    tpu.vector_store %arg8[%c0_4, %c0_5], %5 {strides = array<i32>} : memref<16x512xf32, #tpu.memory_space<vmem>>, vector<16x512xf32>,
    %c192 = arith.constant 192 : index
    %c0_6 = arith.constant 0 : index
    %7 = vector.load %arg4[%c192, %c0_6] : memref<194x64xf32, #tpu.memory_space<vmem>>, vector<1x64xf32>
    %c193 = arith.constant 193 : index
    %c0_7 = arith.constant 0 : index
    %8 = vector.load %arg4[%c193, %c0_7] : memref<194x64xf32, #tpu.memory_space<vmem>>, vector<1x64xf32>
    %c0_8 = arith.constant 0 : index
    %c0_9 = arith.constant 0 : index
    %9 = vector.load %arg1[%c0_8, %c0_9] : memref<4x128xf32, #tpu.memory_space<vmem>>, vector<2x128xf32>
    %c2 = arith.constant 2 : index
    %c0_10 = arith.constant 0 : index
    %10 = vector.load %arg1[%c2, %c0_10] : memref<4x128xf32, #tpu.memory_space<vmem>>, vector<2x128xf32>
    %c0_11 = arith.constant 0 : index
    %c0_12 = arith.constant 0 : index
    %11 = vector.load %arg8[%c0_11, %c0_12] : memref<16x512xf32, #tpu.memory_space<vmem>>, vector<2x512xf32>
    %12 = arith.truncf %9 : vector<2x128xf32> to vector<2x128xbf16>
    %c0_13 = arith.constant 0 : index
    %c0_14 = arith.constant 0 : index
    %13 = vector.load %arg2[%c0_13, %c0_14] : memref<128x512xbf16, #tpu.memory_space<vmem>>, vector<128x512xbf16>
    %cst_15 = arith.constant dense<0.000000e+00> : vector<2x512xf32>
    %14 = tpu.matmul %12, %13, %cst_15 {dimension_numbers = #tpu.dot_dimension_numbers<[1], [0], [0], [1], [0, 0, 1, 1], [], []>} : vector<2x128xbf16>, vector<128x512xbf16>, vector<2x512xf32> -> vector<2x512xf32>
    %15 = arith.addf %11, %14 : vector<2x512xf32>
    %16 = vector.extract_strided_slice %15 {offsets = [0, 0], sizes = [2, 384], strides = [1, 1]} : vector<2x512xf32> to vector<2x384xf32>
    %cst_16 = arith.constant 5.000000e-01 : f32
    %17 = vector.broadcast %cst_16 : f32 to vector<2x384xf32>
    %18 = arith.mulf %17, %16 : vector<2x384xf32>
    %19 = math.tanh %18 : vector<2x384xf32>
    %cst_17 = arith.constant 5.000000e-01 : f32
    %20 = vector.broadcast %cst_17 : f32 to vector<2x384xf32>
    %21 = arith.mulf %20, %19 : vector<2x384xf32>
    %cst_18 = arith.constant 5.000000e-01 : f32
    %22 = vector.broadcast %cst_18 : f32 to vector<2x384xf32>
    %23 = arith.addf %21, %22 : vector<2x384xf32>
    %24 = vector.extract_strided_slice %23 {offsets = [0, 0], sizes = [2, 128], strides = [1, 1]} : vector<2x384xf32> to vector<2x128xf32>
    %25 = vector.extract_strided_slice %23 {offsets = [0, 128], sizes = [2, 128], strides = [1, 1]} : vector<2x384xf32> to vector<2x128xf32>
    %26 = vector.extract_strided_slice %23 {offsets = [0, 256], sizes = [2, 128], strides = [1, 1]} : vector<2x384xf32> to vector<2x128xf32>
    %27 = vector.extract_strided_slice %15 {offsets = [0, 384], sizes = [2, 128], strides = [1, 1]} : vector<2x512xf32> to vector<2x128xf32>
    %28 = math.tanh %27 : vector<2x128xf32>
    %29 = arith.mulf %25, %10 : vector<2x128xf32>
    %30 = arith.mulf %24, %28 : vector<2x128xf32>
    %31 = arith.addf %29, %30 : vector<2x128xf32>
    %32 = math.tanh %31 : vector<2x128xf32>
    %33 = arith.mulf %26, %32 : vector<2x128xf32>
    %c0_19 = arith.constant 0 : index
    %c0_20 = arith.constant 0 : index
    %34 = vector.load %arg4[%c0_19, %c0_20] : memref<194x64xf32, #tpu.memory_space<vmem>>, vector<128x64xf32>
    %cst_21 = arith.constant dense<0.000000e+00> : vector<2x64xf32>
    %35 = tpu.matmul %33, %34, %cst_21 {dimension_numbers = #tpu.dot_dimension_numbers<[1], [0], [0], [1], [0, 0, 1, 1], [], []>} : vector<2x128xf32>, vector<128x64xf32>, vector<2x64xf32> -> vector<2x64xf32>
    %36 = vector.broadcast %7 : vector<1x64xf32> to vector<2x64xf32>
    %37 = arith.addf %35, %36 : vector<2x64xf32>
    %cst_22 = arith.constant 0.000000e+00 : f32
    %38 = vector.broadcast %cst_22 : f32 to vector<2x64xf32>
    %39 = arith.maximumf %37, %38 : vector<2x64xf32>
    %c128 = arith.constant 128 : index
    %c0_23 = arith.constant 0 : index
    %40 = vector.load %arg4[%c128, %c0_23] : memref<194x64xf32, #tpu.memory_space<vmem>>, vector<64x64xf32>
    %cst_24 = arith.constant dense<0.000000e+00> : vector<2x64xf32>
    %41 = tpu.matmul %39, %40, %cst_24 {dimension_numbers = #tpu.dot_dimension_numbers<[1], [0], [0], [1], [0, 0, 1, 1], [], []>} : vector<2x64xf32>, vector<64x64xf32>, vector<2x64xf32> -> vector<2x64xf32>
    %42 = vector.broadcast %8 : vector<1x64xf32> to vector<2x64xf32>
    %43 = arith.addf %41, %42 : vector<2x64xf32>
    %cst_25 = arith.constant 0.000000e+00 : f32
    %44 = vector.broadcast %cst_25 : f32 to vector<2x64xf32>
    %45 = arith.maximumf %43, %44 : vector<2x64xf32>
    %c0_26 = arith.constant 0 : index
    %c0_27 = arith.constant 0 : index
    %46 = vector.load %arg9[%c0_26, %c0_27] : memref<16x64xf32, #tpu.memory_space<vmem>>, vector<2x64xf32>
    tpu.vector_store %arg9[%c0_26, %c0_27], %45 {strides = array<i32>} : memref<16x64xf32, #tpu.memory_space<vmem>>, vector<2x64xf32>,
    %c2_28 = arith.constant 2 : index
    %c0_29 = arith.constant 0 : index
    %47 = vector.load %arg8[%c2_28, %c0_29] : memref<16x512xf32, #tpu.memory_space<vmem>>, vector<2x512xf32>
    %48 = arith.truncf %33 : vector<2x128xf32> to vector<2x128xbf16>
    %c0_30 = arith.constant 0 : index
    %c0_31 = arith.constant 0 : index
    %49 = vector.load %arg2[%c0_30, %c0_31] : memref<128x512xbf16, #tpu.memory_space<vmem>>, vector<128x512xbf16>
    %cst_32 = arith.constant dense<0.000000e+00> : vector<2x512xf32>
    %50 = tpu.matmul %48, %49, %cst_32 {dimension_numbers = #tpu.dot_dimension_numbers<[1], [0], [0], [1], [0, 0, 1, 1], [], []>} : vector<2x128xbf16>, vector<128x512xbf16>, vector<2x512xf32> -> vector<2x512xf32>
    %51 = arith.addf %47, %50 : vector<2x512xf32>
    %52 = vector.extract_strided_slice %51 {offsets = [0, 0], sizes = [2, 384], strides = [1, 1]} : vector<2x512xf32> to vector<2x384xf32>
    %cst_33 = arith.constant 5.000000e-01 : f32
    %53 = vector.broadcast %cst_33 : f32 to vector<2x384xf32>
    %54 = arith.mulf %53, %52 : vector<2x384xf32>
    %55 = math.tanh %54 : vector<2x384xf32>
    %cst_34 = arith.constant 5.000000e-01 : f32
    %56 = vector.broadcast %cst_34 : f32 to vector<2x384xf32>
    %57 = arith.mulf %56, %55 : vector<2x384xf32>
    %cst_35 = arith.constant 5.000000e-01 : f32
    %58 = vector.broadcast %cst_35 : f32 to vector<2x384xf32>
    %59 = arith.addf %57, %58 : vector<2x384xf32>
    %60 = vector.extract_strided_slice %59 {offsets = [0, 0], sizes = [2, 128], strides = [1, 1]} : vector<2x384xf32> to vector<2x128xf32>
    %61 = vector.extract_strided_slice %59 {offsets = [0, 128], sizes = [2, 128], strides = [1, 1]} : vector<2x384xf32> to vector<2x128xf32>
    %62 = vector.extract_strided_slice %59 {offsets = [0, 256], sizes = [2, 128], strides = [1, 1]} : vector<2x384xf32> to vector<2x128xf32>
    %63 = vector.extract_strided_slice %51 {offsets = [0, 384], sizes = [2, 128], strides = [1, 1]} : vector<2x512xf32> to vector<2x128xf32>
    %64 = math.tanh %63 : vector<2x128xf32>
    %65 = arith.mulf %61, %31 : vector<2x128xf32>
    %66 = arith.mulf %60, %64 : vector<2x128xf32>
    %67 = arith.addf %65, %66 : vector<2x128xf32>
    %68 = math.tanh %67 : vector<2x128xf32>
    %69 = arith.mulf %62, %68 : vector<2x128xf32>
    %c0_36 = arith.constant 0 : index
    %c0_37 = arith.constant 0 : index
    %70 = vector.load %arg4[%c0_36, %c0_37] : memref<194x64xf32, #tpu.memory_space<vmem>>, vector<128x64xf32>
    %cst_38 = arith.constant dense<0.000000e+00> : vector<2x64xf32>
    %71 = tpu.matmul %69, %70, %cst_38 {dimension_numbers = #tpu.dot_dimension_numbers<[1], [0], [0], [1], [0, 0, 1, 1], [], []>} : vector<2x128xf32>, vector<128x64xf32>, vector<2x64xf32> -> vector<2x64xf32>
    %72 = vector.broadcast %7 : vector<1x64xf32> to vector<2x64xf32>
    %73 = arith.addf %71, %72 : vector<2x64xf32>
    %cst_39 = arith.constant 0.000000e+00 : f32
    %74 = vector.broadcast %cst_39 : f32 to vector<2x64xf32>
    %75 = arith.maximumf %73, %74 : vector<2x64xf32>
    %c128_40 = arith.constant 128 : index
    %c0_41 = arith.constant 0 : index
    %76 = vector.load %arg4[%c128_40, %c0_41] : memref<194x64xf32, #tpu.memory_space<vmem>>, vector<64x64xf32>
    %cst_42 = arith.constant dense<0.000000e+00> : vector<2x64xf32>
    %77 = tpu.matmul %75, %76, %cst_42 {dimension_numbers = #tpu.dot_dimension_numbers<[1], [0], [0], [1], [0, 0, 1, 1], [], []>} : vector<2x64xf32>, vector<64x64xf32>, vector<2x64xf32> -> vector<2x64xf32>
    %78 = vector.broadcast %8 : vector<1x64xf32> to vector<2x64xf32>
    %79 = arith.addf %77, %78 : vector<2x64xf32>
    %cst_43 = arith.constant 0.000000e+00 : f32
    %80 = vector.broadcast %cst_43 : f32 to vector<2x64xf32>
    %81 = arith.maximumf %79, %80 : vector<2x64xf32>
    %c2_44 = arith.constant 2 : index
    %c0_45 = arith.constant 0 : index
    %82 = vector.load %arg9[%c2_44, %c0_45] : memref<16x64xf32, #tpu.memory_space<vmem>>, vector<2x64xf32>
    tpu.vector_store %arg9[%c2_44, %c0_45], %81 {strides = array<i32>} : memref<16x64xf32, #tpu.memory_space<vmem>>, vector<2x64xf32>,
    %c4 = arith.constant 4 : index
    %c0_46 = arith.constant 0 : index
    %83 = vector.load %arg8[%c4, %c0_46] : memref<16x512xf32, #tpu.memory_space<vmem>>, vector<2x512xf32>
    %84 = arith.truncf %69 : vector<2x128xf32> to vector<2x128xbf16>
    %c0_47 = arith.constant 0 : index
    %c0_48 = arith.constant 0 : index
    %85 = vector.load %arg2[%c0_47, %c0_48] : memref<128x512xbf16, #tpu.memory_space<vmem>>, vector<128x512xbf16>
    %cst_49 = arith.constant dense<0.000000e+00> : vector<2x512xf32>
    %86 = tpu.matmul %84, %85, %cst_49 {dimension_numbers = #tpu.dot_dimension_numbers<[1], [0], [0], [1], [0, 0, 1, 1], [], []>} : vector<2x128xbf16>, vector<128x512xbf16>, vector<2x512xf32> -> vector<2x512xf32>
    %87 = arith.addf %83, %86 : vector<2x512xf32>
    %88 = vector.extract_strided_slice %87 {offsets = [0, 0], sizes = [2, 384], strides = [1, 1]} : vector<2x512xf32> to vector<2x384xf32>
    %cst_50 = arith.constant 5.000000e-01 : f32
    %89 = vector.broadcast %cst_50 : f32 to vector<2x384xf32>
    %90 = arith.mulf %89, %88 : vector<2x384xf32>
    %91 = math.tanh %90 : vector<2x384xf32>
    %cst_51 = arith.constant 5.000000e-01 : f32
    %92 = vector.broadcast %cst_51 : f32 to vector<2x384xf32>
    %93 = arith.mulf %92, %91 : vector<2x384xf32>
    %cst_52 = arith.constant 5.000000e-01 : f32
    %94 = vector.broadcast %cst_52 : f32 to vector<2x384xf32>
    %95 = arith.addf %93, %94 : vector<2x384xf32>
    %96 = vector.extract_strided_slice %95 {offsets = [0, 0], sizes = [2, 128], strides = [1, 1]} : vector<2x384xf32> to vector<2x128xf32>
    %97 = vector.extract_strided_slice %95 {offsets = [0, 128], sizes = [2, 128], strides = [1, 1]} : vector<2x384xf32> to vector<2x128xf32>
    %98 = vector.extract_strided_slice %95 {offsets = [0, 256], sizes = [2, 128], strides = [1, 1]} : vector<2x384xf32> to vector<2x128xf32>
    %99 = vector.extract_strided_slice %87 {offsets = [0, 384], sizes = [2, 128], strides = [1, 1]} : vector<2x512xf32> to vector<2x128xf32>
    %100 = math.tanh %99 : vector<2x128xf32>
    %101 = arith.mulf %97, %67 : vector<2x128xf32>
    %102 = arith.mulf %96, %100 : vector<2x128xf32>
    %103 = arith.addf %101, %102 : vector<2x128xf32>
    %104 = math.tanh %103 : vector<2x128xf32>
    %105 = arith.mulf %98, %104 : vector<2x128xf32>
    %c0_53 = arith.constant 0 : index
    %c0_54 = arith.constant 0 : index
    %106 = vector.load %arg4[%c0_53, %c0_54] : memref<194x64xf32, #tpu.memory_space<vmem>>, vector<128x64xf32>
    %cst_55 = arith.constant dense<0.000000e+00> : vector<2x64xf32>
    %107 = tpu.matmul %105, %106, %cst_55 {dimension_numbers = #tpu.dot_dimension_numbers<[1], [0], [0], [1], [0, 0, 1, 1], [], []>} : vector<2x128xf32>, vector<128x64xf32>, vector<2x64xf32> -> vector<2x64xf32>
    %108 = vector.broadcast %7 : vector<1x64xf32> to vector<2x64xf32>
    %109 = arith.addf %107, %108 : vector<2x64xf32>
    %cst_56 = arith.constant 0.000000e+00 : f32
    %110 = vector.broadcast %cst_56 : f32 to vector<2x64xf32>
    %111 = arith.maximumf %109, %110 : vector<2x64xf32>
    %c128_57 = arith.constant 128 : index
    %c0_58 = arith.constant 0 : index
    %112 = vector.load %arg4[%c128_57, %c0_58] : memref<194x64xf32, #tpu.memory_space<vmem>>, vector<64x64xf32>
    %cst_59 = arith.constant dense<0.000000e+00> : vector<2x64xf32>
    %113 = tpu.matmul %111, %112, %cst_59 {dimension_numbers = #tpu.dot_dimension_numbers<[1], [0], [0], [1], [0, 0, 1, 1], [], []>} : vector<2x64xf32>, vector<64x64xf32>, vector<2x64xf32> -> vector<2x64xf32>
    %114 = vector.broadcast %8 : vector<1x64xf32> to vector<2x64xf32>
    %115 = arith.addf %113, %114 : vector<2x64xf32>
    %cst_60 = arith.constant 0.000000e+00 : f32
    %116 = vector.broadcast %cst_60 : f32 to vector<2x64xf32>
    %117 = arith.maximumf %115, %116 : vector<2x64xf32>
    %c4_61 = arith.constant 4 : index
    %c0_62 = arith.constant 0 : index
    %118 = vector.load %arg9[%c4_61, %c0_62] : memref<16x64xf32, #tpu.memory_space<vmem>>, vector<2x64xf32>
    tpu.vector_store %arg9[%c4_61, %c0_62], %117 {strides = array<i32>} : memref<16x64xf32, #tpu.memory_space<vmem>>, vector<2x64xf32>,
    %c6 = arith.constant 6 : index
    %c0_63 = arith.constant 0 : index
    %119 = vector.load %arg8[%c6, %c0_63] : memref<16x512xf32, #tpu.memory_space<vmem>>, vector<2x512xf32>
    %120 = arith.truncf %105 : vector<2x128xf32> to vector<2x128xbf16>
    %c0_64 = arith.constant 0 : index
    %c0_65 = arith.constant 0 : index
    %121 = vector.load %arg2[%c0_64, %c0_65] : memref<128x512xbf16, #tpu.memory_space<vmem>>, vector<128x512xbf16>
    %cst_66 = arith.constant dense<0.000000e+00> : vector<2x512xf32>
    %122 = tpu.matmul %120, %121, %cst_66 {dimension_numbers = #tpu.dot_dimension_numbers<[1], [0], [0], [1], [0, 0, 1, 1], [], []>} : vector<2x128xbf16>, vector<128x512xbf16>, vector<2x512xf32> -> vector<2x512xf32>
    %123 = arith.addf %119, %122 : vector<2x512xf32>
    %124 = vector.extract_strided_slice %123 {offsets = [0, 0], sizes = [2, 384], strides = [1, 1]} : vector<2x512xf32> to vector<2x384xf32>
    %cst_67 = arith.constant 5.000000e-01 : f32
    %125 = vector.broadcast %cst_67 : f32 to vector<2x384xf32>
    %126 = arith.mulf %125, %124 : vector<2x384xf32>
    %127 = math.tanh %126 : vector<2x384xf32>
    %cst_68 = arith.constant 5.000000e-01 : f32
    %128 = vector.broadcast %cst_68 : f32 to vector<2x384xf32>
    %129 = arith.mulf %128, %127 : vector<2x384xf32>
    %cst_69 = arith.constant 5.000000e-01 : f32
    %130 = vector.broadcast %cst_69 : f32 to vector<2x384xf32>
    %131 = arith.addf %129, %130 : vector<2x384xf32>
    %132 = vector.extract_strided_slice %131 {offsets = [0, 0], sizes = [2, 128], strides = [1, 1]} : vector<2x384xf32> to vector<2x128xf32>
    %133 = vector.extract_strided_slice %131 {offsets = [0, 128], sizes = [2, 128], strides = [1, 1]} : vector<2x384xf32> to vector<2x128xf32>
    %134 = vector.extract_strided_slice %131 {offsets = [0, 256], sizes = [2, 128], strides = [1, 1]} : vector<2x384xf32> to vector<2x128xf32>
    %135 = vector.extract_strided_slice %123 {offsets = [0, 384], sizes = [2, 128], strides = [1, 1]} : vector<2x512xf32> to vector<2x128xf32>
    %136 = math.tanh %135 : vector<2x128xf32>
    %137 = arith.mulf %133, %103 : vector<2x128xf32>
    %138 = arith.mulf %132, %136 : vector<2x128xf32>
    %139 = arith.addf %137, %138 : vector<2x128xf32>
    %140 = math.tanh %139 : vector<2x128xf32>
    %141 = arith.mulf %134, %140 : vector<2x128xf32>
    %c0_70 = arith.constant 0 : index
    %c0_71 = arith.constant 0 : index
    %142 = vector.load %arg4[%c0_70, %c0_71] : memref<194x64xf32, #tpu.memory_space<vmem>>, vector<128x64xf32>
    %cst_72 = arith.constant dense<0.000000e+00> : vector<2x64xf32>
    %143 = tpu.matmul %141, %142, %cst_72 {dimension_numbers = #tpu.dot_dimension_numbers<[1], [0], [0], [1], [0, 0, 1, 1], [], []>} : vector<2x128xf32>, vector<128x64xf32>, vector<2x64xf32> -> vector<2x64xf32>
    %144 = vector.broadcast %7 : vector<1x64xf32> to vector<2x64xf32>
    %145 = arith.addf %143, %144 : vector<2x64xf32>
    %cst_73 = arith.constant 0.000000e+00 : f32
    %146 = vector.broadcast %cst_73 : f32 to vector<2x64xf32>
    %147 = arith.maximumf %145, %146 : vector<2x64xf32>
    %c128_74 = arith.constant 128 : index
    %c0_75 = arith.constant 0 : index
    %148 = vector.load %arg4[%c128_74, %c0_75] : memref<194x64xf32, #tpu.memory_space<vmem>>, vector<64x64xf32>
    %cst_76 = arith.constant dense<0.000000e+00> : vector<2x64xf32>
    %149 = tpu.matmul %147, %148, %cst_76 {dimension_numbers = #tpu.dot_dimension_numbers<[1], [0], [0], [1], [0, 0, 1, 1], [], []>} : vector<2x64xf32>, vector<64x64xf32>, vector<2x64xf32> -> vector<2x64xf32>
    %150 = vector.broadcast %8 : vector<1x64xf32> to vector<2x64xf32>
    %151 = arith.addf %149, %150 : vector<2x64xf32>
    %cst_77 = arith.constant 0.000000e+00 : f32
    %152 = vector.broadcast %cst_77 : f32 to vector<2x64xf32>
    %153 = arith.maximumf %151, %152 : vector<2x64xf32>
    %c6_78 = arith.constant 6 : index
    %c0_79 = arith.constant 0 : index
    %154 = vector.load %arg9[%c6_78, %c0_79] : memref<16x64xf32, #tpu.memory_space<vmem>>, vector<2x64xf32>
    tpu.vector_store %arg9[%c6_78, %c0_79], %153 {strides = array<i32>} : memref<16x64xf32, #tpu.memory_space<vmem>>, vector<2x64xf32>,
    %c8 = arith.constant 8 : index
    %c0_80 = arith.constant 0 : index
    %155 = vector.load %arg8[%c8, %c0_80] : memref<16x512xf32, #tpu.memory_space<vmem>>, vector<2x512xf32>
    %156 = arith.truncf %141 : vector<2x128xf32> to vector<2x128xbf16>
    %c0_81 = arith.constant 0 : index
    %c0_82 = arith.constant 0 : index
    %157 = vector.load %arg2[%c0_81, %c0_82] : memref<128x512xbf16, #tpu.memory_space<vmem>>, vector<128x512xbf16>
    %cst_83 = arith.constant dense<0.000000e+00> : vector<2x512xf32>
    %158 = tpu.matmul %156, %157, %cst_83 {dimension_numbers = #tpu.dot_dimension_numbers<[1], [0], [0], [1], [0, 0, 1, 1], [], []>} : vector<2x128xbf16>, vector<128x512xbf16>, vector<2x512xf32> -> vector<2x512xf32>
    %159 = arith.addf %155, %158 : vector<2x512xf32>
    %160 = vector.extract_strided_slice %159 {offsets = [0, 0], sizes = [2, 384], strides = [1, 1]} : vector<2x512xf32> to vector<2x384xf32>
    %cst_84 = arith.constant 5.000000e-01 : f32
    %161 = vector.broadcast %cst_84 : f32 to vector<2x384xf32>
    %162 = arith.mulf %161, %160 : vector<2x384xf32>
    %163 = math.tanh %162 : vector<2x384xf32>
    %cst_85 = arith.constant 5.000000e-01 : f32
    %164 = vector.broadcast %cst_85 : f32 to vector<2x384xf32>
    %165 = arith.mulf %164, %163 : vector<2x384xf32>
    %cst_86 = arith.constant 5.000000e-01 : f32
    %166 = vector.broadcast %cst_86 : f32 to vector<2x384xf32>
    %167 = arith.addf %165, %166 : vector<2x384xf32>
    %168 = vector.extract_strided_slice %167 {offsets = [0, 0], sizes = [2, 128], strides = [1, 1]} : vector<2x384xf32> to vector<2x128xf32>
    %169 = vector.extract_strided_slice %167 {offsets = [0, 128], sizes = [2, 128], strides = [1, 1]} : vector<2x384xf32> to vector<2x128xf32>
    %170 = vector.extract_strided_slice %167 {offsets = [0, 256], sizes = [2, 128], strides = [1, 1]} : vector<2x384xf32> to vector<2x128xf32>
    %171 = vector.extract_strided_slice %159 {offsets = [0, 384], sizes = [2, 128], strides = [1, 1]} : vector<2x512xf32> to vector<2x128xf32>
    %172 = math.tanh %171 : vector<2x128xf32>
    %173 = arith.mulf %169, %139 : vector<2x128xf32>
    %174 = arith.mulf %168, %172 : vector<2x128xf32>
    %175 = arith.addf %173, %174 : vector<2x128xf32>
    %176 = math.tanh %175 : vector<2x128xf32>
    %177 = arith.mulf %170, %176 : vector<2x128xf32>
    %c0_87 = arith.constant 0 : index
    %c0_88 = arith.constant 0 : index
    %178 = vector.load %arg4[%c0_87, %c0_88] : memref<194x64xf32, #tpu.memory_space<vmem>>, vector<128x64xf32>
    %cst_89 = arith.constant dense<0.000000e+00> : vector<2x64xf32>
    %179 = tpu.matmul %177, %178, %cst_89 {dimension_numbers = #tpu.dot_dimension_numbers<[1], [0], [0], [1], [0, 0, 1, 1], [], []>} : vector<2x128xf32>, vector<128x64xf32>, vector<2x64xf32> -> vector<2x64xf32>
    %180 = vector.broadcast %7 : vector<1x64xf32> to vector<2x64xf32>
    %181 = arith.addf %179, %180 : vector<2x64xf32>
    %cst_90 = arith.constant 0.000000e+00 : f32
    %182 = vector.broadcast %cst_90 : f32 to vector<2x64xf32>
    %183 = arith.maximumf %181, %182 : vector<2x64xf32>
    %c128_91 = arith.constant 128 : index
    %c0_92 = arith.constant 0 : index
    %184 = vector.load %arg4[%c128_91, %c0_92] : memref<194x64xf32, #tpu.memory_space<vmem>>, vector<64x64xf32>
    %cst_93 = arith.constant dense<0.000000e+00> : vector<2x64xf32>
    %185 = tpu.matmul %183, %184, %cst_93 {dimension_numbers = #tpu.dot_dimension_numbers<[1], [0], [0], [1], [0, 0, 1, 1], [], []>} : vector<2x64xf32>, vector<64x64xf32>, vector<2x64xf32> -> vector<2x64xf32>
    %186 = vector.broadcast %8 : vector<1x64xf32> to vector<2x64xf32>
    %187 = arith.addf %185, %186 : vector<2x64xf32>
    %cst_94 = arith.constant 0.000000e+00 : f32
    %188 = vector.broadcast %cst_94 : f32 to vector<2x64xf32>
    %189 = arith.maximumf %187, %188 : vector<2x64xf32>
    %c8_95 = arith.constant 8 : index
    %c0_96 = arith.constant 0 : index
    %190 = vector.load %arg9[%c8_95, %c0_96] : memref<16x64xf32, #tpu.memory_space<vmem>>, vector<2x64xf32>
    tpu.vector_store %arg9[%c8_95, %c0_96], %189 {strides = array<i32>} : memref<16x64xf32, #tpu.memory_space<vmem>>, vector<2x64xf32>,
    %c10 = arith.constant 10 : index
    %c0_97 = arith.constant 0 : index
    %191 = vector.load %arg8[%c10, %c0_97] : memref<16x512xf32, #tpu.memory_space<vmem>>, vector<2x512xf32>
    %192 = arith.truncf %177 : vector<2x128xf32> to vector<2x128xbf16>
    %c0_98 = arith.constant 0 : index
    %c0_99 = arith.constant 0 : index
    %193 = vector.load %arg2[%c0_98, %c0_99] : memref<128x512xbf16, #tpu.memory_space<vmem>>, vector<128x512xbf16>
    %cst_100 = arith.constant dense<0.000000e+00> : vector<2x512xf32>
    %194 = tpu.matmul %192, %193, %cst_100 {dimension_numbers = #tpu.dot_dimension_numbers<[1], [0], [0], [1], [0, 0, 1, 1], [], []>} : vector<2x128xbf16>, vector<128x512xbf16>, vector<2x512xf32> -> vector<2x512xf32>
    %195 = arith.addf %191, %194 : vector<2x512xf32>
    %196 = vector.extract_strided_slice %195 {offsets = [0, 0], sizes = [2, 384], strides = [1, 1]} : vector<2x512xf32> to vector<2x384xf32>
    %cst_101 = arith.constant 5.000000e-01 : f32
    %197 = vector.broadcast %cst_101 : f32 to vector<2x384xf32>
    %198 = arith.mulf %197, %196 : vector<2x384xf32>
    %199 = math.tanh %198 : vector<2x384xf32>
    %cst_102 = arith.constant 5.000000e-01 : f32
    %200 = vector.broadcast %cst_102 : f32 to vector<2x384xf32>
    %201 = arith.mulf %200, %199 : vector<2x384xf32>
    %cst_103 = arith.constant 5.000000e-01 : f32
    %202 = vector.broadcast %cst_103 : f32 to vector<2x384xf32>
    %203 = arith.addf %201, %202 : vector<2x384xf32>
    %204 = vector.extract_strided_slice %203 {offsets = [0, 0], sizes = [2, 128], strides = [1, 1]} : vector<2x384xf32> to vector<2x128xf32>
    %205 = vector.extract_strided_slice %203 {offsets = [0, 128], sizes = [2, 128], strides = [1, 1]} : vector<2x384xf32> to vector<2x128xf32>
    %206 = vector.extract_strided_slice %203 {offsets = [0, 256], sizes = [2, 128], strides = [1, 1]} : vector<2x384xf32> to vector<2x128xf32>
    %207 = vector.extract_strided_slice %195 {offsets = [0, 384], sizes = [2, 128], strides = [1, 1]} : vector<2x512xf32> to vector<2x128xf32>
    %208 = math.tanh %207 : vector<2x128xf32>
    %209 = arith.mulf %205, %175 : vector<2x128xf32>
    %210 = arith.mulf %204, %208 : vector<2x128xf32>
    %211 = arith.addf %209, %210 : vector<2x128xf32>
    %212 = math.tanh %211 : vector<2x128xf32>
    %213 = arith.mulf %206, %212 : vector<2x128xf32>
    %c0_104 = arith.constant 0 : index
    %c0_105 = arith.constant 0 : index
    %214 = vector.load %arg4[%c0_104, %c0_105] : memref<194x64xf32, #tpu.memory_space<vmem>>, vector<128x64xf32>
    %cst_106 = arith.constant dense<0.000000e+00> : vector<2x64xf32>
    %215 = tpu.matmul %213, %214, %cst_106 {dimension_numbers = #tpu.dot_dimension_numbers<[1], [0], [0], [1], [0, 0, 1, 1], [], []>} : vector<2x128xf32>, vector<128x64xf32>, vector<2x64xf32> -> vector<2x64xf32>
    %216 = vector.broadcast %7 : vector<1x64xf32> to vector<2x64xf32>
    %217 = arith.addf %215, %216 : vector<2x64xf32>
    %cst_107 = arith.constant 0.000000e+00 : f32
    %218 = vector.broadcast %cst_107 : f32 to vector<2x64xf32>
    %219 = arith.maximumf %217, %218 : vector<2x64xf32>
    %c128_108 = arith.constant 128 : index
    %c0_109 = arith.constant 0 : index
    %220 = vector.load %arg4[%c128_108, %c0_109] : memref<194x64xf32, #tpu.memory_space<vmem>>, vector<64x64xf32>
    %cst_110 = arith.constant dense<0.000000e+00> : vector<2x64xf32>
    %221 = tpu.matmul %219, %220, %cst_110 {dimension_numbers = #tpu.dot_dimension_numbers<[1], [0], [0], [1], [0, 0, 1, 1], [], []>} : vector<2x64xf32>, vector<64x64xf32>, vector<2x64xf32> -> vector<2x64xf32>
    %222 = vector.broadcast %8 : vector<1x64xf32> to vector<2x64xf32>
    %223 = arith.addf %221, %222 : vector<2x64xf32>
    %cst_111 = arith.constant 0.000000e+00 : f32
    %224 = vector.broadcast %cst_111 : f32 to vector<2x64xf32>
    %225 = arith.maximumf %223, %224 : vector<2x64xf32>
    %c10_112 = arith.constant 10 : index
    %c0_113 = arith.constant 0 : index
    %226 = vector.load %arg9[%c10_112, %c0_113] : memref<16x64xf32, #tpu.memory_space<vmem>>, vector<2x64xf32>
    tpu.vector_store %arg9[%c10_112, %c0_113], %225 {strides = array<i32>} : memref<16x64xf32, #tpu.memory_space<vmem>>, vector<2x64xf32>,
    %c12 = arith.constant 12 : index
    %c0_114 = arith.constant 0 : index
    %227 = vector.load %arg8[%c12, %c0_114] : memref<16x512xf32, #tpu.memory_space<vmem>>, vector<2x512xf32>
    %228 = arith.truncf %213 : vector<2x128xf32> to vector<2x128xbf16>
    %c0_115 = arith.constant 0 : index
    %c0_116 = arith.constant 0 : index
    %229 = vector.load %arg2[%c0_115, %c0_116] : memref<128x512xbf16, #tpu.memory_space<vmem>>, vector<128x512xbf16>
    %cst_117 = arith.constant dense<0.000000e+00> : vector<2x512xf32>
    %230 = tpu.matmul %228, %229, %cst_117 {dimension_numbers = #tpu.dot_dimension_numbers<[1], [0], [0], [1], [0, 0, 1, 1], [], []>} : vector<2x128xbf16>, vector<128x512xbf16>, vector<2x512xf32> -> vector<2x512xf32>
    %231 = arith.addf %227, %230 : vector<2x512xf32>
    %232 = vector.extract_strided_slice %231 {offsets = [0, 0], sizes = [2, 384], strides = [1, 1]} : vector<2x512xf32> to vector<2x384xf32>
    %cst_118 = arith.constant 5.000000e-01 : f32
    %233 = vector.broadcast %cst_118 : f32 to vector<2x384xf32>
    %234 = arith.mulf %233, %232 : vector<2x384xf32>
    %235 = math.tanh %234 : vector<2x384xf32>
    %cst_119 = arith.constant 5.000000e-01 : f32
    %236 = vector.broadcast %cst_119 : f32 to vector<2x384xf32>
    %237 = arith.mulf %236, %235 : vector<2x384xf32>
    %cst_120 = arith.constant 5.000000e-01 : f32
    %238 = vector.broadcast %cst_120 : f32 to vector<2x384xf32>
    %239 = arith.addf %237, %238 : vector<2x384xf32>
    %240 = vector.extract_strided_slice %239 {offsets = [0, 0], sizes = [2, 128], strides = [1, 1]} : vector<2x384xf32> to vector<2x128xf32>
    %241 = vector.extract_strided_slice %239 {offsets = [0, 128], sizes = [2, 128], strides = [1, 1]} : vector<2x384xf32> to vector<2x128xf32>
    %242 = vector.extract_strided_slice %239 {offsets = [0, 256], sizes = [2, 128], strides = [1, 1]} : vector<2x384xf32> to vector<2x128xf32>
    %243 = vector.extract_strided_slice %231 {offsets = [0, 384], sizes = [2, 128], strides = [1, 1]} : vector<2x512xf32> to vector<2x128xf32>
    %244 = math.tanh %243 : vector<2x128xf32>
    %245 = arith.mulf %241, %211 : vector<2x128xf32>
    %246 = arith.mulf %240, %244 : vector<2x128xf32>
    %247 = arith.addf %245, %246 : vector<2x128xf32>
    %248 = math.tanh %247 : vector<2x128xf32>
    %249 = arith.mulf %242, %248 : vector<2x128xf32>
    %c0_121 = arith.constant 0 : index
    %c0_122 = arith.constant 0 : index
    %250 = vector.load %arg4[%c0_121, %c0_122] : memref<194x64xf32, #tpu.memory_space<vmem>>, vector<128x64xf32>
    %cst_123 = arith.constant dense<0.000000e+00> : vector<2x64xf32>
    %251 = tpu.matmul %249, %250, %cst_123 {dimension_numbers = #tpu.dot_dimension_numbers<[1], [0], [0], [1], [0, 0, 1, 1], [], []>} : vector<2x128xf32>, vector<128x64xf32>, vector<2x64xf32> -> vector<2x64xf32>
    %252 = vector.broadcast %7 : vector<1x64xf32> to vector<2x64xf32>
    %253 = arith.addf %251, %252 : vector<2x64xf32>
    %cst_124 = arith.constant 0.000000e+00 : f32
    %254 = vector.broadcast %cst_124 : f32 to vector<2x64xf32>
    %255 = arith.maximumf %253, %254 : vector<2x64xf32>
    %c128_125 = arith.constant 128 : index
    %c0_126 = arith.constant 0 : index
    %256 = vector.load %arg4[%c128_125, %c0_126] : memref<194x64xf32, #tpu.memory_space<vmem>>, vector<64x64xf32>
    %cst_127 = arith.constant dense<0.000000e+00> : vector<2x64xf32>
    %257 = tpu.matmul %255, %256, %cst_127 {dimension_numbers = #tpu.dot_dimension_numbers<[1], [0], [0], [1], [0, 0, 1, 1], [], []>} : vector<2x64xf32>, vector<64x64xf32>, vector<2x64xf32> -> vector<2x64xf32>
    %258 = vector.broadcast %8 : vector<1x64xf32> to vector<2x64xf32>
    %259 = arith.addf %257, %258 : vector<2x64xf32>
    %cst_128 = arith.constant 0.000000e+00 : f32
    %260 = vector.broadcast %cst_128 : f32 to vector<2x64xf32>
    %261 = arith.maximumf %259, %260 : vector<2x64xf32>
    %c12_129 = arith.constant 12 : index
    %c0_130 = arith.constant 0 : index
    %262 = vector.load %arg9[%c12_129, %c0_130] : memref<16x64xf32, #tpu.memory_space<vmem>>, vector<2x64xf32>
    tpu.vector_store %arg9[%c12_129, %c0_130], %261 {strides = array<i32>} : memref<16x64xf32, #tpu.memory_space<vmem>>, vector<2x64xf32>,
    %c14 = arith.constant 14 : index
    %c0_131 = arith.constant 0 : index
    %263 = vector.load %arg8[%c14, %c0_131] : memref<16x512xf32, #tpu.memory_space<vmem>>, vector<2x512xf32>
    %264 = arith.truncf %249 : vector<2x128xf32> to vector<2x128xbf16>
    %c0_132 = arith.constant 0 : index
    %c0_133 = arith.constant 0 : index
    %265 = vector.load %arg2[%c0_132, %c0_133] : memref<128x512xbf16, #tpu.memory_space<vmem>>, vector<128x512xbf16>
    %cst_134 = arith.constant dense<0.000000e+00> : vector<2x512xf32>
    %266 = tpu.matmul %264, %265, %cst_134 {dimension_numbers = #tpu.dot_dimension_numbers<[1], [0], [0], [1], [0, 0, 1, 1], [], []>} : vector<2x128xbf16>, vector<128x512xbf16>, vector<2x512xf32> -> vector<2x512xf32>
    %267 = arith.addf %263, %266 : vector<2x512xf32>
    %268 = vector.extract_strided_slice %267 {offsets = [0, 0], sizes = [2, 384], strides = [1, 1]} : vector<2x512xf32> to vector<2x384xf32>
    %cst_135 = arith.constant 5.000000e-01 : f32
    %269 = vector.broadcast %cst_135 : f32 to vector<2x384xf32>
    %270 = arith.mulf %269, %268 : vector<2x384xf32>
    %271 = math.tanh %270 : vector<2x384xf32>
    %cst_136 = arith.constant 5.000000e-01 : f32
    %272 = vector.broadcast %cst_136 : f32 to vector<2x384xf32>
    %273 = arith.mulf %272, %271 : vector<2x384xf32>
    %cst_137 = arith.constant 5.000000e-01 : f32
    %274 = vector.broadcast %cst_137 : f32 to vector<2x384xf32>
    %275 = arith.addf %273, %274 : vector<2x384xf32>
    %276 = vector.extract_strided_slice %275 {offsets = [0, 0], sizes = [2, 128], strides = [1, 1]} : vector<2x384xf32> to vector<2x128xf32>
    %277 = vector.extract_strided_slice %275 {offsets = [0, 128], sizes = [2, 128], strides = [1, 1]} : vector<2x384xf32> to vector<2x128xf32>
    %278 = vector.extract_strided_slice %275 {offsets = [0, 256], sizes = [2, 128], strides = [1, 1]} : vector<2x384xf32> to vector<2x128xf32>
    %279 = vector.extract_strided_slice %267 {offsets = [0, 384], sizes = [2, 128], strides = [1, 1]} : vector<2x512xf32> to vector<2x128xf32>
    %280 = math.tanh %279 : vector<2x128xf32>
    %281 = arith.mulf %277, %247 : vector<2x128xf32>
    %282 = arith.mulf %276, %280 : vector<2x128xf32>
    %283 = arith.addf %281, %282 : vector<2x128xf32>
    %284 = math.tanh %283 : vector<2x128xf32>
    %285 = arith.mulf %278, %284 : vector<2x128xf32>
    %c0_138 = arith.constant 0 : index
    %c0_139 = arith.constant 0 : index
    %286 = vector.load %arg4[%c0_138, %c0_139] : memref<194x64xf32, #tpu.memory_space<vmem>>, vector<128x64xf32>
    %cst_140 = arith.constant dense<0.000000e+00> : vector<2x64xf32>
    %287 = tpu.matmul %285, %286, %cst_140 {dimension_numbers = #tpu.dot_dimension_numbers<[1], [0], [0], [1], [0, 0, 1, 1], [], []>} : vector<2x128xf32>, vector<128x64xf32>, vector<2x64xf32> -> vector<2x64xf32>
    %288 = vector.broadcast %7 : vector<1x64xf32> to vector<2x64xf32>
    %289 = arith.addf %287, %288 : vector<2x64xf32>
    %cst_141 = arith.constant 0.000000e+00 : f32
    %290 = vector.broadcast %cst_141 : f32 to vector<2x64xf32>
    %291 = arith.maximumf %289, %290 : vector<2x64xf32>
    %c128_142 = arith.constant 128 : index
    %c0_143 = arith.constant 0 : index
    %292 = vector.load %arg4[%c128_142, %c0_143] : memref<194x64xf32, #tpu.memory_space<vmem>>, vector<64x64xf32>
    %cst_144 = arith.constant dense<0.000000e+00> : vector<2x64xf32>
    %293 = tpu.matmul %291, %292, %cst_144 {dimension_numbers = #tpu.dot_dimension_numbers<[1], [0], [0], [1], [0, 0, 1, 1], [], []>} : vector<2x64xf32>, vector<64x64xf32>, vector<2x64xf32> -> vector<2x64xf32>
    %294 = vector.broadcast %8 : vector<1x64xf32> to vector<2x64xf32>
    %295 = arith.addf %293, %294 : vector<2x64xf32>
    %cst_145 = arith.constant 0.000000e+00 : f32
    %296 = vector.broadcast %cst_145 : f32 to vector<2x64xf32>
    %297 = arith.maximumf %295, %296 : vector<2x64xf32>
    %c14_146 = arith.constant 14 : index
    %c0_147 = arith.constant 0 : index
    %298 = vector.load %arg9[%c14_146, %c0_147] : memref<16x64xf32, #tpu.memory_space<vmem>>, vector<2x64xf32>
    tpu.vector_store %arg9[%c14_146, %c0_147], %297 {strides = array<i32>} : memref<16x64xf32, #tpu.memory_space<vmem>>, vector<2x64xf32>,
    %c0_148 = arith.constant 0 : index
    %c0_149 = arith.constant 0 : index
    %299 = vector.load %arg7[%c0_148, %c0_149] : memref<4x128xf32, #tpu.memory_space<vmem>>, vector<2x128xf32>
    tpu.vector_store %arg7[%c0_148, %c0_149], %285 {strides = array<i32>} : memref<4x128xf32, #tpu.memory_space<vmem>>, vector<2x128xf32>,
    %c2_150 = arith.constant 2 : index
    %c0_151 = arith.constant 0 : index
    %300 = vector.load %arg7[%c2_150, %c0_151] : memref<4x128xf32, #tpu.memory_space<vmem>>, vector<2x128xf32>
    tpu.vector_store %arg7[%c2_150, %c0_151], %283 {strides = array<i32>} : memref<4x128xf32, #tpu.memory_space<vmem>>, vector<2x128xf32>,
    %c0_152 = arith.constant 0 : index
    %c0_153 = arith.constant 0 : index
    %301 = vector.load %arg9[%c0_152, %c0_153] : memref<16x64xf32, #tpu.memory_space<vmem>>, vector<16x64xf32>
    %c0_154 = arith.constant 0 : index
    %c0_155 = arith.constant 0 : index
    %302 = vector.load %arg5[%c0_154, %c0_155] : memref<65x128xf32, #tpu.memory_space<vmem>>, vector<64x128xf32>
    %cst_156 = arith.constant dense<0.000000e+00> : vector<16x128xf32>
    %303 = tpu.matmul %301, %302, %cst_156 {dimension_numbers = #tpu.dot_dimension_numbers<[1], [0], [0], [1], [0, 0, 1, 1], [], []>} : vector<16x64xf32>, vector<64x128xf32>, vector<16x128xf32> -> vector<16x128xf32>
    %c64 = arith.constant 64 : index
    %c0_157 = arith.constant 0 : index
    %304 = vector.load %arg5[%c64, %c0_157] : memref<65x128xf32, #tpu.memory_space<vmem>>, vector<1x128xf32>
    %305 = vector.broadcast %304 : vector<1x128xf32> to vector<16x128xf32>
    %306 = arith.addf %303, %305 : vector<16x128xf32>
    %307 = math.tanh %306 : vector<16x128xf32>
    %c0_158 = arith.constant 0 : index
    %c0_159 = arith.constant 0 : index
    %308 = vector.load %arg6[%c0_158, %c0_159] : memref<16x128xf32, #tpu.memory_space<vmem>>, vector<16x128xf32>
    tpu.vector_store %arg6[%c0_158, %c0_159], %307 {strides = array<i32>} : memref<16x128xf32, #tpu.memory_space<vmem>>, vector<16x128xf32>,
    return
  }
}

</mosaic_0001>

<bundles_post_ra>
// kernel: recurrent_ppo_forward.1
= control target key start
LH: loop header
LB: loop body
LE: loop exit
PB: predicated region body
PF: predicated region fallthrough
CT: control target
= control target key end

     0   :  { %13 = vsyncpa [#allocation5], 0  ;;  %s4522_s27 = smov [#allocation4]   ;;  %s4523_s29 = smov 512   ;;  %s6789_s0 = inlined_call_operand.vmem [shape: f32[16,13], index: 0, kind: input, shape index: {}]   ;;  %s6790_s1 = inlined_call_operand.vmem [shape: f32[4,128], index: 1, kind: input, shape index: {}]   ;;  %s6791_s2 = inlined_call_operand.vmem [shape: bf16[128,512], index: 2, kind: input, shape index: {}]   ;;  %s6792_s3 = inlined_call_operand.hbm [shape: f32[14,512], index: 3, kind: input, shape index: {}]   ;;  %s6793_s4 = inlined_call_operand.vmem [shape: f32[194,64], index: 4, kind: input, shape index: {}]   ;;  %s6794_s5 = inlined_call_operand.vmem [shape: f32[65,128], index: 5, kind: input, shape index: {}]   ;;  %s6795_s6 = inlined_call_operand.vmem [shape: f32[16,128], index: 6, kind: output, shape index: {0}]   ;;  %s6796_s7 = inlined_call_operand.vmem [shape: f32[4,128], index: 7, kind: output, shape index: {1}]  }
   0x1   :  { %s24_s26 = sshll.u32 %s6792_s3, 4  ;;  %s26_s28 = sshll.u32 %s4522_s27, 4  ;;  %s25_s26 = int_to_ptr.hbm [resolvable:$true] %s24_s26  ;;  %s27_s28 = int_to_ptr.vmem [resolvable:$true] %s26_s28 }
   0x2   :  { %s4524_s30 = smov 32  }
   0x3   :  { %32 = dma.hbm_to_vmem [thread:$0]  %s25_s26, 1024, %s27_s28, [#allocation5], %s4523_s29, %s4523_s29, %s4524_s30  }
   0x4   :  { %4520 = dma.done.wait [#allocation5], 1024  }
   0x5   :  { %4521 = vsyncadd [#allocation5], 4294966272  ;;  %vm69_vm0 = vcmask 1044480   ;;  %v47_v0 = vld [vmem:[#allocation4 + $0x20] sm:$0x1f]  ;;  %v44_v5 = vld [vmem:[#allocation4 + $0x8] sm:$0xff] }
   0x6   :  { %v48_v1 = vld [vmem:[#allocation4 + $0x28] sm:$0x1f]  ;;  %v49_v2 = vld [vmem:[#allocation4 + $0x30] sm:$0x1f]  ;;  %3100 = vmatpush.msk.msra.mxu0 %vm69_vm0, %v47_v0  ;;  %v50_v3 = vld [vmem:[#allocation4 + $0x38] sm:$0x1f] }
   0x7   :  { %3103 = vmatpush.msk.msra.mxu1 %vm69_vm0, %v48_v1  ;;  %v43_v4 = vld [vmem:[#allocation4] sm:$0xff]  ;;  %3106 = vmatpush.msk.msra.mxu2 %vm69_vm0, %v49_v2  ;;  %v45_v6 = vld [vmem:[#allocation4 + $0x10] sm:$0xff]  ;;  %v46_v7 = vld [vmem:[#allocation4 + $0x18] sm:$0xff]  ;;  %vm62_vm1 = vcmask 105472   ;;  %vm504_vm2 = vcmask 523264   ;;  %vm529_vm3 = vcmask 517120  }
   0x8   :  { %3109 = vmatpush.msk.msra.mxu3 %vm69_vm0, %v50_v3  ;;  %v3226_v8 = vld [vmem:[%s6791_s2 + $0xe0] sm:$0xf]  ;;  %97 = vmatpush.msra.mxu0 %v43_v4  ;;  %v4176_v9 = vld [vmem:[%s6791_s2 + $0xec] sm:$0xf0]  ;;  %v4174_v10 = vld [vmem:[%s6791_s2 + $0xe4] sm:$0xf] }
   0x9   :  { %120 = vmatpush.msra.mxu1 %v44_v5  ;;  %v3228_v11 = vld [vmem:[%s6791_s2 + $0xf0] sm:$0xf0]  ;;  %143 = vmatpush.msra.mxu2 %v45_v6  ;;  %v3227_v12 = vor.u32 %v4176_v9, %v3226_v8  ;;  %v3234_v14 = vld [vmem:[%s6791_s2 + $0xe8] sm:$0xf]  ;;  %v4177_v15 = vld [vmem:[%s6791_s2 + $0xf4] sm:$0xf0] }
   0xa   :  { %166 = vmatpush.msra.mxu3 %v46_v7  ;;  %v3231_v13 = vor.u32 %v4174_v10, %v3228_v11  ;;  %v4175_v16 = vld [vmem:[%s6791_s2 + $0xec] sm:$0xf]  ;;  %v3235_v17 = vor.u32 %v4177_v15, %v3234_v14  ;;  %v3236_v18 = vld [vmem:[%s6791_s2 + $0xf8] sm:$0xf0]  ;;  %v3210_v19 = vld [vmem:[%s6791_s2 + $0xc0] sm:$0xf] }
   0xb   :  { %v4172_v20 = vld [vmem:[%s6791_s2 + $0xcc] sm:$0xf0]  ;;  %383 = vmatpush.bf16.msrb.mxu0 %v3227_v12  ;;  %v3239_v21 = vor.u32 %v4175_v16, %v3236_v18  ;;  %v4170_v23 = vld [vmem:[%s6791_s2 + $0xc4] sm:$0xf]  ;;  %v3212_v24 = vld [vmem:[%s6791_s2 + $0xd0] sm:$0xf0] }
   0xc   :  { %396 = vmatpush.bf16.msrb.mxu1 %v3231_v13  ;;  %v3211_v22 = vor.u32 %v4172_v20, %v3210_v19  ;;  %v3218_v25 = vld [vmem:[%s6791_s2 + $0xc8] sm:$0xf]  ;;  %409 = vmatpush.bf16.msrb.mxu2 %v3235_v17  ;;  %v3215_v26 = vor.u32 %v4170_v23, %v3212_v24  ;;  %v4173_v27 = vld [vmem:[%s6791_s2 + $0xd4] sm:$0xf0]  ;;  %v4171_v28 = vld [vmem:[%s6791_s2 + $0xcc] sm:$0xf] }
   0xd   :  { %v3220_v29 = vld [vmem:[%s6791_s2 + $0xd8] sm:$0xf0]  ;;  %422 = vmatpush.bf16.msrb.mxu3 %v3239_v21  ;;  %v3219_v30 = vor.u32 %v4173_v27, %v3218_v25  ;;  %v3194_v32 = vld [vmem:[%s6791_s2 + $0xa0] sm:$0xf]  ;;  %v4168_v33 = vld [vmem:[%s6791_s2 + $0xac] sm:$0xf0] }
   0xe   :  { %v3223_v31 = vor.u32 %v4171_v28, %v3220_v29  ;;  %v4166_v34 = vld [vmem:[%s6791_s2 + $0xa4] sm:$0xf]  ;;  %v3196_v35 = vld [vmem:[%s6791_s2 + $0xb0] sm:$0xf0]  ;;  %v3202_v36 = vld [vmem:[%s6791_s2 + $0xa8] sm:$0xf]  ;;  %v3195_v38 = vor.u32 %v4168_v33, %v3194_v32 }
   0xf   :  { %v4169_v37 = vld [vmem:[%s6791_s2 + $0xb4] sm:$0xf0]  ;;  %384 = vmatpush.bf16.msrb.mxu0 %v3211_v22  ;;  %v3199_v39 = vor.u32 %v4166_v34, %v3196_v35  ;;  %v4167_v40 = vld [vmem:[%s6791_s2 + $0xac] sm:$0xf]  ;;  %v3204_v41 = vld [vmem:[%s6791_s2 + $0xb8] sm:$0xf0] }
  0x10   :  { %397 = vmatpush.bf16.msrb.mxu1 %v3215_v26  ;;  %v3178_v42 = vld [vmem:[%s6791_s2 + $0x80] sm:$0xf]  ;;  %410 = vmatpush.bf16.msrb.mxu2 %v3219_v30  ;;  %v3203_v43 = vor.u32 %v4169_v37, %v3202_v36  ;;  %v4164_v44 = vld [vmem:[%s6791_s2 + $0x8c] sm:$0xf0]  ;;  %v4162_v45 = vld [vmem:[%s6791_s2 + $0x84] sm:$0xf]  ;;  %v3207_v47 = vor.u32 %v4167_v40, %v3204_v41 }
  0x11   :  { %v3180_v46 = vld [vmem:[%s6791_s2 + $0x90] sm:$0xf0]  ;;  %423 = vmatpush.bf16.msrb.mxu3 %v3223_v31  ;;  %v3186_v48 = vld [vmem:[%s6791_s2 + $0x88] sm:$0xf]  ;;  %v4165_v49 = vld [vmem:[%s6791_s2 + $0x94] sm:$0xf0]  ;;  %v3179_v53 = vor.u32 %v4164_v44, %v3178_v42 }
  0x12   :  { %v4163_v50 = vld [vmem:[%s6791_s2 + $0x8c] sm:$0xf]  ;;  %v3188_v51 = vld [vmem:[%s6791_s2 + $0x98] sm:$0xf0]  ;;  %v41_v52 = vld [vmem:[%s6789_s0] sm:$0xff]  ;;  %v3183_v54 = vor.u32 %v4162_v45, %v3180_v46  ;;  %v3187_v56 = vor.u32 %v4165_v49, %v3186_v48 }
  0x13   :  { %385 = vmatpush.bf16.msrb.mxu0 %v3195_v38  ;;  %v3162_v55 = vld [vmem:[%s6791_s2 + $0x60] sm:$0xf]  ;;  %v4160_v57 = vld [vmem:[%s6791_s2 + $0x6c] sm:$0xf0]  ;;  %v4158_v58 = vld [vmem:[%s6791_s2 + $0x64] sm:$0xf]  ;;  %v3191_v60 = vor.u32 %v4163_v50, %v3188_v51  ;;  %3104 = vmatmul.msk.f32.vlgmr.msra.gmra.mxu1 %vm62_vm1, %v41_v52 }
  0x14   :  { %398 = vmatpush.bf16.msrb.mxu1 %v3199_v39  ;;  %411 = vmatpush.bf16.msrb.mxu2 %v3203_v43  ;;  %v3164_v59 = vld [vmem:[%s6791_s2 + $0x70] sm:$0xf0]  ;;  %v3170_v61 = vld [vmem:[%s6791_s2 + $0x68] sm:$0xf]  ;;  %v4161_v62 = vld [vmem:[%s6791_s2 + $0x74] sm:$0xf0]  ;;  %v3163_v1 = vor.u32 %v4160_v57, %v3162_v55 }
  0x15   :  { %3101 = vmatmul.msk.f32.vlgmr.msra.gmra.mxu0 %vm62_vm1, %v41_v52  ;;  %424 = vmatpush.bf16.msrb.mxu3 %v3207_v47  ;;  %v4159_v63 = vld [vmem:[%s6791_s2 + $0x6c] sm:$0xf]  ;;  %v3172_v0 = vld [vmem:[%s6791_s2 + $0x78] sm:$0xf0]  ;;  %v3167_v2 = vor.u32 %v4158_v58, %v3164_v59  ;;  %v3146_v3 = vld [vmem:[%s6791_s2 + $0x40] sm:$0xf]  ;;  %v3171_v4 = vor.u32 %v4161_v62, %v3170_v61 }
  0x16   :  { %3107 = vmatmul.msk.f32.vlgmr.msra.gmra.mxu2 %vm62_vm1, %v41_v52  ;;  %3110 = vmatmul.msk.f32.vlgmr.msra.gmra.mxu3 %vm62_vm1, %v41_v52  ;;  %v4156_v5 = vld [vmem:[%s6791_s2 + $0x4c] sm:$0xf0]  ;;  %v4154_v6 = vld [vmem:[%s6791_s2 + $0x44] sm:$0xf]  ;;  %v3148_v7 = vld [vmem:[%s6791_s2 + $0x50] sm:$0xf0]  ;;  %v3175_v8 = vor.u32 %v4159_v63, %v3172_v0 }
  0x17   :  { %386 = vmatpush.bf16.msrb.mxu0 %v3179_v53  ;;  %v3154_v9 = vld [vmem:[%s6791_s2 + $0x48] sm:$0xf]  ;;  %v4157_v10 = vld [vmem:[%s6791_s2 + $0x54] sm:$0xf0]  ;;  %v4155_v12 = vld [vmem:[%s6791_s2 + $0x4c] sm:$0xf]  ;;  %v3147_v14 = vor.u32 %v4156_v5, %v3146_v3  ;;  %v3151_v15 = vor.u32 %v4154_v6, %v3148_v7 }
  0x18   :  { %399 = vmatpush.bf16.msrb.mxu1 %v3183_v54  ;;  %412 = vmatpush.bf16.msrb.mxu2 %v3187_v56  ;;  %v42_v11 = vld [vmem:[%s6789_s0 + $0x8] sm:$0xff]  ;;  %v3156_v13 = vld [vmem:[%s6791_s2 + $0x58] sm:$0xf0]  ;;  %v3130_v16 = vld [vmem:[%s6791_s2 + $0x20] sm:$0xf]  ;;  %v3155_v17 = vor.u32 %v4157_v10, %v3154_v9 }
  0x19   :  { %425 = vmatpush.bf16.msrb.mxu3 %v3191_v60  ;;  %v4152_v18 = vld [vmem:[%s6791_s2 + $0x2c] sm:$0xf0]  ;;  %v4150_v19 = vld [vmem:[%s6791_s2 + $0x24] sm:$0xf]  ;;  %v3132_v20 = vld [vmem:[%s6791_s2 + $0x30] sm:$0xf0]  ;;  %v3159_v21 = vor.u32 %v4155_v12, %v3156_v13 }
  0x1a   :  { %v3138_v22 = vld [vmem:[%s6791_s2 + $0x28] sm:$0xf]  ;;  %v4153_v23 = vld [vmem:[%s6791_s2 + $0x34] sm:$0xf0]  ;;  %v4151_v24 = vld [vmem:[%s6791_s2 + $0x2c] sm:$0xf]  ;;  %v3131_v26 = vor.u32 %v4152_v18, %v3130_v16  ;;  %v3135_v27 = vor.u32 %v4150_v19, %v3132_v20 }
  0x1b   :  { %387 = vmatpush.bf16.msrb.mxu0 %v3163_v1  ;;  %3105 = vmatmul.msk.f32.gmra.mxu1 %vm62_vm1, %v42_v11  ;;  %v3140_v25 = vld [vmem:[%s6791_s2 + $0x38] sm:$0xf0]  ;;  %v3114_v28 = vld [vmem:[%s6791_s2] sm:$0xf]  ;;  %v4148_v29 = vld [vmem:[%s6791_s2 + $0xc] sm:$0xf0]  ;;  %v3139_v31 = vor.u32 %v4153_v23, %v3138_v22 }
  0x1c   :  { %400 = vmatpush.bf16.msrb.mxu1 %v3167_v2  ;;  %413 = vmatpush.bf16.msrb.mxu2 %v3171_v4  ;;  %v4146_v30 = vld [vmem:[%s6791_s2 + $0x4] sm:$0xf]  ;;  %v3116_v32 = vld [vmem:[%s6791_s2 + $0x10] sm:$0xf0]  ;;  %v3143_v33 = vor.u32 %v4151_v24, %v3140_v25  ;;  %v3122_v34 = vld [vmem:[%s6791_s2 + $0x8] sm:$0xf]  ;;  %v3115_v38 = vor.u32 %v4148_v29, %v3114_v28 }
  0x1d   :  { %3102 = vmatmul.msk.f32.gmra.mxu0 %vm62_vm1, %v42_v11  ;;  %426 = vmatpush.bf16.msrb.mxu3 %v3175_v8  ;;  %v4149_v35 = vld [vmem:[%s6791_s2 + $0x14] sm:$0xf0]  ;;  %v4147_v36 = vld [vmem:[%s6791_s2 + $0xc] sm:$0xf]  ;;  %v3124_v37 = vld [vmem:[%s6791_s2 + $0x18] sm:$0xf0]  ;;  %v3119_v39 = vor.u32 %v4146_v30, %v3116_v32 }
  0x1e   :  { %3108 = vmatmul.msk.f32.gmra.mxu2 %vm62_vm1, %v42_v11  ;;  %3111 = vmatmul.msk.f32.gmra.mxu3 %vm62_vm1, %v42_v11  ;;  %v184_v40 = vld [vmem:[%s6790_s1] sm:$0x3]  ;;  %v3123_v41 = vor.u32 %v4149_v35, %v3122_v34  ;;  %v3127_v42 = vor.u32 %v4147_v36, %v3124_v37  ;;  %v4780_v43 = vld [vmem:[%s6793_s4 + $0x78] sm:$0xff]  ;;  %v4786_v45 = vld [vmem:[%s6793_s4 + $0x70] sm:$0xff] }
  0x1f   :  { %388 = vmatpush.bf16.msrb.mxu0 %v3147_v14  ;;  %v190_v44 = vpack.c.bf16 %v184_v40, %v184_v40  ;;  %v4791_v46 = vld [vmem:[%s6793_s4 + $0x68] sm:$0xff]  ;;  %v4797_v47 = vld [vmem:[%s6793_s4 + $0x60] sm:$0xff]  ;;  %v4803_v48 = vld [vmem:[%s6793_s4 + $0x58] sm:$0xff] }
  0x20   :  { %401 = vmatpush.bf16.msrb.mxu1 %v3151_v15  ;;  %414 = vmatpush.bf16.msrb.mxu2 %v3155_v17  ;;  %v4810_v49 = vld [vmem:[%s6793_s4 + $0x50] sm:$0xff]  ;;  %v4815_v50 = vld [vmem:[%s6793_s4 + $0x48] sm:$0xff]  ;;  %v4821_v51 = vld [vmem:[%s6793_s4 + $0x40] sm:$0xff] }
  0x21   :  { %427 = vmatpush.bf16.msrb.mxu3 %v3159_v21  ;;  %v4828_v52 = vld [vmem:[%s6793_s4 + $0x38] sm:$0xff]  ;;  %v4834_v53 = vld [vmem:[%s6793_s4 + $0x30] sm:$0xff]  ;;  %v4839_v54 = vld [vmem:[%s6793_s4 + $0x28] sm:$0xff] }
  0x22   :  { %v4845_v55 = vld [vmem:[%s6793_s4 + $0x20] sm:$0xff]  ;;  %v4852_v56 = vld [vmem:[%s6793_s4 + $0x18] sm:$0xff]  ;;  %v4208_v58 = vld [vmem:[%s6791_s2 + $0xec] sm:$0xf0] }
  0x23   :  { %389 = vmatpush.bf16.msrb.mxu0 %v3131_v26  ;;  %v3355_v57 = vld [vmem:[%s6791_s2 + $0xe0] sm:$0xf]  ;;  %v4206_v59 = vld [vmem:[%s6791_s2 + $0xe4] sm:$0xf]  ;;  %v3357_v61 = vld [vmem:[%s6791_s2 + $0xf0] sm:$0xf0] }
  0x24   :  { %402 = vmatpush.bf16.msrb.mxu1 %v3135_v27  ;;  %415 = vmatpush.bf16.msrb.mxu2 %v3139_v31  ;;  %v3356_v60 = vor.u32 %v4208_v58, %v3355_v57  ;;  %v3360_v62 = vor.u32 %v4206_v59, %v3357_v61  ;;  %v4867_v63 = vld [vmem:[#allocation4 + $0x25] ss:$8 sm:$0xf]  ;;  %v3339_v1 = vld [vmem:[%s6791_s2 + $0xc0] sm:$0xf] }
  0x25   :  { %428 = vmatpush.bf16.msrb.mxu3 %v3143_v33  ;;  %v4872_v0 = vld [vmem:[%s6793_s4 + $0x10] sm:$0xff]  ;;  %v4202_v3 = vld [vmem:[%s6791_s2 + $0xc4] sm:$0xf]  ;;  %v4887_v4 = vld [vmem:[%s6793_s4 + $0x8] sm:$0xff]  ;;  %v54_v10 = vperm.slane %v4867_v63, 0  ;;  %v55_v16 = vperm.slane %v4867_v63, 1 }
  0x26   :  { %v4204_v2 = vld [vmem:[%s6791_s2 + $0xcc] sm:$0xf0]  ;;  %v3341_v6 = vld [vmem:[%s6791_s2 + $0xd0] sm:$0xf0]  ;;  %v4207_v8 = vld [vmem:[%s6791_s2 + $0xec] sm:$0xf] }
  0x27   :  { %390 = vmatpush.bf16.msrb.mxu0 %v3115_v38  ;;  %v3340_v5 = vor.u32 %v4204_v2, %v3339_v1  ;;  %v3344_v7 = vor.u32 %v4202_v3, %v3341_v6  ;;  %v3365_v9 = vld [vmem:[%s6791_s2 + $0xf8] sm:$0xf0]  ;;  %v4903_v11 = vld [vmem:[%s6793_s4] sm:$0xff]  ;;  %v4200_v14 = vld [vmem:[%s6791_s2 + $0xac] sm:$0xf0]  ;;  %v56_v35 = vperm.slane %v4867_v63, 2 }
  0x28   :  { %403 = vmatpush.bf16.msrb.mxu1 %v3119_v39  ;;  %416 = vmatpush.bf16.msrb.mxu2 %v3123_v41  ;;  %v3368_v12 = vor.u32 %v4207_v8, %v3365_v9  ;;  %v3323_v13 = vld [vmem:[%s6791_s2 + $0xa0] sm:$0xf]  ;;  %v4198_v15 = vld [vmem:[%s6791_s2 + $0xa4] sm:$0xf]  ;;  %v3325_v18 = vld [vmem:[%s6791_s2 + $0xb0] sm:$0xf0] }
  0x29   :  { %429 = vmatpush.bf16.msrb.mxu3 %v3127_v42  ;;  %v3324_v17 = vor.u32 %v4200_v14, %v3323_v13  ;;  %v3328_v19 = vor.u32 %v4198_v15, %v3325_v18  ;;  %v4203_v20 = vld [vmem:[%s6791_s2 + $0xcc] sm:$0xf]  ;;  %v3349_v21 = vld [vmem:[%s6791_s2 + $0xd8] sm:$0xf0]  ;;  %v3307_v26 = vld [vmem:[%s6791_s2 + $0x80] sm:$0xf] }
  0x2a   :  { %391 = vmatmul.bf16.vlgmr.msrb.gmra.mxu0 %v190_v44  ;;  %v3352_v23 = vor.u32 %v4203_v20, %v3349_v21  ;;  %v4196_v27 = vld [vmem:[%s6791_s2 + $0x8c] sm:$0xf0]  ;;  %v4194_v28 = vld [vmem:[%s6791_s2 + $0x84] sm:$0xf]  ;;  %v3309_v31 = vld [vmem:[%s6791_s2 + $0x90] sm:$0xf0] }
  0x2b   :  { %474 = vmatpush.msra.mxu0 %v4780_v43  ;;  %404 = vmatmul.bf16.vlgmr.msrb.gmra.mxu1 %v190_v44  ;;  %v3308_v30 = vor.u32 %v4196_v27, %v3307_v26  ;;  %v3312_v32 = vor.u32 %v4194_v28, %v3309_v31  ;;  %v4199_v33 = vld [vmem:[%s6791_s2 + $0xac] sm:$0xf]  ;;  %v3333_v34 = vld [vmem:[%s6791_s2 + $0xb8] sm:$0xf0]  ;;  %v57_v36 = vperm.slane %v4867_v63, 3 }
  0x2c   :  { %417 = vmatmul.bf16.vlgmr.msrb.gmra.mxu2 %v190_v44  ;;  %430 = vmatmul.bf16.vlgmr.msrb.gmra.mxu3 %v190_v44  ;;  %v3336_v37 = vor.u32 %v4199_v33, %v3333_v34  ;;  %v3291_v38 = vld [vmem:[%s6791_s2 + $0x60] sm:$0xf]  ;;  %v4192_v39 = vld [vmem:[%s6791_s2 + $0x6c] sm:$0xf0]  ;;  %v4190_v40 = vld [vmem:[%s6791_s2 + $0x64] sm:$0xf] }
  0x2d   :  { %475 = vmatpush.msra.mxu0 %v4786_v45  ;;  %728 = vmatpush.bf16.msra.mxu2 %v3356_v60  ;;  %v3292_v41 = vor.u32 %v4192_v39, %v3291_v38  ;;  %v3293_v42 = vld [vmem:[%s6791_s2 + $0x70] sm:$0xf0]  ;;  %v4195_v57 = vld [vmem:[%s6791_s2 + $0x8c] sm:$0xf]  ;;  %v3317_v58 = vld [vmem:[%s6791_s2 + $0x98] sm:$0xf0] }
  0x2e   :  { %741 = vmatpush.bf16.msra.mxu3 %v3360_v62  ;;  %v3296_v44 = vor.u32 %v4190_v40, %v3293_v42  ;;  %v3320_v61 = vor.u32 %v4195_v57, %v3317_v58  ;;  %v3275_v3 = vld [vmem:[%s6791_s2 + $0x40] sm:$0xf]  ;;  %v4186_v6 = vld [vmem:[%s6791_s2 + $0x44] sm:$0xf]  ;;  %v4191_v14 = vld [vmem:[%s6791_s2 + $0x6c] sm:$0xf] }
  0x2f   :  { %476 = vmatpush.msra.mxu0 %v4791_v46  ;;  %v3301_v15 = vld [vmem:[%s6791_s2 + $0x78] sm:$0xf0]  ;;  %v4182_v18 = vld [vmem:[%s6791_s2 + $0x24] sm:$0xf]  ;;  %v3261_v20 = vld [vmem:[%s6791_s2 + $0x30] sm:$0xf0] }
  0x30   :  { %v4187_v21 = vld [vmem:[%s6791_s2 + $0x4c] sm:$0xf]  ;;  %v3245_v31 = vld [vmem:[%s6791_s2 + $0x10] sm:$0xf0]  ;;  %v3269_v38 = vld [vmem:[%s6791_s2 + $0x38] sm:$0xf0] }
  0x31   :  { %477 = vmatpush.msra.mxu0 %v4797_v47  ;;  %729 = vmatpush.bf16.msra.mxu2 %v3340_v5  ;;  %v4188_v5 = vld [vmem:[%s6791_s2 + $0x4c] sm:$0xf0]  ;;  %v4179_v57 = vld [vmem:[%s6791_s2 + $0xc] sm:$0xf]  ;;  %v3253_v58 = vld [vmem:[%s6791_s2 + $0x18] sm:$0xf0] }
  0x32   :  { %742 = vmatpush.bf16.msra.mxu3 %v3344_v7  ;;  %v3276_v9 = vor.u32 %v4188_v5, %v3275_v3 }
  0x33   :  { %478 = vmatpush.msra.mxu0 %v4803_v48 }
  0x35   :  { %479 = vmatpush.msra.mxu0 %v4810_v49  ;;  %730 = vmatpush.bf16.msra.mxu2 %v3324_v17  ;;  %v4184_v17 = vld [vmem:[%s6791_s2 + $0x2c] sm:$0xf0] }
  0x36   :  { %743 = vmatpush.bf16.msra.mxu3 %v3328_v19 }
  0x37   :  { %480 = vmatpush.msra.mxu0 %v4815_v50 }
  0x39   :  { %481 = vmatpush.msra.mxu0 %v4821_v51  ;;  %731 = vmatpush.bf16.msra.mxu2 %v3308_v30  ;;  %v4178_v30 = vld [vmem:[%s6791_s2 + $0x4] sm:$0xf] }
  0x3a   :  { %744 = vmatpush.bf16.msra.mxu3 %v3312_v32  ;;  %v3248_v34 = vor.u32 %v4178_v30, %v3245_v31  ;;  %v5092_v31 = vld [vmem:[%s6793_s4 + $0x80] sm:$0xff] }
  0x3b   :  { %482 = vmatpush.msra.mxu0 %v4828_v52 }
  0x3d   :  { %483 = vmatpush.msra.mxu0 %v4834_v53  ;;  %732 = vmatpush.bf16.msra.mxu2 %v3292_v41 }
  0x3e   :  { %745 = vmatpush.bf16.msra.mxu3 %v3296_v44 }
  0x3f   :  { %484 = vmatpush.msra.mxu0 %v4839_v54 }
  0x41   :  { %485 = vmatpush.msra.mxu0 %v4845_v55  ;;  %733 = vmatpush.bf16.msra.mxu2 %v3276_v9 }
  0x43   :  { %486 = vmatpush.msra.mxu0 %v4852_v56 }
  0x45   :  { %487 = vmatpush.msra.mxu0 %v4872_v0 }
  0x47   :  { %488 = vmatpush.msra.mxu0 %v4887_v4 }
  0x49   :  { %489 = vmatpush.msra.mxu0 %v4903_v11 }
  0x4b   :  { %767 = vmatpush.bf16.msrb.mxu0 %v3368_v12  ;;  %v3277_v12 = vld [vmem:[%s6791_s2 + $0x50] sm:$0xf0] }
  0x4c   :  { %v3280_v13 = vor.u32 %v4186_v6, %v3277_v12  ;;  %v5043_v12 = vld [vmem:[%s6793_s4 + $0xa8] sm:$0xff] }
  0x4e   :  { %746 = vmatpush.bf16.msra.mxu3 %v3280_v13 }
  0x4f   :  { %768 = vmatpush.bf16.msrb.mxu0 %v3352_v23  ;;  %v3285_v23 = vld [vmem:[%s6791_s2 + $0x58] sm:$0xf0] }
  0x50   :  { %v3288_v28 = vor.u32 %v4187_v21, %v3285_v23  ;;  %v5070_v23 = vld [vmem:[%s6793_s4 + $0x90] sm:$0xff] }
  0x53   :  { %769 = vmatpush.bf16.msrb.mxu0 %v3336_v37  ;;  %v4183_v37 = vld [vmem:[%s6791_s2 + $0x2c] sm:$0xf] }
  0x54   :  { %v3272_v39 = vor.u32 %v4183_v37, %v3269_v38  ;;  %v3347_v37 = vld [vmem:[%s6791_s2 + $0xc8] sm:$0xf]  ;;  %v4205_v38 = vld [vmem:[%s6791_s2 + $0xd4] sm:$0xf0] }
  0x57   :  { %770 = vmatpush.bf16.msrb.mxu0 %v3320_v61 }
  0x90   :  { %v122_v25 = vpop.f32.mrf.mxu1 }
  0x91   :  { %v123_v29 = vadd.f32 %v122_v25, %v55_v16  ;;  %v4180_v25 = vld [vmem:[%s6791_s2 + $0xc] sm:$0xf0] }
  0x92   :  { %v99_v22 = vpop.f32.mrf.mxu0 }
  0x93   :  { %v100_v24 = vadd.f32 %v99_v22, %v54_v10  ;;  %175 = vst [vmem:[#allocation2] sm:$0xff] %v123_v29  ;;  %v3264_v22 = vor.u32 %v4182_v18, %v3261_v20  ;;  %v5059_v18 = vld [vmem:[%s6793_s4 + $0x98] sm:$0xff]  ;;  %v185_v20 = vld [vmem:[%s6790_s1 + $0x2] sm:$0x3] }
  0x95   :  { %174 = vst [vmem:[#allocation2 + $0x30] sm:$0xff] %v100_v24  ;;  %v3243_v24 = vld [vmem:[%s6791_s2] sm:$0xf]  ;;  %747 = vmatpush.bf16.msra.mxu3 %v3264_v22 }
  0x96   :  { %v3244_v29 = vor.u32 %v4180_v25, %v3243_v24  ;;  %v3363_v25 = vld [vmem:[%s6791_s2 + $0xe8] sm:$0xf] }
  0x98   :  { %v125_v2 = vpop.f32.mrf.mxu1 }
  0x99   :  { %v145_v59 = vpop.f32.mrf.mxu2  ;;  %v168_v60 = vpop.f32.mrf.mxu3  ;;  %v126_v8 = vadd.f32 %v125_v2, %v55_v16  ;;  %v3304_v16 = vor.u32 %v4191_v14, %v3301_v15  ;;  %748 = vmatpush.bf16.msra.mxu3 %v3248_v34  ;;  %v5035_v2 = vld [vmem:[%s6793_s4 + $0xb0] sm:$0xff]  ;;  %v5051_v15 = vld [vmem:[%s6793_s4 + $0xa0] sm:$0xff] }
  0x9a   :  { %v146_v62 = vadd.f32 %v145_v59, %v56_v35  ;;  %v169_v63 = vadd.f32 %v168_v60, %v57_v36  ;;  %v102_v1 = vpop.f32.mrf.mxu0  ;;  %v187_v40 = vld [vmem:[#allocation2] sm:$0x3]  ;;  %v3256_v59 = vor.u32 %v4179_v57, %v3253_v58  ;;  %v3315_v57 = vld [vmem:[%s6791_s2 + $0x88] sm:$0xf]  ;;  %v4197_v58 = vld [vmem:[%s6791_s2 + $0x94] sm:$0xf0] }
  0x9b   :  { %v103_v7 = vadd.f32 %v102_v1, %v54_v10  ;;  %v3259_v10 = vld [vmem:[%s6791_s2 + $0x20] sm:$0xf]  ;;  %179 = vst [vmem:[#allocation2 + $0x20] sm:$0xff] %v126_v8  ;;  %771 = vmatpush.bf16.msrb.mxu0 %v3304_v16  ;;  %v5030_v1 = vld [vmem:[%s6793_s4 + $0xb8] sm:$0xff] }
  0x9c   :  { %176 = vst [vmem:[#allocation2 + $0x18] sm:$0xff] %v146_v62  ;;  %v3260_v19 = vor.u32 %v4184_v17, %v3259_v10  ;;  %516 = vmatpush.msra.mxu1 %v5030_v1 }
  0x9d   :  { %177 = vst [vmem:[#allocation2 + $0x10] sm:$0xff] %v169_v63  ;;  %876 = vmatpush.msrb.mxu3 %v5030_v1 }
  0x9e   :  { %178 = vst [vmem:[#allocation2 + $0x8] sm:$0xff] %v103_v7  ;;  %734 = vmatpush.bf16.msra.mxu2 %v3260_v19  ;;  %517 = vmatpush.msra.mxu1 %v5035_v2 }
  0x9f   :  { %772 = vmatpush.bf16.msrb.mxu0 %v3288_v28  ;;  %877 = vmatpush.msrb.mxu3 %v5035_v2 }
  0xa0   :  { %518 = vmatpush.msra.mxu1 %v5043_v12 }
  0xa1   :  { %v148_v26 = vpop.f32.mrf.mxu2  ;;  %v171_v27 = vpop.f32.mrf.mxu3  ;;  %878 = vmatpush.msrb.mxu3 %v5043_v12 }
  0xa2   :  { %v149_v32 = vadd.f32 %v148_v26, %v56_v35  ;;  %v172_v33 = vadd.f32 %v171_v27, %v57_v36  ;;  %735 = vmatpush.bf16.msra.mxu2 %v3244_v29  ;;  %v186_v35 = vld [vmem:[#allocation2 + $0x30] sm:$0x3]  ;;  %519 = vmatpush.msra.mxu1 %v5051_v15  ;;  %v4209_v26 = vld [vmem:[%s6791_s2 + $0xf4] sm:$0xf0]  ;;  %v5084_v29 = vld [vmem:[%s6793_s4 + $0x88] sm:$0xff] }
  0xa3   :  { %773 = vmatpush.bf16.msrb.mxu0 %v3272_v39  ;;  %v188_v62 = vld [vmem:[#allocation2 + $0x18] sm:$0x3]  ;;  %879 = vmatpush.msrb.mxu3 %v5051_v15 }
  0xa4   :  { %180 = vst [vmem:[#allocation2 + $0x28] sm:$0xff] %v149_v32  ;;  %v189_v5 = vld [vmem:[#allocation2 + $0x10] sm:$0x3]  ;;  %520 = vmatpush.msra.mxu1 %v5059_v18  ;;  %v3364_v32 = vor.u32 %v4209_v26, %v3363_v25 }
  0xa5   :  { %181 = vst [vmem:[#allocation2 + $0x38] sm:$0xff] %v172_v33  ;;  %880 = vmatpush.msrb.mxu3 %v5059_v18 }
  0xa6   :  { %836 = vmatpush.msrb.mxu2 %v4780_v43  ;;  %521 = vmatpush.msra.mxu1 %v5070_v23 }
  0xa7   :  { %v392_v36 = vpop.f32.mrf.mxu0  ;;  %774 = vmatpush.bf16.msrb.mxu0 %v3256_v59  ;;  %881 = vmatpush.msrb.mxu3 %v5070_v23 }
  0xa8   :  { %v405_v41 = vpop.f32.mrf.mxu1  ;;  %v435_v42 = vadd.f32 %v392_v36, %v186_v35  ;;  %837 = vmatpush.msrb.mxu2 %v4786_v45  ;;  %522 = vmatpush.msra.mxu1 %v5084_v29  ;;  %v3348_v35 = vor.u32 %v4205_v38, %v3347_v37  ;;  %v3331_v36 = vld [vmem:[%s6791_s2 + $0xa8] sm:$0xf] }
  0xa9   :  { %v436_v44 = vadd.f32 %v405_v41, %v187_v40  ;;  %882 = vmatpush.msrb.mxu3 %v5084_v29  ;;  %v4201_v40 = vld [vmem:[%s6791_s2 + $0xb4] sm:$0xf0] }
  0xaa   :  { %v439_v60 = vmul.f32 0.5, %v435_v42  ;;  %838 = vmatpush.msrb.mxu2 %v4791_v46  ;;  %523 = vmatpush.msra.mxu1 %v5092_v31  ;;  %v3332_v42 = vor.u32 %v4201_v40, %v3331_v36 }
  0xab   :  { %v440_v61 = vmul.f32 0.5, %v436_v44  ;;  %883 = vmatpush.msrb.mxu3 %v5092_v31 }
  0xac   :  { %4408 = vtanh.f32 %v439_v60  ;;  %839 = vmatpush.msrb.mxu2 %v4797_v47  ;;  %754 = vmatpush.bf16.msrb.mxu1 %v3364_v32 }
  0xad   :  { %4410 = vtanh.f32 %v440_v61  ;;  %v3316_v61 = vor.u32 %v4197_v58, %v3315_v57 }
  0xae   :  { %840 = vmatpush.msrb.mxu2 %v4803_v48 }
  0xaf   :  { %v418_v63 = vpop.f32.mrf.mxu2  ;;  %v431_v6 = vpop.f32.mrf.mxu3 }
  0xb0   :  { %v437_v3 = vadd.f32 %v418_v63, %v188_v62  ;;  %v394_v7 = vpop.f32.mrf.mxu0  ;;  %v438_v8 = vadd.f32 %v431_v6, %v189_v5  ;;  %v407_v9 = vpop.f32.mrf.mxu1  ;;  %841 = vmatpush.msrb.mxu2 %v4810_v49  ;;  %755 = vmatpush.bf16.msrb.mxu1 %v3348_v35  ;;  %v3299_v62 = vld [vmem:[%s6791_s2 + $0x68] sm:$0xf]  ;;  %v4193_v63 = vld [vmem:[%s6791_s2 + $0x74] sm:$0xf0]  ;;  %v534_v35 = vld [vmem:[#allocation2 + $0x10] sm:$0xc] }
  0xb1   :  { %v3283_v5 = vld [vmem:[%s6791_s2 + $0x48] sm:$0xf]  ;;  %v4189_v6 = vld [vmem:[%s6791_s2 + $0x54] sm:$0xf0] }
  0xb2   :  { %v441_v13 = vmul.f32 0.5, %v437_v3  ;;  %v4409_v14 = vpop.eup %4408  ;;  %4412 = vtanh.f32 %v438_v8  ;;  %842 = vmatpush.msrb.mxu2 %v4815_v50  ;;  %v3300_v3 = vor.u32 %v4193_v63, %v3299_v62  ;;  %v3284_v7 = vor.u32 %v4189_v6, %v3283_v5  ;;  %v3267_v8 = vld [vmem:[%s6791_s2 + $0x28] sm:$0xf]  ;;  %v4185_v9 = vld [vmem:[%s6791_s2 + $0x34] sm:$0xf0] }
  0xb3   :  { %v4411_v10 = vpop.eup %4410  ;;  %v445_v16 = vmul.f32 0.5, %v4409_v14  ;;  %v3251_v14 = vld [vmem:[%s6791_s2 + $0x8] sm:$0xf] }
  0xb4   :  { %v446_v17 = vmul.f32 0.5, %v4411_v10  ;;  %843 = vmatpush.msrb.mxu2 %v4821_v51  ;;  %4414 = vtanh.f32 %v441_v13  ;;  %756 = vmatpush.bf16.msrb.mxu1 %v3332_v42  ;;  %v3268_v13 = vor.u32 %v4185_v9, %v3267_v8  ;;  %v4181_v10 = vld [vmem:[%s6791_s2 + $0x14] sm:$0xf0]  ;;  %v4240_v8 = vld [vmem:[%s6791_s2 + $0xec] sm:$0xf0] }
  0xb5   :  { %v448_v19 = vadd.f32 0.5, %v445_v16  ;;  %v3252_v16 = vor.u32 %v4181_v10, %v3251_v14  ;;  %v3492_v9 = vld [vmem:[%s6791_s2 + $0xe8] sm:$0xf]  ;;  %v3468_v10 = vld [vmem:[%s6791_s2 + $0xc0] sm:$0xf] }
  0xb6   :  { %v449_v21 = vadd.f32 0.5, %v446_v17  ;;  %844 = vmatpush.msrb.mxu2 %v4828_v52  ;;  %v5152_v17 = vld [vmem:[%s6793_s4 + $0xc0] ss:$0 sm:$0xff] }
  0xb7   :  { %v420_v22 = vpop.f32.mrf.mxu2  ;;  %v433_v24 = vpop.f32.mrf.mxu3 }
  0xb8   :  { %v4413_v27 = vpop.eup %4412  ;;  %v452_v28 = vmul.f32 %v449_v21, %v185_v20  ;;  %845 = vmatpush.msrb.mxu2 %v4834_v53  ;;  %757 = vmatpush.bf16.msrb.mxu1 %v3316_v61 }
  0xb9   :  { %v453_v30 = vmul.f32 %v4413_v27, %v448_v19 }
  0xba   :  { %846 = vmatpush.msrb.mxu2 %v4839_v54  ;;  %v4415_v33 = vpop.eup %4414 }
  0xbb   :  { %v5095_v34 = vadd.f32 %v453_v30, %v452_v28  ;;  %v447_v39 = vmul.f32 0.5, %v4415_v33  ;;  %v531_v28 = vld [vmem:[#allocation2 + $0x30] sm:$0xc]  ;;  %v532_v30 = vld [vmem:[#allocation2] sm:$0xc] }
  0xbc   :  { %847 = vmatpush.msrb.mxu2 %v4845_v55  ;;  %758 = vmatpush.bf16.msrb.mxu1 %v3300_v3 }
  0xbd   :  { %4416 = vtanh.f32 %v5095_v34  ;;  %v450_v41 = vadd.f32 0.5, %v447_v39  ;;  %v810_v3 = vrot.slane %v5095_v34, 6  ;;  %v4241_v34 = vld [vmem:[%s6791_s2 + $0xf4] sm:$0xf0] }
  0xbe   :  { %848 = vmatpush.msrb.mxu2 %v4852_v56  ;;  %v3493_v14 = vor.u32 %v4241_v34, %v3492_v9  ;;  %v3446_v9 = vld [vmem:[%s6791_s2 + $0x98] sm:$0xf0]  ;;  %v3404_v34 = vld [vmem:[%s6791_s2 + $0x40] sm:$0xf] }
  0xc0   :  { %849 = vmatpush.msrb.mxu2 %v4872_v0  ;;  %759 = vmatpush.bf16.msrb.mxu1 %v3284_v7  ;;  %v3484_v7 = vld [vmem:[%s6791_s2 + $0xe0] sm:$0xf] }
  0xc2   :  { %850 = vmatpush.msrb.mxu2 %v4887_v4 }
  0xc3   :  { %v4417_v44 = vpop.eup %4416 }
  0xc4   :  { %v456_v59 = vmul.f32 %v4417_v44, %v450_v41  ;;  %851 = vmatpush.msrb.mxu2 %v4903_v11  ;;  %760 = vmatpush.bf16.msrb.mxu1 %v3268_v13  ;;  %v3485_v13 = vor.u32 %v4240_v8, %v3484_v7  ;;  %v4227_v8 = vld [vmem:[%s6791_s2 + $0x8c] sm:$0xf] }
  0xc6   :  { %490 = vmatmul.f32.vlgmr.msra.gmra.mxu0 %v456_v59  ;;  %v535_v60 = vpack.c.bf16 %v456_v59, %v456_v59 }
  0xc7   :  { %1116 = vmatpush.bf16.msra.mxu0 %v3493_v14  ;;  %v4220_v14 = vld [vmem:[%s6791_s2 + $0x4c] sm:$0xf0] }
  0xc8   :  { %736 = vmatmul.bf16.vlgmr.msra.gmra.mxu2 %v535_v60  ;;  %749 = vmatmul.bf16.vlgmr.msra.gmra.mxu3 %v535_v60 }
  0xc9   :  { %761 = vmatpush.bf16.msrb.mxu1 %v3252_v16  ;;  %v4236_v16 = vld [vmem:[%s6791_s2 + $0xcc] sm:$0xf0] }
  0xce   :  { %775 = vmatmul.bf16.vlgmr.msrb.gmra.mxu0 %v535_v60 }
 0x143   :  { %v491_v19 = vpop.f32.mrf.mxu0 }
 0x144   :  { %v492_v20 = vadd.f32 %v5152_v17, %v491_v19  ;;  %v3469_v19 = vor.u32 %v4236_v16, %v3468_v10  ;;  %v3412_v10 = vld [vmem:[%s6791_s2 + $0x48] sm:$0xf]  ;;  %v3405_v16 = vor.u32 %v4220_v14, %v3404_v34  ;;  %v533_v34 = vld [vmem:[#allocation2 + $0x18] sm:$0xc]  ;;  %v4230_v14 = vld [vmem:[%s6791_s2 + $0xa4] sm:$0xf] }
 0x146   :  { %v494_v21 = vmax.f32 %v492_v20, 0.0  ;;  %v3476_v20 = vld [vmem:[%s6791_s2 + $0xc8] sm:$0xf] }
 0x148   :  { %3240 = vmatmul.msk.f32.vlgmr.msra.gmra.mxu1 %vm504_vm2, %v494_v21  ;;  %v4237_v21 = vld [vmem:[%s6791_s2 + $0xd4] sm:$0xf0] }
 0x149   :  { %1090 = vmatpush.bf16.msra.mxu1 %v3485_v13  ;;  %v3449_v13 = vor.u32 %v4227_v8, %v3446_v9 }
 0x14b   :  { %v737_v22 = vpop.f32.mrf.mxu2  ;;  %v750_v24 = vpop.f32.mrf.mxu3 }
 0x14c   :  { %v784_v25 = vrot.slane %v737_v22, 6  ;;  %v785_v26 = vrot.slane %v750_v24, 6  ;;  %v776_v27 = vpop.f32.mrf.mxu0  ;;  %v3477_v22 = vor.u32 %v4237_v21, %v3476_v20  ;;  %v4239_v24 = vld [vmem:[%s6791_s2 + $0xec] sm:$0xf] }
 0x14d   :  { %v787_v37 = vrot.slane %v776_v27, 6  ;;  %1091 = vmatpush.bf16.msra.mxu1 %v3469_v19  ;;  %v3452_v27 = vld [vmem:[%s6791_s2 + $0xa0] sm:$0xf]  ;;  %v4221_v19 = vld [vmem:[%s6791_s2 + $0x54] sm:$0xf0] }
 0x14e   :  { %v792_v32 = vadd.f32 %v784_v25, %v531_v28  ;;  %v793_v33 = vadd.f32 %v785_v26, %v532_v30  ;;  %v3494_v25 = vld [vmem:[%s6791_s2 + $0xf8] sm:$0xf0]  ;;  %1117 = vmatpush.bf16.msra.mxu0 %v3477_v22  ;;  %v4232_v28 = vld [vmem:[%s6791_s2 + $0xac] sm:$0xf0]  ;;  %v3460_v30 = vld [vmem:[%s6791_s2 + $0xa8] sm:$0xf]  ;;  %v3413_v20 = vor.u32 %v4221_v19, %v3412_v10 }
 0x14f   :  { %v795_v36 = vadd.f32 %v787_v37, %v534_v35  ;;  %v3497_v26 = vor.u32 %v4239_v24, %v3494_v25  ;;  %v4223_v21 = vld [vmem:[%s6791_s2 + $0x6c] sm:$0xf]  ;;  %v3430_v22 = vld [vmem:[%s6791_s2 + $0x78] sm:$0xf0]  ;;  %v3388_v25 = vld [vmem:[%s6791_s2 + $0x20] sm:$0xf] }
 0x150   :  { %v796_v38 = vmul.f32 0.5, %v792_v32  ;;  %v797_v39 = vmul.f32 0.5, %v793_v33  ;;  %762 = vmatmul.bf16.vlgmr.msrb.gmra.mxu1 %v535_v60  ;;  %v3453_v32 = vor.u32 %v4232_v28, %v3452_v27  ;;  %v4233_v33 = vld [vmem:[%s6791_s2 + $0xb4] sm:$0xf0]  ;;  %v3433_v24 = vor.u32 %v4223_v21, %v3430_v22  ;;  %v3396_v27 = vld [vmem:[%s6791_s2 + $0x28] sm:$0xf] }
 0x151   :  { %1129 = vmatpush.bf16.msra.mxu2 %v3497_v26  ;;  %v3461_v37 = vor.u32 %v4233_v33, %v3460_v30  ;;  %v4216_v26 = vld [vmem:[%s6791_s2 + $0x2c] sm:$0xf0]  ;;  %v4217_v30 = vld [vmem:[%s6791_s2 + $0x34] sm:$0xf0]  ;;  %v4219_v33 = vld [vmem:[%s6791_s2 + $0x4c] sm:$0xf] }
 0x152   :  { %4418 = vtanh.f32 %v796_v38  ;;  %v4235_v38 = vld [vmem:[%s6791_s2 + $0xcc] sm:$0xf]  ;;  %1092 = vmatpush.bf16.msra.mxu1 %v3453_v32  ;;  %v3389_v28 = vor.u32 %v4216_v26, %v3388_v25  ;;  %v3397_v32 = vor.u32 %v4217_v30, %v3396_v27  ;;  %v3454_v10 = vld [vmem:[%s6791_s2 + $0xb0] sm:$0xf0] }
 0x153   :  { %4420 = vtanh.f32 %v797_v39  ;;  %v739_v40 = vpop.f32.mrf.mxu2  ;;  %v752_v41 = vpop.f32.mrf.mxu3  ;;  %v3478_v39 = vld [vmem:[%s6791_s2 + $0xd8] sm:$0xf0]  ;;  %1118 = vmatpush.bf16.msra.mxu0 %v3461_v37  ;;  %v3390_v30 = vld [vmem:[%s6791_s2 + $0x30] sm:$0xf0] }
 0x154   :  { %v778_v42 = vpop.f32.mrf.mxu0  ;;  %4422 = vtanh.f32 %v795_v36  ;;  %v3481_v35 = vor.u32 %v4235_v38, %v3478_v39  ;;  %v3436_v36 = vld [vmem:[%s6791_s2 + $0x80] sm:$0xf]  ;;  %v4228_v40 = vld [vmem:[%s6791_s2 + $0x8c] sm:$0xf0]  ;;  %v3444_v41 = vld [vmem:[%s6791_s2 + $0x88] sm:$0xf] }
 0x155   :  { %v3437_v42 = vor.u32 %v4228_v40, %v3436_v36  ;;  %v3414_v37 = vld [vmem:[%s6791_s2 + $0x58] sm:$0xf0]  ;;  %v3372_v39 = vld [vmem:[%s6791_s2] sm:$0xf]  ;;  %v3380_v36 = vld [vmem:[%s6791_s2 + $0x8] sm:$0xf] }
 0x156   :  { %1130 = vmatpush.bf16.msra.mxu2 %v3481_v35  ;;  %v3417_v38 = vor.u32 %v4219_v33, %v3414_v37  ;;  %v4212_v35 = vld [vmem:[%s6791_s2 + $0xc] sm:$0xf0]  ;;  %v4210_v33 = vld [vmem:[%s6791_s2 + $0x4] sm:$0xf]  ;;  %v3374_v37 = vld [vmem:[%s6791_s2 + $0x10] sm:$0xf0] }
 0x157   :  { %1093 = vmatpush.bf16.msra.mxu1 %v3437_v42  ;;  %v3373_v40 = vor.u32 %v4212_v35, %v3372_v39 }
 0x158   :  { %v4419_v44 = vpop.eup %4418 }
 0x159   :  { %v4421_v57 = vpop.eup %4420  ;;  %v802_v58 = vmul.f32 0.5, %v4419_v44  ;;  %v4229_v44 = vld [vmem:[%s6791_s2 + $0x94] sm:$0xf0] }
 0x15a   :  { %v803_v59 = vmul.f32 0.5, %v4421_v57  ;;  %v4423_v62 = vpop.eup %4422  ;;  %v3445_v57 = vor.u32 %v4229_v44, %v3444_v41  ;;  %v4213_v41 = vld [vmem:[%s6791_s2 + $0x14] sm:$0xf0]  ;;  %v5294_v44 = vld [vmem:[%s6793_s4 + $0xc1] ss:$0 sm:$0xff] }
 0x15b   :  { %v805_v61 = vadd.f32 0.5, %v802_v58  ;;  %v4231_v58 = vld [vmem:[%s6791_s2 + $0xac] sm:$0xf]  ;;  %v3381_v42 = vor.u32 %v4213_v41, %v3380_v36 }
 0x15c   :  { %v806_v63 = vadd.f32 0.5, %v803_v59  ;;  %v3462_v59 = vld [vmem:[%s6791_s2 + $0xb8] sm:$0xf0]  ;;  %1119 = vmatpush.bf16.msra.mxu0 %v3445_v57  ;;  %v4215_v57 = vld [vmem:[%s6791_s2 + $0x2c] sm:$0xf] }
 0x15d   :  { %v813_v5 = vmul.f32 %v4423_v62, %v805_v61  ;;  %v3465_v61 = vor.u32 %v4231_v58, %v3462_v59  ;;  %v3420_v62 = vld [vmem:[%s6791_s2 + $0x60] sm:$0xf]  ;;  %v3398_v58 = vld [vmem:[%s6791_s2 + $0x38] sm:$0xf0] }
 0x15e   :  { %v812_v6 = vmul.f32 %v810_v3, %v806_v63  ;;  %v4224_v63 = vld [vmem:[%s6791_s2 + $0x6c] sm:$0xf0]  ;;  %v3428_v3 = vld [vmem:[%s6791_s2 + $0x68] sm:$0xf]  ;;  %v3401_v59 = vor.u32 %v4215_v57, %v3398_v58 }
 0x15f   :  { %1131 = vmatpush.bf16.msra.mxu2 %v3465_v61 }
 0x160   :  { %v5157_v60 = vadd.f32 %v813_v5, %v812_v6  ;;  %v3421_v5 = vor.u32 %v4224_v63, %v3420_v62  ;;  %v4225_v6 = vld [vmem:[%s6791_s2 + $0x74] sm:$0xf0]  ;;  %v4211_v62 = vld [vmem:[%s6791_s2 + $0xc] sm:$0xf]  ;;  %v3382_v63 = vld [vmem:[%s6791_s2 + $0x18] sm:$0xf0] }
 0x161   :  { %v3429_v7 = vor.u32 %v4225_v6, %v3428_v3 }
 0x162   :  { %1094 = vmatpush.bf16.msra.mxu1 %v3421_v5  ;;  %v3385_v5 = vor.u32 %v4211_v62, %v3382_v63 }
 0x163   :  { %1120 = vmatpush.bf16.msra.mxu0 %v3429_v7  ;;  %1132 = vmatpush.bf16.msra.mxu2 %v3449_v13  ;;  %v3486_v7 = vld [vmem:[%s6791_s2 + $0xf0] sm:$0xf0] }
 0x166   :  { %1095 = vmatpush.bf16.msra.mxu1 %v3405_v16 }
 0x167   :  { %1121 = vmatpush.bf16.msra.mxu0 %v3413_v20  ;;  %1133 = vmatpush.bf16.msra.mxu2 %v3433_v24  ;;  %v3438_v20 = vld [vmem:[%s6791_s2 + $0x90] sm:$0xf0] }
 0x16a   :  { %1096 = vmatpush.bf16.msra.mxu1 %v3389_v28  ;;  %v4214_v28 = vld [vmem:[%s6791_s2 + $0x24] sm:$0xf] }
 0x16b   :  { %1122 = vmatpush.bf16.msra.mxu0 %v3397_v32  ;;  %1134 = vmatpush.bf16.msra.mxu2 %v3417_v38  ;;  %v3393_v32 = vor.u32 %v4214_v28, %v3390_v30  ;;  %v3377_v38 = vor.u32 %v4210_v33, %v3374_v37  ;;  %v4256_v28 = vld [vmem:[%s6791_s2 + $0x6c] sm:$0xf0]  ;;  %v4254_v30 = vld [vmem:[%s6791_s2 + $0x64] sm:$0xf]  ;;  %v3551_v33 = vld [vmem:[%s6791_s2 + $0x70] sm:$0xf0] }
 0x16c   :  { %v3554_v37 = vor.u32 %v4254_v30, %v3551_v33 }
 0x16e   :  { %1097 = vmatpush.bf16.msra.mxu1 %v3373_v40  ;;  %v890_v40 = vld [vmem:[#allocation2 + $0x30] sm:$0x30] }
 0x16f   :  { %1123 = vmatpush.bf16.msra.mxu0 %v3381_v42  ;;  %1135 = vmatpush.bf16.msra.mxu2 %v3401_v59 }
 0x172   :  { %1198 = vmatpush.msrb.mxu1 %v4780_v43  ;;  %v4238_v43 = vld [vmem:[%s6791_s2 + $0xe4] sm:$0xf] }
 0x173   :  { %1136 = vmatpush.bf16.msra.mxu2 %v3385_v5  ;;  %v3489_v8 = vor.u32 %v4238_v43, %v3486_v7  ;;  %v893_v5 = vld [vmem:[#allocation2 + $0x10] sm:$0x30] }
 0x174   :  { %1199 = vmatpush.msrb.mxu1 %v4786_v45  ;;  %v4234_v45 = vld [vmem:[%s6791_s2 + $0xc4] sm:$0xf] }
 0x175   :  { %1103 = vmatpush.bf16.msra.mxu3 %v3489_v8 }
 0x176   :  { %1200 = vmatpush.msrb.mxu1 %v4791_v46  ;;  %v3470_v46 = vld [vmem:[%s6791_s2 + $0xd0] sm:$0xf0] }
 0x177   :  { %v3473_v13 = vor.u32 %v4234_v45, %v3470_v46 }
 0x178   :  { %1201 = vmatpush.msrb.mxu1 %v4797_v47 }
 0x179   :  { %1104 = vmatpush.bf16.msra.mxu3 %v3473_v13 }
 0x17a   :  { %1202 = vmatpush.msrb.mxu1 %v4803_v48  ;;  %v3457_v48 = vor.u32 %v4230_v14, %v3454_v10  ;;  %v4271_v10 = vld [vmem:[%s6791_s2 + $0xec] sm:$0xf] }
 0x17c   :  { %1203 = vmatpush.msrb.mxu1 %v4810_v49  ;;  %v4226_v49 = vld [vmem:[%s6791_s2 + $0x84] sm:$0xf] }
 0x17d   :  { %1105 = vmatpush.bf16.msra.mxu3 %v3457_v48  ;;  %v3441_v22 = vor.u32 %v4226_v49, %v3438_v20  ;;  %v3581_v48 = vld [vmem:[%s6791_s2 + $0xa0] sm:$0xf]  ;;  %v4264_v49 = vld [vmem:[%s6791_s2 + $0xac] sm:$0xf0]  ;;  %v4262_v20 = vld [vmem:[%s6791_s2 + $0xa4] sm:$0xf] }
 0x17e   :  { %1204 = vmatpush.msrb.mxu1 %v4815_v50 }
 0x180   :  { %1205 = vmatpush.msrb.mxu1 %v4821_v51 }
 0x181   :  { %1106 = vmatpush.bf16.msra.mxu3 %v3441_v22  ;;  %v3583_v22 = vld [vmem:[%s6791_s2 + $0xb0] sm:$0xf0] }
 0x182   :  { %1206 = vmatpush.msrb.mxu1 %v4828_v52 }
 0x184   :  { %1207 = vmatpush.msrb.mxu1 %v4834_v53 }
 0x186   :  { %1208 = vmatpush.msrb.mxu1 %v4839_v54 }
 0x188   :  { %1209 = vmatpush.msrb.mxu1 %v4845_v55  ;;  %v4222_v55 = vld [vmem:[%s6791_s2 + $0x64] sm:$0xf] }
 0x18a   :  { %1210 = vmatpush.msrb.mxu1 %v4852_v56  ;;  %v3422_v56 = vld [vmem:[%s6791_s2 + $0x70] sm:$0xf0] }
 0x18c   :  { %1211 = vmatpush.msrb.mxu1 %v4872_v0  ;;  %v3425_v0 = vor.u32 %v4222_v55, %v3422_v56  ;;  %v3567_v55 = vld [vmem:[%s6791_s2 + $0x90] sm:$0xf0] }
 0x18e   :  { %1212 = vmatpush.msrb.mxu1 %v4887_v4  ;;  %1107 = vmatpush.bf16.msra.mxu3 %v3425_v0  ;;  %v4218_v4 = vld [vmem:[%s6791_s2 + $0x44] sm:$0xf]  ;;  %v4263_v0 = vld [vmem:[%s6791_s2 + $0xac] sm:$0xf] }
 0x190   :  { %1213 = vmatpush.msrb.mxu1 %v4903_v11  ;;  %v3406_v11 = vld [vmem:[%s6791_s2 + $0x50] sm:$0xf0] }
 0x191   :  { %v3409_v27 = vor.u32 %v4218_v4, %v3406_v11  ;;  %v3591_v4 = vld [vmem:[%s6791_s2 + $0xb8] sm:$0xf0] }
 0x192   :  { %v3594_v11 = vor.u32 %v4263_v0, %v3591_v4 }
 0x193   :  { %1108 = vmatpush.bf16.msra.mxu3 %v3409_v27  ;;  %v3549_v27 = vld [vmem:[%s6791_s2 + $0x60] sm:$0xf] }
 0x197   :  { %1109 = vmatpush.bf16.msra.mxu3 %v3393_v32  ;;  %v3550_v32 = vor.u32 %v4256_v28, %v3549_v27  ;;  %v4265_v27 = vld [vmem:[%s6791_s2 + $0xb4] sm:$0xf0] }
 0x19b   :  { %1110 = vmatpush.bf16.msra.mxu3 %v3377_v38  ;;  %v4259_v38 = vld [vmem:[%s6791_s2 + $0x8c] sm:$0xf] }
 0x1c5   :  { %v525_v61 = vpop.f32.mrf.mxu1 }
 0x1c6   :  { %v526_v3 = vadd.f32 %v5294_v44, %v525_v61 }
 0x1c8   :  { %v528_v6 = vmax.f32 %v526_v3, 0.0 }
 0x1ca   :  { %530 = vst.msk [vmem:[#allocation3] sm:$0x3] %vm529_vm3, %v528_v6 }
 0x1cd   :  { %v763_v47 = vpop.f32.mrf.mxu1 }
 0x1ce   :  { %v786_v9 = vrot.slane %v763_v47, 6  ;;  %v4268_v47 = vld [vmem:[%s6791_s2 + $0xcc] sm:$0xf0] }
 0x1d0   :  { %v794_v16 = vadd.f32 %v786_v9, %v533_v34  ;;  %v4266_v9 = vld [vmem:[%s6791_s2 + $0xc4] sm:$0xf]  ;;  %v3599_v34 = vld [vmem:[%s6791_s2 + $0xd0] sm:$0xf0] }
 0x1d1   :  { %v3602_v14 = vor.u32 %v4266_v9, %v3599_v34 }
 0x1d2   :  { %v798_v19 = vmul.f32 0.5, %v794_v16  ;;  %v3623_v16 = vld [vmem:[%s6791_s2 + $0xf8] sm:$0xf0] }
 0x1d4   :  { %4424 = vtanh.f32 %v798_v19  ;;  %v3626_v19 = vor.u32 %v4271_v10, %v3623_v16  ;;  %v3527_v10 = vld [vmem:[%s6791_s2 + $0x38] sm:$0xf0] }
 0x1d5   :  { %v765_v21 = vpop.f32.mrf.mxu1  ;;  %4426 = vtanh.f32 %v5157_v60 }
 0x1d6   :  { %v3582_v21 = vor.u32 %v4264_v49, %v3581_v48  ;;  %v891_v49 = vld [vmem:[#allocation2] sm:$0x30] }
 0x1da   :  { %v4425_v50 = vpop.eup %4424 }
 0x1db   :  { %v804_v51 = vmul.f32 0.5, %v4425_v50  ;;  %v4427_v25 = vpop.eup %4426  ;;  %v3586_v50 = vor.u32 %v4262_v20, %v3583_v22  ;;  %v3511_v22 = vld [vmem:[%s6791_s2 + $0x18] sm:$0xf0] }
 0x1dd   :  { %v807_v24 = vadd.f32 0.5, %v804_v51  ;;  %v4267_v51 = vld [vmem:[%s6791_s2 + $0xcc] sm:$0xf] }
 0x1df   :  { %v816_v52 = vmul.f32 %v4427_v25, %v807_v24  ;;  %v3607_v24 = vld [vmem:[%s6791_s2 + $0xd8] sm:$0xf0] }
 0x1e0   :  { %v3610_v25 = vor.u32 %v4267_v51, %v3607_v24  ;;  %v892_v51 = vld [vmem:[#allocation2 + $0x18] sm:$0x30] }
 0x1e1   :  { %v834_v26 = vrot.slane %v816_v52, 2  ;;  %v894_v53 = vpack.c.bf16 %v816_v52, %v816_v52  ;;  %v3565_v52 = vld [vmem:[%s6791_s2 + $0x80] sm:$0xf] }
 0x1e3   :  { %852 = vmatmul.f32.vlgmr.msrb.gmra.mxu2 %v834_v26  ;;  %v928_v54 = vrot.slane %v894_v53, 1  ;;  %v4260_v26 = vld [vmem:[%s6791_s2 + $0x8c] sm:$0xf0]  ;;  %v4258_v53 = vld [vmem:[%s6791_s2 + $0x84] sm:$0xf] }
 0x1e4   :  { %v3570_v56 = vor.u32 %v4258_v53, %v3567_v55  ;;  %v3605_v53 = vld [vmem:[%s6791_s2 + $0xc8] sm:$0xf] }
 0x1e5   :  { %1098 = vmatmul.bf16.vlgmr.msra.gmra.mxu1 %v928_v54  ;;  %1124 = vmatmul.bf16.vlgmr.msra.gmra.mxu0 %v928_v54 }
 0x1e6   :  { %1491 = vmatpush.bf16.msra.mxu1 %v3626_v19 }
 0x1ea   :  { %1492 = vmatpush.bf16.msra.mxu1 %v3610_v25 }
 0x1eb   :  { %1137 = vmatmul.bf16.vlgmr.msra.gmra.mxu2 %v928_v54 }
 0x1ee   :  { %1493 = vmatpush.bf16.msra.mxu1 %v3594_v11  ;;  %v3589_v11 = vld [vmem:[%s6791_s2 + $0xa8] sm:$0xf] }
 0x1ef   :  { %v3590_v33 = vor.u32 %v4265_v27, %v3589_v11  ;;  %v5653_v11 = vld [vmem:[%s6793_s4 + $0x28] sm:$0xff] }
 0x262   :  { %v1099_v39 = vpop.f32.mrf.mxu1  ;;  %v5375_v35 = vpop.f32.mrf.mxu0 }
 0x263   :  { %v1146_v36 = vrot.slane %v1099_v39, 4  ;;  %v3575_v39 = vld [vmem:[%s6791_s2 + $0x98] sm:$0xf0]  ;;  %v1148_v48 = vrot.slane %v5375_v35, 4  ;;  %v3621_v35 = vld [vmem:[%s6791_s2 + $0xe8] sm:$0xf] }
 0x265   :  { %v1154_v41 = vadd.f32 %v1146_v36, %v890_v40  ;;  %v3578_v36 = vor.u32 %v4259_v38, %v3575_v39  ;;  %v3533_v40 = vld [vmem:[%s6791_s2 + $0x40] sm:$0xf]  ;;  %v1156_v25 = vadd.f32 %v1148_v48, %v892_v51  ;;  %v4261_v38 = vld [vmem:[%s6791_s2 + $0x94] sm:$0xf0]  ;;  %v1255_v51 = vld [vmem:[#allocation2 + $0x10] sm:$0xc0] }
 0x266   :  { %v853_v42 = vpop.f32.mrf.mxu2 }
 0x267   :  { %v1158_v57 = vmul.f32 0.5, %v1154_v41  ;;  %v854_v58 = vadd.f32 %v5152_v17, %v853_v42  ;;  %v4252_v41 = vld [vmem:[%s6791_s2 + $0x4c] sm:$0xf0]  ;;  %v4250_v42 = vld [vmem:[%s6791_s2 + $0x44] sm:$0xf]  ;;  %1494 = vmatpush.bf16.msra.mxu1 %v3578_v36 }
 0x269   :  { %v856_v59 = vmax.f32 %v854_v58, 0.0  ;;  %4428 = vtanh.f32 %v1158_v57  ;;  %v3534_v57 = vor.u32 %v4252_v41, %v3533_v40  ;;  %v3535_v58 = vld [vmem:[%s6791_s2 + $0x50] sm:$0xf0] }
 0x26a   :  { %v1101_v61 = vpop.f32.mrf.mxu1  ;;  %v1127_v62 = vpop.f32.mrf.mxu0 }
 0x26b   :  { %3369 = vmatmul.msk.f32.vlgmr.msrb.gmra.mxu3 %vm504_vm2, %v856_v59  ;;  %v4255_v59 = vld [vmem:[%s6791_s2 + $0x6c] sm:$0xf]  ;;  %v3559_v61 = vld [vmem:[%s6791_s2 + $0x78] sm:$0xf0] }
 0x26c   :  { %1238 = vmatpush.msrb.mxu3 %v5030_v1 }
 0x26e   :  { %v1138_v63 = vpop.f32.mrf.mxu2  ;;  %1239 = vmatpush.msrb.mxu3 %v5035_v2 }
 0x26f   :  { %v1149_v3 = vrot.slane %v1138_v63, 4  ;;  %v4429_v6 = vpop.eup %4428  ;;  %v3538_v63 = vor.u32 %v4250_v42, %v3535_v58  ;;  %v4257_v42 = vld [vmem:[%s6791_s2 + $0x74] sm:$0xf0] }
 0x270   :  { %1240 = vmatpush.msrb.mxu3 %v5043_v12  ;;  %v1164_v7 = vmul.f32 0.5, %v4429_v6  ;;  %v3613_v12 = vld [vmem:[%s6791_s2 + $0xe0] sm:$0xf]  ;;  %v4248_v6 = vld [vmem:[%s6791_s2 + $0x2c] sm:$0xf0] }
 0x271   :  { %v1157_v43 = vadd.f32 %v1149_v3, %v893_v5  ;;  %v3562_v3 = vor.u32 %v4255_v59, %v3559_v61  ;;  %v3517_v5 = vld [vmem:[%s6791_s2 + $0x20] sm:$0xf] }
 0x272   :  { %1241 = vmatpush.msrb.mxu3 %v5051_v15  ;;  %v1167_v1 = vadd.f32 0.5, %v1164_v7  ;;  %v4272_v15 = vld [vmem:[%s6791_s2 + $0xec] sm:$0xf0] }
 0x273   :  { %4430 = vtanh.f32 %v1157_v43  ;;  %1111 = vmatmul.bf16.vlgmr.msra.gmra.mxu3 %v928_v54  ;;  %v3566_v54 = vor.u32 %v4260_v26, %v3565_v52  ;;  %v4246_v43 = vld [vmem:[%s6791_s2 + $0x24] sm:$0xf]  ;;  %1495 = vmatpush.bf16.msra.mxu1 %v3562_v3  ;;  %v4273_v26 = vld [vmem:[%s6791_s2 + $0xf4] sm:$0xf0] }
 0x274   :  { %1242 = vmatpush.msrb.mxu3 %v5059_v18  ;;  %v4270_v18 = vld [vmem:[%s6791_s2 + $0xe4] sm:$0xf]  ;;  %v3622_v55 = vor.u32 %v4273_v26, %v3621_v35  ;;  %v5641_v26 = vld [vmem:[%s6793_s4 + $0x38] sm:$0xff] }
 0x276   :  { %v1140_v45 = vpop.f32.mrf.mxu2  ;;  %1243 = vmatpush.msrb.mxu3 %v5070_v23  ;;  %v3614_v23 = vor.u32 %v4272_v15, %v3613_v12  ;;  %v3543_v12 = vld [vmem:[%s6791_s2 + $0x58] sm:$0xf0] }
 0x277   :  { %v3518_v45 = vor.u32 %v4248_v6, %v3517_v5  ;;  %v3541_v5 = vld [vmem:[%s6791_s2 + $0x48] sm:$0xf]  ;;  %v4253_v6 = vld [vmem:[%s6791_s2 + $0x54] sm:$0xf0] }
 0x278   :  { %1244 = vmatpush.msrb.mxu3 %v5084_v29  ;;  %v3615_v29 = vld [vmem:[%s6791_s2 + $0xf0] sm:$0xf0]  ;;  %1452 = vmatpush.bf16.msrb.mxu0 %v3614_v23  ;;  %v4244_v23 = vld [vmem:[%s6791_s2 + $0xc] sm:$0xf0] }
 0x279   :  { %v4431_v2 = vpop.eup %4430  ;;  %v3618_v46 = vor.u32 %v4270_v18, %v3615_v29  ;;  %v3501_v18 = vld [vmem:[%s6791_s2] sm:$0xf] }
 0x27a   :  { %v5386_v8 = vmul.f32 %v4431_v2, %v1167_v1  ;;  %1245 = vmatpush.msrb.mxu3 %v5092_v31  ;;  %v3597_v31 = vld [vmem:[%s6791_s2 + $0xc0] sm:$0xf]  ;;  %v3519_v1 = vld [vmem:[%s6791_s2 + $0x30] sm:$0xf0]  ;;  %v4251_v2 = vld [vmem:[%s6791_s2 + $0x4c] sm:$0xf]  ;;  %v3502_v9 = vor.u32 %v4244_v23, %v3501_v18 }
 0x27b   :  { %1465 = vmatpush.bf16.msrb.mxu2 %v3618_v46  ;;  %v3598_v13 = vor.u32 %v4268_v47, %v3597_v31  ;;  %v3522_v15 = vor.u32 %v4246_v43, %v3519_v1  ;;  %v3546_v46 = vor.u32 %v4251_v2, %v3543_v12  ;;  %v4242_v31 = vld [vmem:[%s6791_s2 + $0x4] sm:$0xf]  ;;  %v3503_v47 = vld [vmem:[%s6791_s2 + $0x10] sm:$0xf0]  ;;  %v3542_v43 = vor.u32 %v4253_v6, %v3541_v5  ;;  %v3509_v2 = vld [vmem:[%s6791_s2 + $0x8] sm:$0xf] }
 0x27c   :  { %1478 = vmatpush.bf16.msra.mxu3 %v3622_v55  ;;  %v4245_v12 = vld [vmem:[%s6791_s2 + $0x14] sm:$0xf0]  ;;  %v5597_v23 = vld [vmem:[%s6793_s4 + $0x70] sm:$0xff]  ;;  %v4298_v6 = vld [vmem:[%s6791_s2 + $0xc4] sm:$0xf] }
 0x27d   :  { %1453 = vmatpush.bf16.msrb.mxu0 %v3598_v13  ;;  %v3506_v13 = vor.u32 %v4242_v31, %v3503_v47  ;;  %1496 = vmatpush.bf16.msra.mxu1 %v3546_v46  ;;  %v5592_v18 = vld [vmem:[%s6793_s4 + $0x78] sm:$0xff]  ;;  %v5603_v46 = vld [vmem:[%s6793_s4 + $0x68] sm:$0xff] }
 0x27f   :  { %1466 = vmatpush.bf16.msrb.mxu2 %v3602_v14  ;;  %v4247_v14 = vld [vmem:[%s6791_s2 + $0x2c] sm:$0xf] }
 0x280   :  { %v3530_v19 = vor.u32 %v4247_v14, %v3527_v10  ;;  %v1252_v14 = vld [vmem:[#allocation2 + $0x30] sm:$0xc0]  ;;  %v5616_v10 = vld [vmem:[%s6793_s4 + $0x58] sm:$0xff] }
 0x281   :  { %1454 = vmatpush.bf16.msrb.mxu0 %v3582_v21  ;;  %v4243_v21 = vld [vmem:[%s6791_s2 + $0xc] sm:$0xf] }
 0x282   :  { %1497 = vmatpush.bf16.msra.mxu1 %v3530_v19 }
 0x283   :  { %1467 = vmatpush.bf16.msrb.mxu2 %v3586_v50  ;;  %v3514_v50 = vor.u32 %v4243_v21, %v3511_v22 }
 0x285   :  { %1455 = vmatpush.bf16.msrb.mxu0 %v3566_v54  ;;  %v1160_v54 = vmul.f32 0.5, %v1156_v25  ;;  %v5635_v25 = vld [vmem:[%s6793_s4 + $0x40] sm:$0xff] }
 0x286   :  { %1498 = vmatpush.bf16.msra.mxu1 %v3514_v50  ;;  %v1253_v50 = vld [vmem:[#allocation2] sm:$0xc0] }
 0x287   :  { %1468 = vmatpush.bf16.msrb.mxu2 %v3570_v56  ;;  %v4269_v56 = vld [vmem:[%s6791_s2 + $0xd4] sm:$0xf0] }
 0x288   :  { %v3606_v0 = vor.u32 %v4269_v56, %v3605_v53 }
 0x289   :  { %1456 = vmatpush.bf16.msrb.mxu0 %v3550_v32  ;;  %v1172_v32 = vrot.slane %v5157_v60, 6  ;;  %v3557_v60 = vld [vmem:[%s6791_s2 + $0x68] sm:$0xf] }
 0x28a   :  { %1479 = vmatpush.bf16.msra.mxu3 %v3606_v0  ;;  %v3558_v58 = vor.u32 %v4257_v42, %v3557_v60  ;;  %v3742_v60 = vld [vmem:[%s6791_s2 + $0xe0] sm:$0xf]  ;;  %v4304_v42 = vld [vmem:[%s6791_s2 + $0xec] sm:$0xf0] }
 0x28b   :  { %1469 = vmatpush.bf16.msrb.mxu2 %v3554_v37  ;;  %v3573_v37 = vld [vmem:[%s6791_s2 + $0x88] sm:$0xf] }
 0x28c   :  { %v3574_v41 = vor.u32 %v4261_v38, %v3573_v37 }
 0x28d   :  { %1457 = vmatpush.bf16.msrb.mxu0 %v3534_v57 }
 0x28e   :  { %1480 = vmatpush.bf16.msra.mxu3 %v3590_v33 }
 0x28f   :  { %1470 = vmatpush.bf16.msrb.mxu2 %v3538_v63 }
 0x291   :  { %1458 = vmatpush.bf16.msrb.mxu0 %v3518_v45  ;;  %v4249_v45 = vld [vmem:[%s6791_s2 + $0x34] sm:$0xf0] }
 0x292   :  { %1481 = vmatpush.bf16.msra.mxu3 %v3574_v41 }
 0x293   :  { %1471 = vmatpush.bf16.msrb.mxu2 %v3522_v15  ;;  %v3510_v15 = vor.u32 %v4245_v12, %v3509_v2  ;;  %v3752_v2 = vld [vmem:[%s6791_s2 + $0xf8] sm:$0xf0] }
 0x295   :  { %1459 = vmatpush.bf16.msrb.mxu0 %v3502_v9  ;;  %v5610_v9 = vld [vmem:[%s6793_s4 + $0x60] sm:$0xff] }
 0x296   :  { %1482 = vmatpush.bf16.msra.mxu3 %v3558_v58  ;;  %v5678_v58 = vld [vmem:[%s6793_s4 + $0x18] sm:$0xff] }
 0x297   :  { %1472 = vmatpush.bf16.msrb.mxu2 %v3506_v13 }
 0x299   :  { %1560 = vmatpush.msra.mxu0 %v5592_v18 }
 0x29a   :  { %1483 = vmatpush.bf16.msra.mxu3 %v3542_v43  ;;  %v3728_v43 = vld [vmem:[%s6791_s2 + $0xd0] sm:$0xf0] }
 0x29b   :  { %1561 = vmatpush.msra.mxu0 %v5597_v23 }
 0x29d   :  { %1562 = vmatpush.msra.mxu0 %v5603_v46 }
 0x29f   :  { %1563 = vmatpush.msra.mxu0 %v5610_v9 }
 0x2a1   :  { %1564 = vmatpush.msra.mxu0 %v5616_v10 }
 0x2ee   :  { %v885_v62 = vpop.f32.mrf.mxu3 }
 0x2ef   :  { %v886_v7 = vadd.f32 %v5294_v44, %v885_v62 }
 0x2f1   :  { %v888_v29 = vmax.f32 %v886_v7, 0.0  ;;  %v3525_v7 = vld [vmem:[%s6791_s2 + $0x28] sm:$0xf] }
 0x2f2   :  { %v3526_v1 = vor.u32 %v4249_v45, %v3525_v7  ;;  %v5710_v7 = vld [vmem:[%s6793_s4] sm:$0xff]  ;;  %v3731_v45 = vor.u32 %v4298_v6, %v3728_v43  ;;  %v3648_v6 = vld [vmem:[%s6791_s2 + $0x30] sm:$0xf0]  ;;  %v4283_v43 = vld [vmem:[%s6791_s2 + $0x4c] sm:$0xf] }
 0x2f3   :  { %889 = vst.msk [vmem:[#allocation3 + $0x2] sm:$0x3] %vm529_vm3, %v888_v29 }
 0x2f4   :  { %1484 = vmatpush.bf16.msra.mxu3 %v3526_v1  ;;  %v4303_v1 = vld [vmem:[%s6791_s2 + $0xec] sm:$0xf] }
 0x2f5   :  { %v3755_v12 = vor.u32 %v4303_v1, %v3752_v2 }
 0x2f6   :  { %v1112_v34 = vpop.f32.mrf.mxu3 }
 0x2f7   :  { %v1147_v16 = vrot.slane %v1112_v34, 4 }
 0x2f8   :  { %1485 = vmatpush.bf16.msra.mxu3 %v3510_v15  ;;  %v3710_v15 = vld [vmem:[%s6791_s2 + $0xa0] sm:$0xf] }
 0x2f9   :  { %v1155_v20 = vadd.f32 %v1147_v16, %v891_v49 }
 0x2fb   :  { %v1159_v24 = vmul.f32 0.5, %v1155_v20  ;;  %v5629_v20 = vld [vmem:[%s6793_s4 + $0x48] sm:$0xff] }
 0x2fd   :  { %4432 = vtanh.f32 %v1159_v24 }
 0x2fe   :  { %v1114_v52 = vpop.f32.mrf.mxu3  ;;  %4434 = vtanh.f32 %v1160_v54  ;;  %v5647_v54 = vld [vmem:[%s6793_s4 + $0x30] sm:$0xff] }
 0x303   :  { %v4433_v4 = vpop.eup %4432 }
 0x304   :  { %v1165_v28 = vmul.f32 0.5, %v4433_v4  ;;  %v4435_v36 = vpop.eup %4434 }
 0x305   :  { %v1166_v57 = vmul.f32 0.5, %v4435_v36 }
 0x306   :  { %v1168_v30 = vadd.f32 0.5, %v1165_v28  ;;  %v5659_v28 = vld [vmem:[%s6793_s4 + $0x20] sm:$0xff] }
 0x307   :  { %v1169_v59 = vadd.f32 0.5, %v1166_v57  ;;  %v4302_v57 = vld [vmem:[%s6791_s2 + $0xe4] sm:$0xf] }
 0x308   :  { %v1174_v39 = vmul.f32 %v1172_v32, %v1168_v30 }
 0x30a   :  { %v5562_v40 = vadd.f32 %v5386_v8, %v1174_v39 }
 0x30c   :  { %4436 = vtanh.f32 %v5562_v40  ;;  %v1534_v39 = vrot.slane %v5562_v40, 6  ;;  %v3743_v40 = vor.u32 %v4304_v42, %v3742_v60  ;;  %v3664_v60 = vld [vmem:[%s6791_s2 + $0x50] sm:$0xf0] }
 0x312   :  { %v4437_v61 = vpop.eup %4436 }
 0x313   :  { %v1178_v8 = vmul.f32 %v4437_v61, %v1169_v59  ;;  %v3744_v59 = vld [vmem:[%s6791_s2 + $0xf0] sm:$0xf0] }
 0x314   :  { %v3747_v61 = vor.u32 %v4302_v57, %v3744_v59  ;;  %v4287_v57 = vld [vmem:[%s6791_s2 + $0x6c] sm:$0xf] }
 0x315   :  { %v1196_v62 = vrot.slane %v1178_v8, 4  ;;  %v1256_v63 = vpack.c.bf16 %v1178_v8, %v1178_v8  ;;  %v5687_v8 = vld [vmem:[%s6793_s4 + $0x10] sm:$0xff] }
 0x317   :  { %1214 = vmatmul.f32.vlgmr.msrb.gmra.mxu1 %v1196_v62  ;;  %v1290_v3 = vrot.slane %v1256_v63, 2  ;;  %v5693_v62 = vld [vmem:[%s6793_s4 + $0x8] sm:$0xff]  ;;  %v3726_v63 = vld [vmem:[%s6791_s2 + $0xc0] sm:$0xf] }
 0x318   :  { %1827 = vmatpush.bf16.msrb.mxu1 %v3747_v61  ;;  %v3646_v61 = vld [vmem:[%s6791_s2 + $0x20] sm:$0xf] }
 0x319   :  { %1460 = vmatmul.bf16.vlgmr.msrb.gmra.mxu0 %v1290_v3  ;;  %1473 = vmatmul.bf16.vlgmr.msrb.gmra.mxu2 %v1290_v3 }
 0x31c   :  { %1828 = vmatpush.bf16.msrb.mxu1 %v3731_v45  ;;  %v3672_v45 = vld [vmem:[%s6791_s2 + $0x58] sm:$0xf0] }
 0x31d   :  { %v3675_v2 = vor.u32 %v4283_v43, %v3672_v45  ;;  %v3702_v43 = vld [vmem:[%s6791_s2 + $0x88] sm:$0xf]  ;;  %v4293_v45 = vld [vmem:[%s6791_s2 + $0x94] sm:$0xf0] }
 0x31f   :  { %1499 = vmatmul.bf16.vlgmr.msra.gmra.mxu1 %v1290_v3 }
 0x394   :  { %v1215_v29 = vpop.f32.mrf.mxu1 }
 0x395   :  { %v1216_v31 = vadd.f32 %v5152_v17, %v1215_v29  ;;  %v5623_v17 = vld [vmem:[%s6793_s4 + $0x50] sm:$0xff] }
 0x396   :  { %v1461_v47 = vpop.f32.mrf.mxu0  ;;  %1565 = vmatpush.msra.mxu0 %v5623_v17  ;;  %v4296_v29 = vld [vmem:[%s6791_s2 + $0xac] sm:$0xf0] }
 0x397   :  { %v1218_v13 = vmax.f32 %v1216_v31, 0.0  ;;  %v1508_v34 = vrot.slane %v1461_v47, 2  ;;  %v4294_v31 = vld [vmem:[%s6791_s2 + $0xa4] sm:$0xf]  ;;  %v3711_v47 = vor.u32 %v4296_v29, %v3710_v15  ;;  %v4276_v15 = vld [vmem:[%s6791_s2 + $0xc] sm:$0xf0] }
 0x398   :  { %1566 = vmatpush.msra.mxu0 %v5629_v20  ;;  %v4274_v29 = vld [vmem:[%s6791_s2 + $0x4] sm:$0xf] }
 0x399   :  { %v1516_v16 = vadd.f32 %v1508_v34, %v1252_v14  ;;  %3498 = vmatmul.msk.f32.vlgmr.msrb.gmra.mxu3 %vm504_vm2, %v1218_v13  ;;  %v3712_v13 = vld [vmem:[%s6791_s2 + $0xb0] sm:$0xf0]  ;;  %v4299_v14 = vld [vmem:[%s6791_s2 + $0xcc] sm:$0xf] }
 0x39a   :  { %1567 = vmatpush.msra.mxu0 %v5635_v25  ;;  %1814 = vmatpush.bf16.msrb.mxu3 %v3743_v40  ;;  %v3715_v34 = vor.u32 %v4294_v31, %v3712_v13  ;;  %v3688_v40 = vld [vmem:[%s6791_s2 + $0x78] sm:$0xf0] }
 0x39b   :  { %v1520_v19 = vmul.f32 0.5, %v1516_v16  ;;  %v3736_v16 = vld [vmem:[%s6791_s2 + $0xd8] sm:$0xf0]  ;;  %v3691_v59 = vor.u32 %v4287_v57, %v3688_v40 }
 0x39c   :  { %v1474_v48 = vpop.f32.mrf.mxu2  ;;  %v1500_v49 = vpop.f32.mrf.mxu1  ;;  %1568 = vmatpush.msra.mxu0 %v5641_v26  ;;  %1829 = vmatpush.bf16.msrb.mxu1 %v3715_v34  ;;  %v4279_v34 = vld [vmem:[%s6791_s2 + $0x2c] sm:$0xf] }
 0x39d   :  { %4438 = vtanh.f32 %v1520_v19  ;;  %v1509_v21 = vrot.slane %v1474_v48, 2  ;;  %v1511_v22 = vrot.slane %v1500_v49, 2  ;;  %v3739_v19 = vor.u32 %v4299_v14, %v3736_v16  ;;  %v3694_v48 = vld [vmem:[%s6791_s2 + $0x80] sm:$0xf]  ;;  %v4292_v49 = vld [vmem:[%s6791_s2 + $0x8c] sm:$0xf0] }
 0x39e   :  { %v1463_v24 = vpop.f32.mrf.mxu0  ;;  %1569 = vmatpush.msra.mxu0 %v5647_v54  ;;  %v3656_v14 = vld [vmem:[%s6791_s2 + $0x38] sm:$0xf0] }
 0x39f   :  { %v1517_v52 = vadd.f32 %v1509_v21, %v1253_v50  ;;  %v1519_v35 = vadd.f32 %v1511_v22, %v1255_v51  ;;  %v4290_v21 = vld [vmem:[%s6791_s2 + $0x84] sm:$0xf]  ;;  %v3695_v22 = vor.u32 %v4292_v49, %v3694_v48  ;;  %v3696_v50 = vld [vmem:[%s6791_s2 + $0x90] sm:$0xf0]  ;;  %v4295_v24 = vld [vmem:[%s6791_s2 + $0xac] sm:$0xf]  ;;  %v3659_v16 = vor.u32 %v4279_v34, %v3656_v14 }
 0x3a0   :  { %1570 = vmatpush.msra.mxu0 %v5653_v11  ;;  %v3699_v51 = vor.u32 %v4290_v21, %v3696_v50  ;;  %v4275_v48 = vld [vmem:[%s6791_s2 + $0xc] sm:$0xf]  ;;  %v3640_v49 = vld [vmem:[%s6791_s2 + $0x18] sm:$0xf0]  ;;  %v4285_v34 = vld [vmem:[%s6791_s2 + $0x54] sm:$0xf0] }
 0x3a1   :  { %v1521_v53 = vmul.f32 0.5, %v1517_v52  ;;  %4440 = vtanh.f32 %v1519_v35  ;;  %1486 = vmatmul.bf16.vlgmr.msra.gmra.mxu3 %v1290_v3  ;;  %v4300_v3 = vld [vmem:[%s6791_s2 + $0xcc] sm:$0xf0]  ;;  %v3720_v52 = vld [vmem:[%s6791_s2 + $0xb8] sm:$0xf0] }
 0x3a2   :  { %1571 = vmatpush.msra.mxu0 %v5659_v28  ;;  %v3727_v5 = vor.u32 %v4300_v3, %v3726_v63  ;;  %v3723_v35 = vor.u32 %v4295_v24, %v3720_v52  ;;  %1830 = vmatpush.bf16.msrb.mxu1 %v3699_v51  ;;  %v4280_v63 = vld [vmem:[%s6791_s2 + $0x2c] sm:$0xf0]  ;;  %v4278_v3 = vld [vmem:[%s6791_s2 + $0x24] sm:$0xf]  ;;  %v5842_v51 = vld [vmem:[%s6793_s4 + $0xb8] sm:$0xff] }
 0x3a3   :  { %v4439_v55 = vpop.eup %4438  ;;  %4442 = vtanh.f32 %v1521_v53  ;;  %v3678_v53 = vld [vmem:[%s6791_s2 + $0x60] sm:$0xf]  ;;  %v3651_v1 = vor.u32 %v4278_v3, %v3648_v6  ;;  %1600 = vmatpush.msra.mxu2 %v5842_v51  ;;  %v5854_v52 = vld [vmem:[%s6793_s4 + $0xa8] sm:$0xff] }
 0x3a4   :  { %v1526_v56 = vmul.f32 0.5, %v4439_v55  ;;  %v1476_v0 = vpop.f32.mrf.mxu2  ;;  %v1502_v4 = vpop.f32.mrf.mxu1  ;;  %1572 = vmatpush.msra.mxu0 %v5678_v58  ;;  %1815 = vmatpush.bf16.msrb.mxu3 %v3727_v5  ;;  %v4288_v55 = vld [vmem:[%s6791_s2 + $0x6c] sm:$0xf0]  ;;  %v3647_v5 = vor.u32 %v4280_v63, %v3646_v61  ;;  %v4297_v61 = vld [vmem:[%s6791_s2 + $0xb4] sm:$0xf0] }
 0x3a5   :  { %v3679_v0 = vor.u32 %v4288_v55, %v3678_v53  ;;  %v3680_v4 = vld [vmem:[%s6791_s2 + $0x70] sm:$0xf0]  ;;  %v1254_v53 = vld [vmem:[#allocation2 + $0x18] sm:$0xc0]  ;;  %v5862_v55 = vld [vmem:[%s6793_s4 + $0xa0] sm:$0xff] }
 0x3a6   :  { %v1529_v27 = vadd.f32 0.5, %v1526_v56  ;;  %1573 = vmatpush.msra.mxu0 %v5687_v8  ;;  %v4286_v56 = vld [vmem:[%s6791_s2 + $0x64] sm:$0xf] }
 0x3a7   :  { %v4441_v30 = vpop.eup %4440 }
 0x3a8   :  { %v1537_v32 = vmul.f32 %v4441_v30, %v1529_v27  ;;  %1574 = vmatpush.msra.mxu0 %v5693_v62  ;;  %1816 = vmatpush.bf16.msrb.mxu3 %v3711_v47  ;;  %v3683_v27 = vor.u32 %v4286_v56, %v3680_v4  ;;  %v4291_v30 = vld [vmem:[%s6791_s2 + $0x8c] sm:$0xf]  ;;  %v3632_v47 = vld [vmem:[%s6791_s2 + $0x10] sm:$0xf0] }
 0x3a9   :  { %v4443_v33 = vpop.eup %4442  ;;  %v3635_v13 = vor.u32 %v4274_v29, %v3632_v47  ;;  %v3686_v29 = vld [vmem:[%s6791_s2 + $0x68] sm:$0xf] }
 0x3aa   :  { %v1527_v37 = vmul.f32 0.5, %v4443_v33  ;;  %1575 = vmatpush.msra.mxu0 %v5710_v7  ;;  %1831 = vmatpush.bf16.msrb.mxu1 %v3683_v27  ;;  %v5878_v27 = vld [vmem:[%s6793_s4 + $0x90] sm:$0xff] }
 0x3ac   :  { %v1530_v38 = vadd.f32 0.5, %v1527_v37  ;;  %1853 = vmatpush.bf16.msrb.mxu0 %v3755_v12  ;;  %1817 = vmatpush.bf16.msrb.mxu3 %v3695_v22  ;;  %v3662_v37 = vld [vmem:[%s6791_s2 + $0x40] sm:$0xf]  ;;  %v3643_v22 = vor.u32 %v4275_v48, %v3640_v49  ;;  %v3638_v49 = vld [vmem:[%s6791_s2 + $0x8] sm:$0xf] }
 0x3ad   :  { %v3630_v12 = vld [vmem:[%s6791_s2] sm:$0xf] }
 0x3ae   :  { %v1536_v36 = vmul.f32 %v1534_v39, %v1530_v38  ;;  %v4284_v38 = vld [vmem:[%s6791_s2 + $0x4c] sm:$0xf0]  ;;  %v4282_v39 = vld [vmem:[%s6791_s2 + $0x44] sm:$0xf]  ;;  %v3631_v31 = vor.u32 %v4276_v15, %v3630_v12  ;;  %v3703_v15 = vor.u32 %v4293_v45, %v3702_v43 }
 0x3af   :  { %v3667_v42 = vor.u32 %v4282_v39, %v3664_v60  ;;  %v4301_v60 = vld [vmem:[%s6791_s2 + $0xd4] sm:$0xf0] }
 0x3b0   :  { %v5664_v41 = vadd.f32 %v1537_v32, %v1536_v36  ;;  %1854 = vmatpush.bf16.msrb.mxu0 %v3739_v19  ;;  %v3704_v32 = vld [vmem:[%s6791_s2 + $0x98] sm:$0xf0]  ;;  %1818 = vmatpush.bf16.msrb.mxu3 %v3679_v0  ;;  %v3663_v36 = vor.u32 %v4284_v38, %v3662_v37  ;;  %v5892_v37 = vld [vmem:[%s6793_s4 + $0x88] sm:$0xff]  ;;  %v5900_v38 = vld [vmem:[%s6793_s4 + $0x80] sm:$0xff] }
 0x3b1   :  { %v3707_v33 = vor.u32 %v4291_v30, %v3704_v32  ;;  %1832 = vmatpush.bf16.msrb.mxu1 %v3667_v42  ;;  %v5870_v0 = vld [vmem:[%s6793_s4 + $0x98] sm:$0xff]  ;;  %v3750_v30 = vld [vmem:[%s6791_s2 + $0xe8] sm:$0xf] }
 0x3b2   :  { %v4305_v32 = vld [vmem:[%s6791_s2 + $0xf4] sm:$0xf0] }
 0x3b3   :  { %v3751_v39 = vor.u32 %v4305_v32, %v3750_v30  ;;  %v5972_v30 = vld [vmem:[%s6793_s4 + $0xc0] ss:$0 sm:$0xff] }
 0x3b4   :  { %1855 = vmatpush.bf16.msrb.mxu0 %v3723_v35  ;;  %1819 = vmatpush.bf16.msrb.mxu3 %v3663_v36  ;;  %v3734_v36 = vld [vmem:[%s6791_s2 + $0xc8] sm:$0xf] }
 0x3b5   :  { %1833 = vmatpush.bf16.msrb.mxu1 %v3651_v1  ;;  %v3735_v40 = vor.u32 %v4301_v60, %v3734_v36 }
 0x3b8   :  { %1856 = vmatpush.bf16.msrb.mxu0 %v3707_v33  ;;  %1820 = vmatpush.bf16.msrb.mxu3 %v3647_v5 }
 0x3b9   :  { %1834 = vmatpush.bf16.msrb.mxu1 %v3635_v13  ;;  %v3670_v13 = vld [vmem:[%s6791_s2 + $0x48] sm:$0xf] }
 0x3ba   :  { %v3671_v14 = vor.u32 %v4285_v34, %v3670_v13 }
 0x3bc   :  { %1857 = vmatpush.bf16.msrb.mxu0 %v3691_v59  ;;  %1821 = vmatpush.bf16.msrb.mxu3 %v3631_v31  ;;  %v3718_v59 = vld [vmem:[%s6791_s2 + $0xa8] sm:$0xf]  ;;  %v4289_v31 = vld [vmem:[%s6791_s2 + $0x74] sm:$0xf0] }
 0x3bd   :  { %1947 = vmatpush.msra.mxu1 %v5842_v51  ;;  %v3719_v6 = vor.u32 %v4297_v61, %v3718_v59  ;;  %v3687_v47 = vor.u32 %v4289_v31, %v3686_v29 }
 0x3c0   :  { %1858 = vmatpush.bf16.msrb.mxu0 %v3675_v2  ;;  %1907 = vmatpush.msra.mxu3 %v5592_v18 }
 0x3c2   :  { %1908 = vmatpush.msra.mxu3 %v5597_v23 }
 0x3c4   :  { %1859 = vmatpush.bf16.msrb.mxu0 %v3659_v16  ;;  %1909 = vmatpush.msra.mxu3 %v5603_v46  ;;  %v3654_v16 = vld [vmem:[%s6791_s2 + $0x28] sm:$0xf] }
 0x3c6   :  { %1910 = vmatpush.msra.mxu3 %v5610_v9 }
 0x3c8   :  { %1860 = vmatpush.bf16.msrb.mxu0 %v3643_v22  ;;  %1911 = vmatpush.msra.mxu3 %v5616_v10 }
 0x3ca   :  { %1912 = vmatpush.msra.mxu3 %v5623_v17 }
 0x3cc   :  { %1913 = vmatpush.msra.mxu3 %v5629_v20 }
 0x3ce   :  { %1914 = vmatpush.msra.mxu3 %v5635_v25 }
 0x3d0   :  { %1915 = vmatpush.msra.mxu3 %v5641_v26 }
 0x3d2   :  { %1916 = vmatpush.msra.mxu3 %v5647_v54 }
 0x3d4   :  { %1917 = vmatpush.msra.mxu3 %v5653_v11 }
 0x3d6   :  { %1918 = vmatpush.msra.mxu3 %v5659_v28 }
 0x3d8   :  { %1919 = vmatpush.msra.mxu3 %v5678_v58 }
 0x3da   :  { %1920 = vmatpush.msra.mxu3 %v5687_v8 }
 0x3dc   :  { %1921 = vmatpush.msra.mxu3 %v5693_v62 }
 0x3de   :  { %1922 = vmatpush.msra.mxu3 %v5710_v7 }
 0x41c   :  { %v1247_v19 = vpop.f32.mrf.mxu3 }
 0x41d   :  { %v1248_v21 = vadd.f32 %v5294_v44, %v1247_v19  ;;  %v5847_v44 = vld [vmem:[%s6793_s4 + $0xb0] sm:$0xff]  ;;  %v4281_v19 = vld [vmem:[%s6791_s2 + $0x34] sm:$0xf0] }
 0x41e   :  { %1601 = vmatpush.msra.mxu2 %v5847_v44  ;;  %1948 = vmatpush.msra.mxu1 %v5847_v44  ;;  %v3655_v48 = vor.u32 %v4281_v19, %v3654_v16 }
 0x41f   :  { %v1250_v50 = vmax.f32 %v1248_v21, 0.0  ;;  %v4277_v21 = vld [vmem:[%s6791_s2 + $0x14] sm:$0xf0] }
 0x420   :  { %1602 = vmatpush.msra.mxu2 %v5854_v52  ;;  %1949 = vmatpush.msra.mxu1 %v5854_v52  ;;  %v3639_v22 = vor.u32 %v4277_v21, %v3638_v49  ;;  %v3855_v49 = vld [vmem:[%s6791_s2 + $0xc0] sm:$0xf] }
 0x421   :  { %1251 = vst.msk [vmem:[#allocation3 + $0x4] sm:$0x3] %vm529_vm3, %v1250_v50  ;;  %v4334_v50 = vld [vmem:[%s6791_s2 + $0xe4] sm:$0xf] }
 0x422   :  { %1603 = vmatpush.msra.mxu2 %v5862_v55  ;;  %1950 = vmatpush.msra.mxu1 %v5862_v55 }
 0x424   :  { %v1487_v24 = vpop.f32.mrf.mxu3  ;;  %1604 = vmatpush.msra.mxu2 %v5870_v0  ;;  %1951 = vmatpush.msra.mxu1 %v5870_v0 }
 0x425   :  { %v1510_v35 = vrot.slane %v1487_v24, 2  ;;  %v3873_v24 = vld [vmem:[%s6791_s2 + $0xf0] sm:$0xf0] }
 0x426   :  { %1605 = vmatpush.msra.mxu2 %v5878_v27  ;;  %1952 = vmatpush.msra.mxu1 %v5878_v27 }
 0x427   :  { %v1518_v56 = vadd.f32 %v1510_v35, %v1254_v53  ;;  %v3876_v35 = vor.u32 %v4334_v50, %v3873_v24  ;;  %v3871_v53 = vld [vmem:[%s6791_s2 + $0xe0] sm:$0xf]  ;;  %v4335_v24 = vld [vmem:[%s6791_s2 + $0xec] sm:$0xf] }
 0x428   :  { %1606 = vmatpush.msra.mxu2 %v5892_v37  ;;  %1953 = vmatpush.msra.mxu1 %v5892_v37 }
 0x429   :  { %v1522_v4 = vmul.f32 0.5, %v1518_v56  ;;  %v4336_v56 = vld [vmem:[%s6791_s2 + $0xec] sm:$0xf0] }
 0x42a   :  { %1607 = vmatpush.msra.mxu2 %v5900_v38  ;;  %1954 = vmatpush.msra.mxu1 %v5900_v38  ;;  %v3872_v36 = vor.u32 %v4336_v56, %v3871_v53  ;;  %v3839_v56 = vld [vmem:[%s6791_s2 + $0xa0] sm:$0xf] }
 0x42b   :  { %4444 = vtanh.f32 %v1522_v4 }
 0x42c   :  { %v1489_v33 = vpop.f32.mrf.mxu3  ;;  %4446 = vtanh.f32 %v5664_v41  ;;  %1840 = vmatpush.bf16.msrb.mxu2 %v3751_v39 }
 0x42d   :  { %v1615_v33 = vld [vmem:[#allocation2 + $0x20] sm:$0x3] }
 0x430   :  { %1841 = vmatpush.bf16.msrb.mxu2 %v3735_v40  ;;  %v1614_v40 = vld [vmem:[#allocation2 + $0x8] sm:$0x3] }
 0x431   :  { %v4445_v42 = vpop.eup %4444 }
 0x432   :  { %v1528_v57 = vmul.f32 0.5, %v4445_v42  ;;  %v4447_v3 = vpop.eup %4446 }
 0x434   :  { %v1531_v63 = vadd.f32 0.5, %v1528_v57  ;;  %1842 = vmatpush.bf16.msrb.mxu2 %v3719_v6  ;;  %v1617_v6 = vld [vmem:[#allocation2 + $0x38] sm:$0x3] }
 0x436   :  { %v1540_v5 = vmul.f32 %v4447_v3, %v1531_v63 }
 0x438   :  { %v1558_v1 = vrot.slane %v1540_v5, 6  ;;  %v1618_v2 = vpack.c.bf16 %v1540_v5, %v1540_v5  ;;  %1843 = vmatpush.bf16.msrb.mxu2 %v3703_v15  ;;  %v1884_v15 = vrot.slane %v5664_v41, 6  ;;  %v4330_v41 = vld [vmem:[%s6791_s2 + $0xc4] sm:$0xf] }
 0x43a   :  { %1576 = vmatmul.f32.vlgmr.msra.gmra.mxu0 %v1558_v1  ;;  %v1652_v12 = vrot.slane %v1618_v2, 3 }
 0x43b   :  { %2171 = vmatpush.bf16.msra.mxu0 %v3876_v35  ;;  %v3881_v35 = vld [vmem:[%s6791_s2 + $0xf8] sm:$0xf0] }
 0x43c   :  { %1822 = vmatmul.bf16.vlgmr.msrb.gmra.mxu3 %v1652_v12  ;;  %1835 = vmatmul.bf16.vlgmr.msrb.gmra.mxu1 %v1652_v12  ;;  %v3884_v53 = vor.u32 %v4335_v24, %v3881_v35  ;;  %v3775_v35 = vld [vmem:[%s6791_s2 + $0x20] sm:$0xf] }
 0x43d   :  { %1844 = vmatpush.bf16.msrb.mxu2 %v3687_v47 }
 0x43e   :  { %2197 = vmatpush.bf16.msrb.mxu3 %v3884_v53  ;;  %v4312_v53 = vld [vmem:[%s6791_s2 + $0x2c] sm:$0xf0] }
 0x441   :  { %1845 = vmatpush.bf16.msrb.mxu2 %v3671_v14 }
 0x442   :  { %1861 = vmatmul.bf16.vlgmr.msrb.gmra.mxu0 %v1652_v12 }
 0x445   :  { %1846 = vmatpush.bf16.msrb.mxu2 %v3655_v48 }
 0x449   :  { %1847 = vmatpush.bf16.msrb.mxu2 %v3639_v22  ;;  %v3857_v22 = vld [vmem:[%s6791_s2 + $0xd0] sm:$0xf0] }
 0x44a   :  { %v3860_v50 = vor.u32 %v4330_v41, %v3857_v22  ;;  %v3793_v41 = vld [vmem:[%s6791_s2 + $0x50] sm:$0xf0]  ;;  %v4319_v22 = vld [vmem:[%s6791_s2 + $0x6c] sm:$0xf] }
 0x44c   :  { %2172 = vmatpush.bf16.msra.mxu0 %v3860_v50  ;;  %v3817_v50 = vld [vmem:[%s6791_s2 + $0x78] sm:$0xf0] }
 0x44d   :  { %v3820_v24 = vor.u32 %v4319_v22, %v3817_v50 }
 0x4b7   :  { %v1577_v4 = vpop.f32.mrf.mxu0 }
 0x4b8   :  { %v1578_v32 = vadd.f32 %v5972_v30, %v1577_v4  ;;  %v4328_v4 = vld [vmem:[%s6791_s2 + $0xac] sm:$0xf0] }
 0x4b9   :  { %v1836_v39 = vpop.f32.mrf.mxu1 }
 0x4ba   :  { %v1580_v60 = vmax.f32 %v1578_v32, 0.0  ;;  %v1867_v42 = vadd.f32 %v1836_v39, %v1615_v33  ;;  %v4326_v32 = vld [vmem:[%s6791_s2 + $0xa4] sm:$0xf]  ;;  %v3840_v33 = vor.u32 %v4328_v4, %v3839_v56  ;;  %v3841_v39 = vld [vmem:[%s6791_s2 + $0xb0] sm:$0xf0]  ;;  %v3776_v4 = vor.u32 %v4312_v53, %v3775_v35 }
 0x4bb   :  { %v4310_v56 = vld [vmem:[%s6791_s2 + $0x24] sm:$0xf]  ;;  %v1962_v35 = vld [vmem:[#allocation2 + $0x20] sm:$0xc] }
 0x4bc   :  { %v1871_v57 = vmul.f32 0.5, %v1867_v42  ;;  %3627 = vmatmul.msk.f32.vlgmr.msra.gmra.mxu2 %vm504_vm2, %v1580_v60  ;;  %v3865_v60 = vld [vmem:[%s6791_s2 + $0xd8] sm:$0xf0]  ;;  %v3844_v42 = vor.u32 %v4326_v32, %v3841_v39  ;;  %v3777_v32 = vld [vmem:[%s6791_s2 + $0x30] sm:$0xf0] }
 0x4bd   :  { %2158 = vmatpush.bf16.msra.mxu2 %v3872_v36  ;;  %v4331_v36 = vld [vmem:[%s6791_s2 + $0xcc] sm:$0xf] }
 0x4be   :  { %4448 = vtanh.f32 %v1871_v57  ;;  %v3868_v57 = vor.u32 %v4331_v36, %v3865_v60  ;;  %2173 = vmatpush.bf16.msra.mxu0 %v3844_v42  ;;  %v4315_v39 = vld [vmem:[%s6791_s2 + $0x4c] sm:$0xf]  ;;  %v3801_v36 = vld [vmem:[%s6791_s2 + $0x58] sm:$0xf0]  ;;  %v3759_v42 = vld [vmem:[%s6791_s2] sm:$0xf] }
 0x4bf   :  { %v1823_v59 = vpop.f32.mrf.mxu3  ;;  %v1862_v61 = vpop.f32.mrf.mxu0  ;;  %v3804_v60 = vor.u32 %v4315_v39, %v3801_v36 }
 0x4c0   :  { %v1866_v63 = vadd.f32 %v1823_v59, %v1614_v40  ;;  %v1869_v45 = vadd.f32 %v1862_v61, %v1617_v6  ;;  %v3823_v40 = vld [vmem:[%s6791_s2 + $0x80] sm:$0xf]  ;;  %v4324_v59 = vld [vmem:[%s6791_s2 + $0x8c] sm:$0xf0]  ;;  %v4322_v61 = vld [vmem:[%s6791_s2 + $0x84] sm:$0xf]  ;;  %2198 = vmatpush.bf16.msrb.mxu3 %v3868_v57 }
 0x4c1   :  { %v1838_v3 = vpop.f32.mrf.mxu1  ;;  %v4327_v6 = vld [vmem:[%s6791_s2 + $0xac] sm:$0xf]  ;;  %v4308_v57 = vld [vmem:[%s6791_s2 + $0xc] sm:$0xf0] }
 0x4c2   :  { %v1870_v5 = vmul.f32 0.5, %v1866_v63  ;;  %v3824_v63 = vor.u32 %v4324_v59, %v3823_v40  ;;  %v3825_v3 = vld [vmem:[%s6791_s2 + $0x90] sm:$0xf0]  ;;  %v4306_v40 = vld [vmem:[%s6791_s2 + $0x4] sm:$0xf]  ;;  %v3760_v59 = vor.u32 %v4308_v57, %v3759_v42 }
 0x4c4   :  { %v4449_v43 = vpop.eup %4448  ;;  %4450 = vtanh.f32 %v1870_v5  ;;  %1848 = vmatmul.bf16.vlgmr.msrb.gmra.mxu2 %v1652_v12  ;;  %v4332_v12 = vld [vmem:[%s6791_s2 + $0xcc] sm:$0xf0]  ;;  %v3828_v5 = vor.u32 %v4322_v61, %v3825_v3  ;;  %v3761_v61 = vld [vmem:[%s6791_s2 + $0x10] sm:$0xf0]  ;;  %v4311_v3 = vld [vmem:[%s6791_s2 + $0x2c] sm:$0xf] }
 0x4c5   :  { %v1877_v1 = vmul.f32 0.5, %v4449_v43  ;;  %4452 = vtanh.f32 %v1869_v45  ;;  %v3856_v21 = vor.u32 %v4332_v12, %v3855_v49  ;;  %v3849_v43 = vld [vmem:[%s6791_s2 + $0xb8] sm:$0xf0]  ;;  %v4314_v49 = vld [vmem:[%s6791_s2 + $0x44] sm:$0xf] }
 0x4c6   :  { %v3852_v45 = vor.u32 %v4327_v6, %v3849_v43  ;;  %2174 = vmatpush.bf16.msra.mxu0 %v3828_v5  ;;  %v3785_v5 = vld [vmem:[%s6791_s2 + $0x38] sm:$0xf0]  ;;  %v4307_v43 = vld [vmem:[%s6791_s2 + $0xc] sm:$0xf] }
 0x4c7   :  { %v1880_v2 = vadd.f32 0.5, %v1877_v1  ;;  %v1825_v29 = vpop.f32.mrf.mxu3  ;;  %v1864_v31 = vpop.f32.mrf.mxu0  ;;  %2159 = vmatpush.bf16.msra.mxu2 %v3856_v21  ;;  %v3807_v1 = vld [vmem:[%s6791_s2 + $0x60] sm:$0xf]  ;;  %v3796_v21 = vor.u32 %v4314_v49, %v3793_v41  ;;  %v3788_v6 = vor.u32 %v4311_v3, %v3785_v5  ;;  %v4313_v49 = vld [vmem:[%s6791_s2 + $0x34] sm:$0xf0] }
 0x4c8   :  { %2199 = vmatpush.bf16.msrb.mxu3 %v3852_v45  ;;  %v3809_v31 = vld [vmem:[%s6791_s2 + $0x70] sm:$0xf0]  ;;  %v3769_v45 = vld [vmem:[%s6791_s2 + $0x18] sm:$0xf0]  ;;  %v3767_v41 = vld [vmem:[%s6791_s2 + $0x8] sm:$0xf] }
 0x4c9   :  { %v1886_v47 = vmul.f32 %v1884_v15, %v1880_v2  ;;  %v4320_v2 = vld [vmem:[%s6791_s2 + $0x6c] sm:$0xf0]  ;;  %v4318_v15 = vld [vmem:[%s6791_s2 + $0x64] sm:$0xf]  ;;  %v1964_v5 = vld [vmem:[#allocation2 + $0x38] sm:$0xc] }
 0x4ca   :  { %v4451_v13 = vpop.eup %4450  ;;  %v3808_v29 = vor.u32 %v4320_v2, %v3807_v1  ;;  %v3772_v1 = vor.u32 %v4307_v43, %v3769_v45 }
 0x4cb   :  { %v1876_v34 = vmul.f32 0.5, %v4451_v13  ;;  %v4453_v16 = vpop.eup %4452  ;;  %2160 = vmatpush.bf16.msra.mxu2 %v3840_v33  ;;  %v4323_v13 = vld [vmem:[%s6791_s2 + $0x8c] sm:$0xf]  ;;  %v3780_v33 = vor.u32 %v4310_v56, %v3777_v32 }
 0x4cd   :  { %v1879_v14 = vadd.f32 0.5, %v1876_v34  ;;  %v3833_v34 = vld [vmem:[%s6791_s2 + $0x98] sm:$0xf0] }
 0x4cf   :  { %v1887_v19 = vmul.f32 %v4453_v16, %v1879_v14  ;;  %2161 = vmatpush.bf16.msra.mxu2 %v3824_v63  ;;  %v3836_v14 = vor.u32 %v4323_v13, %v3833_v34  ;;  %v3791_v16 = vld [vmem:[%s6791_s2 + $0x40] sm:$0xf]  ;;  %v3764_v63 = vor.u32 %v4306_v40, %v3761_v61  ;;  %v4329_v13 = vld [vmem:[%s6791_s2 + $0xb4] sm:$0xf0] }
 0x4d1   :  { %v5977_v48 = vadd.f32 %v1887_v19, %v1886_v47  ;;  %v3812_v47 = vor.u32 %v4318_v15, %v3809_v31  ;;  %v4316_v19 = vld [vmem:[%s6791_s2 + $0x4c] sm:$0xf0]  ;;  %2200 = vmatpush.bf16.msrb.mxu3 %v3836_v14  ;;  %v6118_v15 = vld [vmem:[%s6793_s4 + $0xc1] ss:$0 sm:$0xff] }
 0x4d2   :  { %v3792_v12 = vor.u32 %v4316_v19, %v3791_v16  ;;  %v4325_v16 = vld [vmem:[%s6791_s2 + $0x94] sm:$0xf0] }
 0x4d3   :  { %2162 = vmatpush.bf16.msra.mxu2 %v3808_v29  ;;  %2175 = vmatpush.bf16.msra.mxu0 %v3812_v47 }
 0x4d5   :  { %2201 = vmatpush.bf16.msrb.mxu3 %v3820_v24 }
 0x4d7   :  { %2163 = vmatpush.bf16.msra.mxu2 %v3792_v12  ;;  %2176 = vmatpush.bf16.msra.mxu0 %v3796_v21  ;;  %v4309_v21 = vld [vmem:[%s6791_s2 + $0x14] sm:$0xf0] }
 0x4d8   :  { %v3768_v22 = vor.u32 %v4309_v21, %v3767_v41  ;;  %v3954_v41 = vld [vmem:[%s6791_s2 + $0x90] sm:$0xf0] }
 0x4d9   :  { %2202 = vmatpush.bf16.msrb.mxu3 %v3804_v60  ;;  %v1961_v60 = vld [vmem:[#allocation2 + $0x8] sm:$0xc] }
 0x4db   :  { %2164 = vmatpush.bf16.msra.mxu2 %v3776_v4  ;;  %2177 = vmatpush.bf16.msra.mxu0 %v3780_v33 }
 0x4dd   :  { %2203 = vmatpush.bf16.msrb.mxu3 %v3788_v6 }
 0x4df   :  { %2165 = vmatpush.bf16.msra.mxu2 %v3760_v59  ;;  %2178 = vmatpush.bf16.msra.mxu0 %v3764_v63 }
 0x4e1   :  { %2204 = vmatpush.bf16.msrb.mxu3 %v3772_v1  ;;  %v2240_v1 = vrot.slane %v5977_v48, 6 }
 0x4e3   :  { %2266 = vmatpush.msrb.mxu2 %v5592_v18  ;;  %2306 = vmatpush.msrb.mxu0 %v5842_v51  ;;  %v3879_v18 = vld [vmem:[%s6791_s2 + $0xe8] sm:$0xf] }
 0x4e4   :  { %v3863_v51 = vld [vmem:[%s6791_s2 + $0xc8] sm:$0xf] }
 0x4e5   :  { %2267 = vmatpush.msrb.mxu2 %v5597_v23  ;;  %2307 = vmatpush.msrb.mxu0 %v5847_v44  ;;  %v4337_v23 = vld [vmem:[%s6791_s2 + $0xf4] sm:$0xf0] }
 0x4e6   :  { %v3880_v31 = vor.u32 %v4337_v23, %v3879_v18 }
 0x4e7   :  { %2268 = vmatpush.msrb.mxu2 %v5603_v46  ;;  %2308 = vmatpush.msrb.mxu0 %v5854_v52  ;;  %v4333_v46 = vld [vmem:[%s6791_s2 + $0xd4] sm:$0xf0]  ;;  %v3847_v52 = vld [vmem:[%s6791_s2 + $0xa8] sm:$0xf] }
 0x4e8   :  { %2184 = vmatpush.bf16.msrb.mxu1 %v3880_v31  ;;  %v3864_v47 = vor.u32 %v4333_v46, %v3863_v51  ;;  %v3848_v14 = vor.u32 %v4329_v13, %v3847_v52  ;;  %v4368_v52 = vld [vmem:[%s6791_s2 + $0xec] sm:$0xf0] }
 0x4e9   :  { %2269 = vmatpush.msrb.mxu2 %v5610_v9  ;;  %2309 = vmatpush.msrb.mxu0 %v5862_v55  ;;  %v1616_v9 = vld [vmem:[#allocation2 + $0x28] sm:$0x3] }
 0x4eb   :  { %2270 = vmatpush.msrb.mxu2 %v5616_v10  ;;  %2310 = vmatpush.msrb.mxu0 %v5870_v0  ;;  %v3831_v10 = vld [vmem:[%s6791_s2 + $0x88] sm:$0xf] }
 0x4ec   :  { %2185 = vmatpush.bf16.msrb.mxu1 %v3864_v47  ;;  %v3832_v0 = vor.u32 %v4325_v16, %v3831_v10  ;;  %v4000_v47 = vld [vmem:[%s6791_s2 + $0xe0] sm:$0xf]  ;;  %v4362_v10 = vld [vmem:[%s6791_s2 + $0xc4] sm:$0xf] }
 0x4ed   :  { %2271 = vmatpush.msrb.mxu2 %v5623_v17  ;;  %2311 = vmatpush.msrb.mxu0 %v5878_v27  ;;  %v4001_v13 = vor.u32 %v4368_v52, %v4000_v47  ;;  %v4340_v47 = vld [vmem:[%s6791_s2 + $0xc] sm:$0xf0]  ;;  %v4338_v52 = vld [vmem:[%s6791_s2 + $0x4] sm:$0xf] }
 0x4ef   :  { %2272 = vmatpush.msrb.mxu2 %v5629_v20  ;;  %2312 = vmatpush.msrb.mxu0 %v5892_v37 }
 0x4f0   :  { %2186 = vmatpush.bf16.msrb.mxu1 %v3848_v14  ;;  %v4364_v14 = vld [vmem:[%s6791_s2 + $0xcc] sm:$0xf0] }
 0x4f1   :  { %2273 = vmatpush.msrb.mxu2 %v5635_v25  ;;  %2313 = vmatpush.msrb.mxu0 %v5900_v38 }
 0x4f3   :  { %2274 = vmatpush.msrb.mxu2 %v5641_v26 }
 0x4f4   :  { %2187 = vmatpush.bf16.msrb.mxu1 %v3832_v0  ;;  %v4367_v0 = vld [vmem:[%s6791_s2 + $0xec] sm:$0xf] }
 0x4f5   :  { %2275 = vmatpush.msrb.mxu2 %v5647_v54  ;;  %v3815_v54 = vld [vmem:[%s6791_s2 + $0x68] sm:$0xf] }
 0x4f7   :  { %2276 = vmatpush.msrb.mxu2 %v5653_v11  ;;  %v4321_v11 = vld [vmem:[%s6791_s2 + $0x74] sm:$0xf0] }
 0x4f9   :  { %2277 = vmatpush.msrb.mxu2 %v5659_v28  ;;  %v3816_v28 = vor.u32 %v4321_v11, %v3815_v54  ;;  %v3970_v54 = vld [vmem:[%s6791_s2 + $0xb0] sm:$0xf0] }
 0x4fb   :  { %2278 = vmatpush.msrb.mxu2 %v5678_v58  ;;  %2188 = vmatpush.bf16.msrb.mxu1 %v3816_v28  ;;  %v3799_v58 = vld [vmem:[%s6791_s2 + $0x48] sm:$0xf]  ;;  %v4363_v28 = vld [vmem:[%s6791_s2 + $0xcc] sm:$0xf] }
 0x4fd   :  { %2279 = vmatpush.msrb.mxu2 %v5687_v8  ;;  %v4317_v8 = vld [vmem:[%s6791_s2 + $0x54] sm:$0xf0] }
 0x4ff   :  { %2280 = vmatpush.msrb.mxu2 %v5693_v62  ;;  %v3800_v62 = vor.u32 %v4317_v8, %v3799_v58  ;;  %v3994_v58 = vld [vmem:[%s6791_s2 + $0xd8] sm:$0xf0] }
 0x500   :  { %v3997_v8 = vor.u32 %v4363_v28, %v3994_v58  ;;  %v1963_v58 = vld [vmem:[#allocation2 + $0x28] sm:$0xc] }
 0x501   :  { %2281 = vmatpush.msrb.mxu2 %v5710_v7  ;;  %2189 = vmatpush.bf16.msrb.mxu1 %v3800_v62  ;;  %v3783_v7 = vld [vmem:[%s6791_s2 + $0x28] sm:$0xf]  ;;  %v3952_v62 = vld [vmem:[%s6791_s2 + $0x80] sm:$0xf] }
 0x502   :  { %v3784_v12 = vor.u32 %v4313_v49, %v3783_v7  ;;  %v4356_v7 = vld [vmem:[%s6791_s2 + $0x8c] sm:$0xf0]  ;;  %v4354_v49 = vld [vmem:[%s6791_s2 + $0x84] sm:$0xf] }
 0x503   :  { %v3957_v21 = vor.u32 %v4354_v49, %v3954_v41  ;;  %v3960_v41 = vld [vmem:[%s6791_s2 + $0x88] sm:$0xf] }
 0x505   :  { %2190 = vmatpush.bf16.msrb.mxu1 %v3784_v12  ;;  %v3953_v12 = vor.u32 %v4356_v7, %v3952_v62  ;;  %v4361_v62 = vld [vmem:[%s6791_s2 + $0xb4] sm:$0xf0] }
 0x509   :  { %2191 = vmatpush.bf16.msrb.mxu1 %v3768_v22  ;;  %v4359_v22 = vld [vmem:[%s6791_s2 + $0xac] sm:$0xf] }
 0x53f   :  { %v1609_v2 = vpop.f32.mrf.mxu2 }
 0x540   :  { %v1610_v29 = vadd.f32 %v6118_v15, %v1609_v2 }
 0x542   :  { %v1612_v44 = vmax.f32 %v1610_v29, 0.0 }
 0x544   :  { %1613 = vst.msk [vmem:[#allocation3 + $0x6] sm:$0x3] %vm529_vm3, %v1612_v44 }
 0x547   :  { %v1849_v55 = vpop.f32.mrf.mxu2 }
 0x548   :  { %v1868_v34 = vadd.f32 %v1849_v55, %v1616_v9  ;;  %v4002_v9 = vld [vmem:[%s6791_s2 + $0xf0] sm:$0xf0] }
 0x54a   :  { %v1872_v17 = vmul.f32 0.5, %v1868_v34  ;;  %v3984_v34 = vld [vmem:[%s6791_s2 + $0xc0] sm:$0xf] }
 0x54b   :  { %v3985_v16 = vor.u32 %v4364_v14, %v3984_v34  ;;  %v3914_v34 = vld [vmem:[%s6791_s2 + $0x38] sm:$0xf0] }
 0x54c   :  { %4454 = vtanh.f32 %v1872_v17  ;;  %v3986_v17 = vld [vmem:[%s6791_s2 + $0xd0] sm:$0xf0] }
 0x54d   :  { %4456 = vtanh.f32 %v5977_v48  ;;  %v4366_v48 = vld [vmem:[%s6791_s2 + $0xe4] sm:$0xf] }
 0x54e   :  { %v4005_v55 = vor.u32 %v4366_v48, %v4002_v9 }
 0x54f   :  { %v1851_v20 = vpop.f32.mrf.mxu2 }
 0x550   :  { %v4010_v20 = vld [vmem:[%s6791_s2 + $0xf8] sm:$0xf0] }
 0x552   :  { %v4455_v27 = vpop.eup %4454 }
 0x553   :  { %v1878_v37 = vmul.f32 0.5, %v4455_v27  ;;  %v4457_v38 = vpop.eup %4456  ;;  %v3989_v27 = vor.u32 %v4362_v10, %v3986_v17  ;;  %v3898_v17 = vld [vmem:[%s6791_s2 + $0x18] sm:$0xf0] }
 0x555   :  { %v1881_v25 = vadd.f32 0.5, %v1878_v37  ;;  %v4013_v37 = vor.u32 %v4367_v0, %v4010_v20 }
 0x557   :  { %v1890_v19 = vmul.f32 %v4457_v38, %v1881_v25  ;;  %v3968_v25 = vld [vmem:[%s6791_s2 + $0xa0] sm:$0xf]  ;;  %v4360_v38 = vld [vmem:[%s6791_s2 + $0xac] sm:$0xf0] }
 0x559   :  { %1923 = vmatmul.f32.vlgmr.msra.gmra.mxu3 %v1890_v19  ;;  %v1965_v26 = vpack.c.bf16 %v1890_v19, %v1890_v19  ;;  %v4358_v19 = vld [vmem:[%s6791_s2 + $0xa4] sm:$0xf] }
 0x55a   :  { %2533 = vmatpush.bf16.msra.mxu3 %v4005_v55  ;;  %v3973_v11 = vor.u32 %v4358_v19, %v3970_v54  ;;  %v4343_v55 = vld [vmem:[%s6791_s2 + $0x2c] sm:$0xf] }
 0x55b   :  { %2166 = vmatmul.bf16.vlgmr.msra.gmra.mxu2 %v1965_v26  ;;  %2179 = vmatmul.bf16.vlgmr.msra.gmra.mxu0 %v1965_v26  ;;  %v3917_v14 = vor.u32 %v4343_v55, %v3914_v34  ;;  %v6435_v55 = vld [vmem:[%s6793_s4 + $0x48] sm:$0xff] }
 0x55c   :  { %2559 = vmatpush.bf16.msra.mxu2 %v4013_v37  ;;  %v4008_v37 = vld [vmem:[%s6791_s2 + $0xe8] sm:$0xf] }
 0x55e   :  { %2534 = vmatpush.bf16.msra.mxu3 %v3989_v27 }
 0x560   :  { %2560 = vmatpush.bf16.msra.mxu2 %v3997_v8  ;;  %v3976_v8 = vld [vmem:[%s6791_s2 + $0xa8] sm:$0xf] }
 0x561   :  { %2205 = vmatmul.bf16.vlgmr.msrb.gmra.mxu3 %v1965_v26 }
 0x562   :  { %2535 = vmatpush.bf16.msra.mxu3 %v3973_v11 }
 0x566   :  { %2536 = vmatpush.bf16.msra.mxu3 %v3957_v21  ;;  %v4357_v21 = vld [vmem:[%s6791_s2 + $0x94] sm:$0xf0] }
 0x5d8   :  { %v2180_v50 = vpop.f32.mrf.mxu0 }
 0x5d9   :  { %v2215_v24 = vrot.slane %v2180_v50, 6  ;;  %v3978_v50 = vld [vmem:[%s6791_s2 + $0xb8] sm:$0xf0] }
 0x5db   :  { %v2223_v53 = vadd.f32 %v2215_v24, %v1962_v35  ;;  %v3981_v24 = vor.u32 %v4359_v22, %v3978_v50  ;;  %v3936_v35 = vld [vmem:[%s6791_s2 + $0x60] sm:$0xf]  ;;  %v3961_v50 = vor.u32 %v4357_v21, %v3960_v41 }
 0x5dc   :  { %v1924_v56 = vpop.f32.mrf.mxu3 }
 0x5dd   :  { %v2227_v4 = vmul.f32 0.5, %v2223_v53  ;;  %v1925_v32 = vadd.f32 %v5972_v30, %v1924_v56  ;;  %v4352_v53 = vld [vmem:[%s6791_s2 + $0x6c] sm:$0xf0]  ;;  %v4350_v56 = vld [vmem:[%s6791_s2 + $0x64] sm:$0xf]  ;;  %2561 = vmatpush.bf16.msra.mxu2 %v3981_v24 }
 0x5de   :  { %v2167_v33 = vpop.f32.mrf.mxu2 }
 0x5df   :  { %4458 = vtanh.f32 %v2227_v4  ;;  %v1927_v39 = vmax.f32 %v1925_v32, 0.0  ;;  %v2214_v36 = vrot.slane %v2167_v33, 6  ;;  %v3937_v4 = vor.u32 %v4352_v53, %v3936_v35  ;;  %v3938_v32 = vld [vmem:[%s6791_s2 + $0x70] sm:$0xf0] }
 0x5e0   :  { %v2182_v42 = vpop.f32.mrf.mxu0  ;;  %v3941_v33 = vor.u32 %v4350_v56, %v3938_v32 }
 0x5e1   :  { %v2222_v57 = vadd.f32 %v2214_v36, %v1961_v60  ;;  %3756 = vmatmul.msk.f32.vlgmr.msra.gmra.mxu1 %vm504_vm2, %v1927_v39  ;;  %v4355_v39 = vld [vmem:[%s6791_s2 + $0x8c] sm:$0xf]  ;;  %v3962_v36 = vld [vmem:[%s6791_s2 + $0x98] sm:$0xf0]  ;;  %v3920_v42 = vld [vmem:[%s6791_s2 + $0x40] sm:$0xf] }
 0x5e2   :  { %2520 = vmatpush.bf16.msra.mxu1 %v4001_v13  ;;  %v3965_v60 = vor.u32 %v4355_v39, %v3962_v36  ;;  %2537 = vmatpush.bf16.msra.mxu3 %v3941_v33  ;;  %v3890_v13 = vld [vmem:[%s6791_s2 + $0x10] sm:$0xf0]  ;;  %v3944_v36 = vld [vmem:[%s6791_s2 + $0x68] sm:$0xf] }
 0x5e3   :  { %v2226_v40 = vmul.f32 0.5, %v2222_v57  ;;  %v4348_v57 = vld [vmem:[%s6791_s2 + $0x4c] sm:$0xf0]  ;;  %v3893_v9 = vor.u32 %v4338_v52, %v3890_v13 }
 0x5e4   :  { %v2206_v59 = vpop.f32.mrf.mxu3  ;;  %2562 = vmatpush.bf16.msra.mxu2 %v3965_v60  ;;  %v4353_v60 = vld [vmem:[%s6791_s2 + $0x74] sm:$0xf0]  ;;  %v6428_v52 = vld [vmem:[%s6793_s4 + $0x50] sm:$0xff] }
 0x5e5   :  { %v4459_v61 = vpop.eup %4458  ;;  %4460 = vtanh.f32 %v2226_v40  ;;  %v2217_v63 = vrot.slane %v2206_v59, 6  ;;  %v4346_v40 = vld [vmem:[%s6791_s2 + $0x44] sm:$0xf]  ;;  %v3921_v59 = vor.u32 %v4348_v57, %v3920_v42  ;;  %v3945_v42 = vor.u32 %v4353_v60, %v3944_v36  ;;  %v3928_v57 = vld [vmem:[%s6791_s2 + $0x48] sm:$0xf] }
 0x5e6   :  { %v2233_v3 = vmul.f32 0.5, %v4459_v61  ;;  %v2169_v6 = vpop.f32.mrf.mxu2  ;;  %2521 = vmatpush.bf16.msra.mxu1 %v3985_v16  ;;  %v3922_v61 = vld [vmem:[%s6791_s2 + $0x50] sm:$0xf0]  ;;  %v4339_v16 = vld [vmem:[%s6791_s2 + $0xc] sm:$0xf] }
 0x5e7   :  { %v2225_v43 = vadd.f32 %v2217_v63, %v1964_v5  ;;  %v3925_v63 = vor.u32 %v4346_v40, %v3922_v61  ;;  %v3946_v5 = vld [vmem:[%s6791_s2 + $0x78] sm:$0xf0]  ;;  %v3901_v20 = vor.u32 %v4339_v16, %v3898_v17  ;;  %v4349_v40 = vld [vmem:[%s6791_s2 + $0x54] sm:$0xf0]  ;;  %v3912_v61 = vld [vmem:[%s6791_s2 + $0x28] sm:$0xf] }
 0x5e8   :  { %v2236_v45 = vadd.f32 0.5, %v2233_v3  ;;  %v4351_v3 = vld [vmem:[%s6791_s2 + $0x6c] sm:$0xf]  ;;  %v6441_v17 = vld [vmem:[%s6793_s4 + $0x40] sm:$0xff] }
 0x5e9   :  { %4462 = vtanh.f32 %v2225_v43  ;;  %2192 = vmatmul.bf16.vlgmr.msrb.gmra.mxu1 %v1965_v26  ;;  %v3969_v26 = vor.u32 %v4360_v38, %v3968_v25  ;;  %v3949_v6 = vor.u32 %v4351_v3, %v3946_v5  ;;  %2538 = vmatpush.bf16.msra.mxu3 %v3925_v63  ;;  %v3904_v43 = vld [vmem:[%s6791_s2 + $0x20] sm:$0xf]  ;;  %v4369_v25 = vld [vmem:[%s6791_s2 + $0xf4] sm:$0xf0]  ;;  %v3992_v38 = vld [vmem:[%s6791_s2 + $0xc8] sm:$0xf] }
 0x5ea   :  { %v2242_v2 = vmul.f32 %v2240_v1, %v2236_v45  ;;  %v4344_v45 = vld [vmem:[%s6791_s2 + $0x2c] sm:$0xf0]  ;;  %v4342_v1 = vld [vmem:[%s6791_s2 + $0x24] sm:$0xf]  ;;  %v4009_v19 = vor.u32 %v4369_v25, %v4008_v37  ;;  %v4345_v63 = vld [vmem:[%s6791_s2 + $0x34] sm:$0xf0] }
 0x5eb   :  { %v4461_v29 = vpop.eup %4460  ;;  %2522 = vmatpush.bf16.msra.mxu1 %v3969_v26  ;;  %2563 = vmatpush.bf16.msra.mxu2 %v3949_v6  ;;  %v4365_v26 = vld [vmem:[%s6791_s2 + $0xd4] sm:$0xf0]  ;;  %v3913_v3 = vor.u32 %v4345_v63, %v3912_v61  ;;  %v3896_v5 = vld [vmem:[%s6791_s2 + $0x8] sm:$0xf]  ;;  %v6454_v37 = vld [vmem:[%s6793_s4 + $0x30] sm:$0xff] }
 0x5ec   :  { %v2232_v18 = vmul.f32 0.5, %v4461_v29  ;;  %v2208_v23 = vpop.f32.mrf.mxu3  ;;  %v3906_v29 = vld [vmem:[%s6791_s2 + $0x30] sm:$0xf0]  ;;  %2546 = vmatpush.bf16.msra.mxu0 %v4009_v19  ;;  %v3993_v28 = vor.u32 %v4365_v26, %v3992_v38  ;;  %v4341_v6 = vld [vmem:[%s6791_s2 + $0x14] sm:$0xf0]  ;;  %v6460_v26 = vld [vmem:[%s6793_s4 + $0x28] sm:$0xff] }
 0x5ed   :  { %v3930_v23 = vld [vmem:[%s6791_s2 + $0x58] sm:$0xf0]  ;;  %v6501_v36 = vld [vmem:[%s6793_s4 + $0x8] sm:$0xff]  ;;  %v4113_v60 = vld [vmem:[%s6791_s2 + $0xc0] sm:$0xf] }
 0x5ee   :  { %v2235_v51 = vadd.f32 0.5, %v2232_v18  ;;  %v4347_v18 = vld [vmem:[%s6791_s2 + $0x4c] sm:$0xf]  ;;  %v2323_v38 = vld [vmem:[#allocation2 + $0x38] sm:$0x30]  ;;  %v6518_v61 = vld [vmem:[%s6793_s4] sm:$0xff] }
 0x5ef   :  { %v4463_v44 = vpop.eup %4462  ;;  %2523 = vmatpush.bf16.msra.mxu1 %v3953_v12  ;;  %v3977_v12 = vor.u32 %v4361_v62, %v3976_v8 }
 0x5f0   :  { %v2243_v31 = vmul.f32 %v4463_v44, %v2235_v51  ;;  %v3909_v51 = vor.u32 %v4342_v1, %v3906_v29  ;;  %v3933_v44 = vor.u32 %v4347_v18, %v3930_v23  ;;  %2547 = vmatpush.bf16.msra.mxu0 %v3993_v28  ;;  %v6404_v1 = vld [vmem:[%s6793_s4 + $0x70] sm:$0xff]  ;;  %v6416_v18 = vld [vmem:[%s6793_s4 + $0x60] sm:$0xff] }
 0x5f1   :  { %v6466_v28 = vld [vmem:[%s6793_s4 + $0x20] sm:$0xff] }
 0x5f2   :  { %v6194_v46 = vadd.f32 %v2243_v31, %v2242_v2  ;;  %v3905_v2 = vor.u32 %v4344_v45, %v3904_v43  ;;  %v3888_v31 = vld [vmem:[%s6791_s2] sm:$0xf]  ;;  %2539 = vmatpush.bf16.msra.mxu3 %v3909_v51  ;;  %2564 = vmatpush.bf16.msra.mxu2 %v3933_v44  ;;  %v3897_v43 = vor.u32 %v4341_v6, %v3896_v5  ;;  %v6399_v45 = vld [vmem:[%s6793_s4 + $0x78] sm:$0xff]  ;;  %v2320_v51 = vld [vmem:[#allocation2 + $0x8] sm:$0x30] }
 0x5f3   :  { %2524 = vmatpush.bf16.msra.mxu1 %v3937_v4  ;;  %v3889_v48 = vor.u32 %v4340_v47, %v3888_v31  ;;  %v6422_v44 = vld [vmem:[%s6793_s4 + $0x58] sm:$0xff] }
 0x5f4   :  { %2548 = vmatpush.bf16.msra.mxu0 %v3977_v12  ;;  %v2602_v41 = vrot.slane %v6194_v46, 6  ;;  %v4139_v5 = vld [vmem:[%s6791_s2 + $0xf8] sm:$0xf0] }
 0x5f6   :  { %2540 = vmatpush.bf16.msra.mxu3 %v3893_v9  ;;  %2565 = vmatpush.bf16.msra.mxu2 %v3917_v14 }
 0x5f7   :  { %2525 = vmatpush.bf16.msra.mxu1 %v3921_v59  ;;  %v3929_v59 = vor.u32 %v4349_v40, %v3928_v57  ;;  %v4394_v40 = vld [vmem:[%s6791_s2 + $0xc4] sm:$0xf] }
 0x5f8   :  { %2549 = vmatpush.bf16.msra.mxu0 %v3961_v50 }
 0x5fa   :  { %2566 = vmatpush.bf16.msra.mxu2 %v3901_v20 }
 0x5fb   :  { %2526 = vmatpush.bf16.msra.mxu1 %v3905_v2  ;;  %v6410_v2 = vld [vmem:[%s6793_s4 + $0x68] sm:$0xff] }
 0x5fc   :  { %2550 = vmatpush.bf16.msra.mxu0 %v3945_v42  ;;  %v4396_v42 = vld [vmem:[%s6791_s2 + $0xcc] sm:$0xf0] }
 0x5fd   :  { %v4114_v57 = vor.u32 %v4396_v42, %v4113_v60  ;;  %v4376_v60 = vld [vmem:[%s6791_s2 + $0x2c] sm:$0xf0]  ;;  %v4374_v42 = vld [vmem:[%s6791_s2 + $0x24] sm:$0xf] }
 0x5ff   :  { %2527 = vmatpush.bf16.msra.mxu1 %v3889_v48 }
 0x600   :  { %2551 = vmatpush.bf16.msra.mxu0 %v3929_v59  ;;  %v4115_v59 = vld [vmem:[%s6791_s2 + $0xd0] sm:$0xf0] }
 0x601   :  { %v4118_v63 = vor.u32 %v4394_v40, %v4115_v59  ;;  %v4035_v40 = vld [vmem:[%s6791_s2 + $0x30] sm:$0xf0]  ;;  %v4379_v59 = vld [vmem:[%s6791_s2 + $0x4c] sm:$0xf] }
 0x603   :  { %2628 = vmatpush.msrb.mxu1 %v6399_v45 }
 0x604   :  { %2552 = vmatpush.bf16.msra.mxu0 %v3913_v3  ;;  %v4399_v3 = vld [vmem:[%s6791_s2 + $0xec] sm:$0xf] }
 0x605   :  { %2629 = vmatpush.msrb.mxu1 %v6404_v1  ;;  %v4142_v6 = vor.u32 %v4399_v3, %v4139_v5  ;;  %v4038_v3 = vor.u32 %v4374_v42, %v4035_v40  ;;  %v4377_v42 = vld [vmem:[%s6791_s2 + $0x34] sm:$0xf0]  ;;  %v4025_v40 = vld [vmem:[%s6791_s2 + $0x8] sm:$0xf] }
 0x607   :  { %2630 = vmatpush.msrb.mxu1 %v6410_v2 }
 0x608   :  { %2553 = vmatpush.bf16.msra.mxu0 %v3897_v43  ;;  %v4097_v43 = vld [vmem:[%s6791_s2 + $0xa0] sm:$0xf] }
 0x609   :  { %2631 = vmatpush.msrb.mxu1 %v6416_v18 }
 0x60b   :  { %2632 = vmatpush.msrb.mxu1 %v6422_v44 }
 0x60d   :  { %2633 = vmatpush.msrb.mxu1 %v6428_v52 }
 0x60f   :  { %2634 = vmatpush.msrb.mxu1 %v6435_v55 }
 0x611   :  { %2635 = vmatpush.msrb.mxu1 %v6441_v17 }
 0x65e   :  { %v1956_v10 = vpop.f32.mrf.mxu1 }
 0x65f   :  { %v1957_v0 = vadd.f32 %v6118_v15, %v1956_v10  ;;  %v2321_v10 = vld [vmem:[#allocation2 + $0x20] sm:$0x30] }
 0x661   :  { %v1959_v27 = vmax.f32 %v1957_v0, 0.0  ;;  %v6448_v0 = vld [vmem:[%s6793_s4 + $0x38] sm:$0xff] }
 0x662   :  { %2636 = vmatpush.msrb.mxu1 %v6448_v0 }
 0x663   :  { %1960 = vst.msk [vmem:[#allocation3 + $0x8] sm:$0x3] %vm529_vm3, %v1959_v27 }
 0x664   :  { %2637 = vmatpush.msrb.mxu1 %v6454_v37 }
 0x666   :  { %v2193_v54 = vpop.f32.mrf.mxu1  ;;  %2638 = vmatpush.msrb.mxu1 %v6460_v26 }
 0x667   :  { %v2216_v11 = vrot.slane %v2193_v54, 6 }
 0x668   :  { %2639 = vmatpush.msrb.mxu1 %v6466_v28 }
 0x669   :  { %v2224_v7 = vadd.f32 %v2216_v11, %v1963_v58 }
 0x66b   :  { %v2228_v49 = vmul.f32 0.5, %v2224_v7 }
 0x66d   :  { %4464 = vtanh.f32 %v2228_v49 }
 0x66e   :  { %v2195_v22 = vpop.f32.mrf.mxu1  ;;  %4466 = vtanh.f32 %v6194_v46  ;;  %v6486_v46 = vld [vmem:[%s6793_s4 + $0x18] sm:$0xff] }
 0x66f   :  { %2640 = vmatpush.msrb.mxu1 %v6486_v46 }
 0x673   :  { %v4465_v24 = vpop.eup %4464 }
 0x674   :  { %v2234_v35 = vmul.f32 0.5, %v4465_v24  ;;  %v4467_v56 = vpop.eup %4466 }
 0x676   :  { %v2237_v53 = vadd.f32 0.5, %v2234_v35  ;;  %v4129_v35 = vld [vmem:[%s6791_s2 + $0xe0] sm:$0xf] }
 0x678   :  { %v2246_v4 = vmul.f32 %v4467_v56, %v2237_v53  ;;  %v4400_v53 = vld [vmem:[%s6791_s2 + $0xec] sm:$0xf0]  ;;  %v4398_v56 = vld [vmem:[%s6791_s2 + $0xe4] sm:$0xf] }
 0x67a   :  { %v2264_v32 = vrot.slane %v2246_v4, 2  ;;  %v2324_v33 = vpack.c.bf16 %v2246_v4, %v2246_v4  ;;  %v4130_v4 = vor.u32 %v4400_v53, %v4129_v35  ;;  %v4051_v35 = vld [vmem:[%s6791_s2 + $0x50] sm:$0xf0] }
 0x67c   :  { %2282 = vmatmul.f32.vlgmr.msrb.gmra.mxu2 %v2264_v32  ;;  %v6367_v39 = vrot.slane %v2324_v33, 1  ;;  %v4131_v32 = vld [vmem:[%s6791_s2 + $0xf0] sm:$0xf0] }
 0x67d   :  { %v4134_v33 = vor.u32 %v4398_v56, %v4131_v32  ;;  %v4383_v56 = vld [vmem:[%s6791_s2 + $0x6c] sm:$0xf] }
 0x67e   :  { %2528 = vmatmul.bf16.vlgmr.msra.gmra.mxu1 %v6367_v39  ;;  %2541 = vmatmul.bf16.vlgmr.msra.gmra.mxu3 %v6367_v39 }
 0x67f   :  { %2895 = vmatpush.bf16.msrb.mxu2 %v4134_v33  ;;  %v4033_v33 = vld [vmem:[%s6791_s2 + $0x20] sm:$0xf] }
 0x683   :  { %2896 = vmatpush.bf16.msrb.mxu2 %v4118_v63  ;;  %v4059_v63 = vld [vmem:[%s6791_s2 + $0x58] sm:$0xf0] }
 0x684   :  { %2567 = vmatmul.bf16.vlgmr.msra.gmra.mxu2 %v6367_v39  ;;  %v4062_v5 = vor.u32 %v4379_v59, %v4059_v63  ;;  %v4373_v59 = vld [vmem:[%s6791_s2 + $0x14] sm:$0xf0] }
 0x685   :  { %v4026_v63 = vor.u32 %v4373_v59, %v4025_v40 }
 0x6fb   :  { %v2529_v29 = vpop.f32.mrf.mxu1 }
 0x6fc   :  { %v2576_v23 = vrot.slane %v2529_v29, 4  ;;  %v4392_v29 = vld [vmem:[%s6791_s2 + $0xac] sm:$0xf0] }
 0x6fe   :  { %v2584_v31 = vadd.f32 %v2576_v23, %v2320_v51  ;;  %v4390_v23 = vld [vmem:[%s6791_s2 + $0xa4] sm:$0xf]  ;;  %v4098_v51 = vor.u32 %v4392_v29, %v4097_v43  ;;  %v4372_v43 = vld [vmem:[%s6791_s2 + $0xc] sm:$0xf0] }
 0x6ff   :  { %v2283_v47 = vpop.f32.mrf.mxu2  ;;  %v4370_v29 = vld [vmem:[%s6791_s2 + $0x4] sm:$0xf] }
 0x700   :  { %v2588_v48 = vmul.f32 0.5, %v2584_v31  ;;  %v2284_v13 = vadd.f32 %v5972_v30, %v2283_v47  ;;  %v4099_v31 = vld [vmem:[%s6791_s2 + $0xb0] sm:$0xf0] }
 0x701   :  { %v2542_v9 = vpop.f32.mrf.mxu3  ;;  %v4102_v47 = vor.u32 %v4390_v23, %v4099_v31 }
 0x702   :  { %v2286_v34 = vmax.f32 %v2284_v13, 0.0  ;;  %v2577_v14 = vrot.slane %v2542_v9, 4  ;;  %4468 = vtanh.f32 %v2588_v48  ;;  %v4395_v48 = vld [vmem:[%s6791_s2 + $0xcc] sm:$0xf]  ;;  %v4123_v13 = vld [vmem:[%s6791_s2 + $0xd8] sm:$0xf0] }
 0x703   :  { %v2531_v16 = vpop.f32.mrf.mxu1  ;;  %v4126_v9 = vor.u32 %v4395_v48, %v4123_v13  ;;  %2897 = vmatpush.bf16.msrb.mxu2 %v4102_v47  ;;  %v4375_v47 = vld [vmem:[%s6791_s2 + $0x2c] sm:$0xf]  ;;  %v4043_v48 = vld [vmem:[%s6791_s2 + $0x38] sm:$0xf0] }
 0x704   :  { %v2585_v30 = vadd.f32 %v2577_v14, %v2321_v10  ;;  %3885 = vmatmul.msk.f32.vlgmr.msrb.gmra.mxu0 %vm504_vm2, %v2286_v34  ;;  %v4081_v34 = vld [vmem:[%s6791_s2 + $0x80] sm:$0xf]  ;;  %v4388_v14 = vld [vmem:[%s6791_s2 + $0x8c] sm:$0xf0]  ;;  %v4386_v10 = vld [vmem:[%s6791_s2 + $0x84] sm:$0xf]  ;;  %v4046_v13 = vor.u32 %v4375_v47, %v4043_v48 }
 0x705   :  { %2882 = vmatpush.bf16.msrb.mxu0 %v4130_v4  ;;  %v4082_v16 = vor.u32 %v4388_v14, %v4081_v34  ;;  %v4075_v4 = vld [vmem:[%s6791_s2 + $0x78] sm:$0xf0]  ;;  %v4371_v34 = vld [vmem:[%s6791_s2 + $0xc] sm:$0xf]  ;;  %v3054_v48 = vld [vmem:[%s6794_s5 + $0x30] sm:$0xff] }
 0x706   :  { %v2589_v20 = vmul.f32 0.5, %v2585_v30  ;;  %v4083_v30 = vld [vmem:[%s6791_s2 + $0x90] sm:$0xf0]  ;;  %v4078_v32 = vor.u32 %v4383_v56, %v4075_v4  ;;  %v4027_v14 = vld [vmem:[%s6791_s2 + $0x18] sm:$0xf0] }
 0x707   :  { %v2568_v27 = vpop.f32.mrf.mxu2  ;;  %v4073_v4 = vld [vmem:[%s6791_s2 + $0x68] sm:$0xf] }
 0x708   :  { %4470 = vtanh.f32 %v2589_v20  ;;  %v2579_v25 = vrot.slane %v2568_v27, 4  ;;  %v4469_v54 = vpop.eup %4468  ;;  %v4086_v20 = vor.u32 %v4386_v10, %v4083_v30  ;;  %v4391_v27 = vld [vmem:[%s6791_s2 + $0xac] sm:$0xf] }
 0x709   :  { %v2544_v19 = vpop.f32.mrf.mxu3  ;;  %v2594_v58 = vmul.f32 0.5, %v4469_v54  ;;  %2883 = vmatpush.bf16.msrb.mxu0 %v4114_v57  ;;  %v4384_v54 = vld [vmem:[%s6791_s2 + $0x6c] sm:$0xf0]  ;;  %v4034_v57 = vor.u32 %v4376_v60, %v4033_v33  ;;  %v4381_v33 = vld [vmem:[%s6791_s2 + $0x54] sm:$0xf0] }
 0x70a   :  { %v2587_v11 = vadd.f32 %v2579_v25, %v2323_v38  ;;  %v4107_v25 = vld [vmem:[%s6791_s2 + $0xb8] sm:$0xf0]  ;;  %2898 = vmatpush.bf16.msrb.mxu2 %v4086_v20  ;;  %v4065_v19 = vld [vmem:[%s6791_s2 + $0x60] sm:$0xf] }
 0x70b   :  { %v2597_v49 = vadd.f32 0.5, %v2594_v58  ;;  %v4110_v38 = vor.u32 %v4391_v27, %v4107_v25  ;;  %v4066_v58 = vor.u32 %v4384_v54, %v4065_v19  ;;  %v2656_v20 = vld [vmem:[%s6793_s4 + $0xb8] sm:$0xff]  ;;  %v2653_v25 = vld [vmem:[%s6793_s4 + $0xa0] sm:$0xff] }
 0x70c   :  { %4472 = vtanh.f32 %v2587_v11  ;;  %2554 = vmatmul.bf16.vlgmr.msra.gmra.mxu0 %v6367_v39  ;;  %v6495_v39 = vld [vmem:[%s6793_s4 + $0x10] sm:$0xff]  ;;  %v4382_v11 = vld [vmem:[%s6791_s2 + $0x64] sm:$0xf]  ;;  %2668 = vmatpush.msrb.mxu3 %v2656_v20  ;;  %v4401_v54 = vld [vmem:[%s6791_s2 + $0xf4] sm:$0xf0] }
 0x70d   :  { %2641 = vmatpush.msrb.mxu1 %v6495_v39  ;;  %2884 = vmatpush.bf16.msrb.mxu0 %v4098_v51  ;;  %v4019_v51 = vld [vmem:[%s6791_s2 + $0x10] sm:$0xf0] }
 0x70e   :  { %v4471_v8 = vpop.eup %4470  ;;  %v4022_v31 = vor.u32 %v4370_v29, %v4019_v51  ;;  %v3055_v51 = vld [vmem:[%s6794_s5 + $0x38] sm:$0xff] }
 0x70f   :  { %v2595_v62 = vmul.f32 0.5, %v4471_v8  ;;  %v2570_v7 = vpop.f32.mrf.mxu2  ;;  %2642 = vmatpush.msrb.mxu1 %v6501_v36  ;;  %v4067_v8 = vld [vmem:[%s6791_s2 + $0x70] sm:$0xf0] }
 0x710   :  { %v4387_v7 = vld [vmem:[%s6791_s2 + $0x8c] sm:$0xf] }
 0x711   :  { %v2598_v12 = vadd.f32 0.5, %v2595_v62  ;;  %2643 = vmatpush.msrb.mxu1 %v6518_v61  ;;  %2885 = vmatpush.bf16.msrb.mxu0 %v4082_v16  ;;  %v4070_v62 = vor.u32 %v4382_v11, %v4067_v8  ;;  %v4030_v16 = vor.u32 %v4371_v34, %v4027_v14 }
 0x712   :  { %v4473_v21 = vpop.eup %4472 }
 0x713   :  { %v2604_v22 = vmul.f32 %v2602_v41, %v2598_v12  ;;  %v2605_v50 = vmul.f32 %v4473_v21, %v2597_v49  ;;  %2921 = vmatpush.bf16.msra.mxu1 %v4142_v6  ;;  %v4091_v49 = vld [vmem:[%s6791_s2 + $0x98] sm:$0xf0]  ;;  %2899 = vmatpush.bf16.msrb.mxu2 %v4070_v62  ;;  %v4049_v41 = vld [vmem:[%s6791_s2 + $0x40] sm:$0xf]  ;;  %v4380_v21 = vld [vmem:[%s6791_s2 + $0x4c] sm:$0xf0] }
 0x714   :  { %v4094_v12 = vor.u32 %v4387_v7, %v4091_v49  ;;  %v4017_v6 = vld [vmem:[%s6791_s2] sm:$0xf]  ;;  %v4397_v62 = vld [vmem:[%s6791_s2 + $0xd4] sm:$0xf0] }
 0x715   :  { %v6472_v24 = vadd.f32 %v2605_v50, %v2604_v22  ;;  %2886 = vmatpush.bf16.msrb.mxu0 %v4066_v58  ;;  %v4378_v22 = vld [vmem:[%s6791_s2 + $0x44] sm:$0xf]  ;;  %v4050_v50 = vor.u32 %v4380_v21, %v4049_v41  ;;  %v4018_v23 = vor.u32 %v4372_v43, %v4017_v6  ;;  %v4393_v41 = vld [vmem:[%s6791_s2 + $0xb4] sm:$0xf0] }
 0x716   :  { %v4054_v53 = vor.u32 %v4378_v22, %v4051_v35  ;;  %v2649_v58 = vld [vmem:[%s6793_s4 + $0x80] sm:$0xff]  ;;  %v4389_v35 = vld [vmem:[%s6791_s2 + $0x94] sm:$0xf0] }
 0x717   :  { %2922 = vmatpush.bf16.msra.mxu1 %v4126_v9 }
 0x718   :  { %2900 = vmatpush.bf16.msrb.mxu2 %v4054_v53 }
 0x719   :  { %2887 = vmatpush.bf16.msrb.mxu0 %v4050_v50  ;;  %v4089_v50 = vld [vmem:[%s6791_s2 + $0x88] sm:$0xf] }
 0x71b   :  { %2923 = vmatpush.bf16.msra.mxu1 %v4110_v38 }
 0x71c   :  { %2901 = vmatpush.bf16.msrb.mxu2 %v4038_v3 }
 0x71d   :  { %2888 = vmatpush.bf16.msrb.mxu0 %v4034_v57 }
 0x71f   :  { %2924 = vmatpush.bf16.msra.mxu1 %v4094_v12  ;;  %v4105_v12 = vld [vmem:[%s6791_s2 + $0xa8] sm:$0xf] }
 0x720   :  { %2902 = vmatpush.bf16.msrb.mxu2 %v4022_v31  ;;  %v2682_v31 = vld [vmem:[#allocation2 + $0x8] sm:$0xc0] }
 0x721   :  { %2889 = vmatpush.bf16.msrb.mxu0 %v4018_v23 }
 0x723   :  { %2925 = vmatpush.bf16.msra.mxu1 %v4078_v32  ;;  %v4385_v32 = vld [vmem:[%s6791_s2 + $0x74] sm:$0xf0] }
 0x724   :  { %3030 = vmatpush.msra.mxu2 %v2656_v20  ;;  %v2683_v20 = vld [vmem:[#allocation2 + $0x20] sm:$0xc0] }
 0x725   :  { %2990 = vmatpush.msra.mxu0 %v6399_v45 }
 0x727   :  { %2926 = vmatpush.bf16.msra.mxu1 %v4062_v5  ;;  %2991 = vmatpush.msra.mxu0 %v6404_v1  ;;  %v2654_v1 = vld [vmem:[%s6793_s4 + $0xa8] sm:$0xff]  ;;  %v6736_v5 = vld [vmem:[%s6793_s4 + $0xc0] ss:$0 sm:$0xff] }
 0x729   :  { %2992 = vmatpush.msra.mxu0 %v6410_v2  ;;  %v2322_v2 = vld [vmem:[#allocation2 + $0x28] sm:$0x30] }
 0x72b   :  { %2927 = vmatpush.bf16.msra.mxu1 %v4046_v13  ;;  %2993 = vmatpush.msra.mxu0 %v6416_v18  ;;  %v2652_v18 = vld [vmem:[%s6793_s4 + $0x98] sm:$0xff] }
 0x72d   :  { %2994 = vmatpush.msra.mxu0 %v6422_v44  ;;  %v2651_v44 = vld [vmem:[%s6793_s4 + $0x90] sm:$0xff] }
 0x72f   :  { %2928 = vmatpush.bf16.msra.mxu1 %v4030_v16  ;;  %2995 = vmatpush.msra.mxu0 %v6428_v52  ;;  %v4137_v52 = vld [vmem:[%s6791_s2 + $0xe8] sm:$0xf] }
 0x730   :  { %v4138_v8 = vor.u32 %v4401_v54, %v4137_v52  ;;  %v3048_v54 = vld [vmem:[%s6794_s5] sm:$0xff] }
 0x731   :  { %2996 = vmatpush.msra.mxu0 %v6435_v55  ;;  %v2650_v55 = vld [vmem:[%s6793_s4 + $0x88] sm:$0xff] }
 0x733   :  { %2997 = vmatpush.msra.mxu0 %v6441_v17  ;;  %v4121_v17 = vld [vmem:[%s6791_s2 + $0xc8] sm:$0xf] }
 0x734   :  { %v4122_v49 = vor.u32 %v4397_v62, %v4121_v17 }
 0x735   :  { %2998 = vmatpush.msra.mxu0 %v6448_v0 }
 0x737   :  { %2999 = vmatpush.msra.mxu0 %v6454_v37 }
 0x739   :  { %3000 = vmatpush.msra.mxu0 %v6460_v26  ;;  %v4106_v26 = vor.u32 %v4393_v41, %v4105_v12  ;;  %v3046_v41 = vld [vmem:[#allocation3] sm:$0xff] }
 0x73b   :  { %3001 = vmatpush.msra.mxu0 %v6466_v28 }
 0x73d   :  { %3002 = vmatpush.msra.mxu0 %v6486_v46  ;;  %v4090_v46 = vor.u32 %v4389_v35, %v4089_v50  ;;  %v2684_v35 = vld [vmem:[#allocation2 + $0x28] sm:$0xc0] }
 0x73f   :  { %3003 = vmatpush.msra.mxu0 %v6495_v39  ;;  %v4074_v39 = vor.u32 %v4385_v32, %v4073_v4  ;;  %v4407_v4 = vld [vmem:[%s6794_s5 + $0x40] ss:$0 sm:$0xff] }
 0x741   :  { %3004 = vmatpush.msra.mxu0 %v6501_v36  ;;  %v4057_v36 = vld [vmem:[%s6791_s2 + $0x48] sm:$0xf] }
 0x742   :  { %v4058_v60 = vor.u32 %v4381_v33, %v4057_v36 }
 0x743   :  { %3005 = vmatpush.msra.mxu0 %v6518_v61  ;;  %v4041_v61 = vld [vmem:[%s6791_s2 + $0x28] sm:$0xf] }
 0x744   :  { %v4042_v57 = vor.u32 %v4377_v42, %v4041_v61 }
 0x781   :  { %v2315_v9 = vpop.f32.mrf.mxu0 }
 0x782   :  { %v2316_v10 = vadd.f32 %v6118_v15, %v2315_v9  ;;  %v2655_v15 = vld [vmem:[%s6793_s4 + $0xb0] sm:$0xff]  ;;  %v3053_v9 = vld [vmem:[%s6794_s5 + $0x28] sm:$0xff] }
 0x783   :  { %2669 = vmatpush.msrb.mxu3 %v2655_v15  ;;  %3031 = vmatpush.msra.mxu2 %v2655_v15 }
 0x784   :  { %v2318_v30 = vmax.f32 %v2316_v10, 0.0 }
 0x785   :  { %2670 = vmatpush.msrb.mxu3 %v2654_v1  ;;  %3032 = vmatpush.msra.mxu2 %v2654_v1  ;;  %v3051_v1 = vld [vmem:[%s6794_s5 + $0x18] sm:$0xff] }
 0x786   :  { %2319 = vst.msk [vmem:[#allocation3 + $0xa] sm:$0x3] %vm529_vm3, %v2318_v30  ;;  %v3052_v30 = vld [vmem:[%s6794_s5 + $0x20] sm:$0xff] }
 0x787   :  { %2671 = vmatpush.msrb.mxu3 %v2653_v25  ;;  %3033 = vmatpush.msra.mxu2 %v2653_v25 }
 0x789   :  { %v2555_v45 = vpop.f32.mrf.mxu0  ;;  %2672 = vmatpush.msrb.mxu3 %v2652_v18  ;;  %3034 = vmatpush.msra.mxu2 %v2652_v18 }
 0x78a   :  { %v2578_v27 = vrot.slane %v2555_v45, 4 }
 0x78b   :  { %2673 = vmatpush.msrb.mxu3 %v2651_v44  ;;  %3035 = vmatpush.msra.mxu2 %v2651_v44 }
 0x78c   :  { %v2586_v38 = vadd.f32 %v2578_v27, %v2322_v2  ;;  %v2685_v27 = vld [vmem:[#allocation2 + $0x38] sm:$0xc0] }
 0x78d   :  { %2674 = vmatpush.msrb.mxu3 %v2650_v55  ;;  %3036 = vmatpush.msra.mxu2 %v2650_v55 }
 0x78e   :  { %v2590_v19 = vmul.f32 0.5, %v2586_v38  ;;  %v3050_v38 = vld [vmem:[%s6794_s5 + $0x10] sm:$0xff] }
 0x78f   :  { %2675 = vmatpush.msrb.mxu3 %v2649_v58  ;;  %3037 = vmatpush.msra.mxu2 %v2649_v58 }
 0x790   :  { %4474 = vtanh.f32 %v2590_v19  ;;  %v3049_v19 = vld [vmem:[%s6794_s5 + $0x8] sm:$0xff] }
 0x791   :  { %v2557_v11 = vpop.f32.mrf.mxu0  ;;  %4476 = vtanh.f32 %v6472_v24  ;;  %2908 = vmatpush.bf16.msra.mxu3 %v4138_v8 }
 0x795   :  { %2909 = vmatpush.bf16.msra.mxu3 %v4122_v49 }
 0x796   :  { %v4475_v0 = vpop.eup %4474 }
 0x797   :  { %v2596_v7 = vmul.f32 0.5, %v4475_v0  ;;  %v4477_v21 = vpop.eup %4476  ;;  %v2964_v0 = vrot.slane %v6472_v24, 6 }
 0x799   :  { %v2599_v37 = vadd.f32 0.5, %v2596_v7  ;;  %2910 = vmatpush.bf16.msra.mxu3 %v4106_v26 }
 0x79b   :  { %v2608_v22 = vmul.f32 %v4477_v21, %v2599_v37  ;;  %v4495_v21 = vld [vmem:[%s6793_s4 + $0xc1] ss:$0 sm:$0xff] }
 0x79d   :  { %v2626_v53 = vrot.slane %v2608_v22, 4  ;;  %v2686_v56 = vpack.c.bf16 %v2608_v22, %v2608_v22  ;;  %2911 = vmatpush.bf16.msra.mxu3 %v4090_v46 }
 0x79f   :  { %2644 = vmatmul.f32.vlgmr.msrb.gmra.mxu1 %v2626_v53  ;;  %v2720_v28 = vrot.slane %v2686_v56, 2 }
 0x7a1   :  { %2890 = vmatmul.bf16.vlgmr.msrb.gmra.mxu0 %v2720_v28  ;;  %2903 = vmatmul.bf16.vlgmr.msrb.gmra.mxu2 %v2720_v28 }
 0x7a2   :  { %2912 = vmatpush.bf16.msra.mxu3 %v4074_v39 }
 0x7a6   :  { %2913 = vmatpush.bf16.msra.mxu3 %v4058_v60 }
 0x7a7   :  { %2929 = vmatmul.bf16.vlgmr.msra.gmra.mxu1 %v2720_v28 }
 0x7aa   :  { %2914 = vmatpush.bf16.msra.mxu3 %v4042_v57 }
 0x7ae   :  { %2915 = vmatpush.bf16.msra.mxu3 %v4026_v63 }
 0x81c   :  { %v2645_v3 = vpop.f32.mrf.mxu1 }
 0x81d   :  { %v2646_v6 = vadd.f32 %v6736_v5, %v2645_v3 }
 0x81e   :  { %v2891_v43 = vpop.f32.mrf.mxu0 }
 0x81f   :  { %v2648_v29 = vmax.f32 %v2646_v6, 0.0  ;;  %v2938_v23 = vrot.slane %v2891_v43, 2 }
 0x821   :  { %v2946_v47 = vadd.f32 %v2938_v23, %v2682_v31  ;;  %4014 = vmatmul.msk.f32.vlgmr.msrb.gmra.mxu3 %vm504_vm2, %v2648_v29 }
 0x822   :  { %3072 = vmatpush.msrb.mxu3 %v3055_v51 }
 0x823   :  { %v2950_v13 = vmul.f32 0.5, %v2946_v47 }
 0x824   :  { %v2904_v34 = vpop.f32.mrf.mxu2  ;;  %v2930_v14 = vpop.f32.mrf.mxu1  ;;  %3073 = vmatpush.msrb.mxu3 %v3054_v48 }
 0x825   :  { %4478 = vtanh.f32 %v2950_v13  ;;  %v2939_v10 = vrot.slane %v2904_v34, 2  ;;  %v2941_v16 = vrot.slane %v2930_v14, 2 }
 0x826   :  { %v2893_v15 = vpop.f32.mrf.mxu0  ;;  %3074 = vmatpush.msrb.mxu3 %v3053_v9 }
 0x827   :  { %v2947_v45 = vadd.f32 %v2939_v10, %v2683_v20  ;;  %v2949_v25 = vadd.f32 %v2941_v16, %v2685_v27 }
 0x828   :  { %3075 = vmatpush.msrb.mxu3 %v3052_v30 }
 0x829   :  { %v2951_v2 = vmul.f32 0.5, %v2947_v45  ;;  %2916 = vmatmul.bf16.vlgmr.msra.gmra.mxu3 %v2720_v28 }
 0x82a   :  { %3076 = vmatpush.msrb.mxu3 %v3051_v1 }
 0x82b   :  { %v4479_v18 = vpop.eup %4478  ;;  %4480 = vtanh.f32 %v2951_v2 }
 0x82c   :  { %v2906_v44 = vpop.f32.mrf.mxu2  ;;  %v2932_v52 = vpop.f32.mrf.mxu1  ;;  %3077 = vmatpush.msrb.mxu3 %v3050_v38  ;;  %4482 = vtanh.f32 %v2949_v25  ;;  %v2956_v11 = vmul.f32 0.5, %v4479_v18 }
 0x82e   :  { %3078 = vmatpush.msrb.mxu3 %v3049_v19  ;;  %v2959_v58 = vadd.f32 0.5, %v2956_v11 }
 0x830   :  { %3079 = vmatpush.msrb.mxu3 %v3048_v54 }
 0x831   :  { %v4481_v55 = vpop.eup %4480 }
 0x832   :  { %v2957_v8 = vmul.f32 0.5, %v4481_v55  ;;  %v4483_v17 = vpop.eup %4482 }
 0x833   :  { %v2967_v49 = vmul.f32 %v4483_v17, %v2959_v58 }
 0x834   :  { %v2960_v62 = vadd.f32 0.5, %v2957_v8 }
 0x836   :  { %v2966_v7 = vmul.f32 %v2964_v0, %v2960_v62 }
 0x838   :  { %v2968_v12 = vadd.f32 %v2967_v49, %v2966_v7 }
 0x839   :  { %4144 = vmatmul.msk.f32.vlgmr.msrb.gmra.mxu3 %vm504_vm2, %v3046_v41 }
 0x83a   :  { %3045 = vst [vmem:[%s6796_s7 - $0x4] sm:$0xc0] %v2968_v12 }
 0x8a4   :  { %v2677_v37 = vpop.f32.mrf.mxu3 }
 0x8a5   :  { %v2678_v22 = vadd.f32 %v4495_v21, %v2677_v37 }
 0x8a7   :  { %v2680_v26 = vmax.f32 %v2678_v22, 0.0 }
 0x8a9   :  { %2681 = vst.msk [vmem:[#allocation3 + $0xc] sm:$0x3] %vm529_vm3, %v2680_v26 }
 0x8ac   :  { %v2917_v24 = vpop.f32.mrf.mxu3 }
 0x8ad   :  { %v2940_v50 = vrot.slane %v2917_v24, 2 }
 0x8af   :  { %v2948_v53 = vadd.f32 %v2940_v50, %v2684_v35 }
 0x8b1   :  { %v2952_v56 = vmul.f32 0.5, %v2948_v53 }
 0x8b3   :  { %4484 = vtanh.f32 %v2952_v56 }
 0x8b4   :  { %v2919_v28 = vpop.f32.mrf.mxu3  ;;  %4486 = vtanh.f32 %v2968_v12 }
 0x8b9   :  { %v4485_v46 = vpop.eup %4484 }
 0x8ba   :  { %v2958_v32 = vmul.f32 0.5, %v4485_v46  ;;  %v4487_v33 = vpop.eup %4486 }
 0x8bc   :  { %v2961_v39 = vadd.f32 0.5, %v2958_v32  ;;  %v3081_v36 = vpop.f32.mrf.mxu3 }
 0x8bd   :  { %v3082_v60 = vadd.f32 %v4407_v4, %v3081_v36 }
 0x8be   :  { %v2970_v61 = vmul.f32 %v4487_v33, %v2961_v39 }
 0x8bf   :  { %4488 = vtanh.f32 %v3082_v60 }
 0x8c0   :  { %3044 = vst [vmem:[%s6796_s7 - $0x6] sm:$0xc0] %v2970_v61  ;;  %v2988_v42 = vrot.slane %v2970_v61, 6 }
 0x8c2   :  { %3006 = vmatmul.f32.vlgmr.msra.gmra.mxu0 %v2988_v42 }
 0x8c5   :  { %v4489_v57 = vpop.eup %4488 }
 0x8c6   :  { %3089 = vst [vmem:[%s6795_s6] sm:$0xff] %v4489_v57 }
 0x93f   :  { %v3007_v40 = vpop.f32.mrf.mxu0 }
 0x940   :  { %v3008_v59 = vadd.f32 %v6736_v5, %v3007_v40 }
 0x942   :  { %v3010_v63 = vmax.f32 %v3008_v59, 0.0 }
 0x944   :  { %4143 = vmatmul.msk.f32.vlgmr.msra.gmra.mxu2 %vm504_vm2, %v3010_v63 }
 0x9c7   :  { %v3039_v3 = vpop.f32.mrf.mxu2 }
 0x9c8   :  { %v3040_v6 = vadd.f32 %v4495_v21, %v3039_v3 }
 0x9ca   :  { %v3042_v43 = vmax.f32 %v3040_v6, 0.0 }
 0x9cc   :  { %3043 = vst.msk [vmem:[#allocation3 + $0xe] sm:$0x3] %vm529_vm3, %v3042_v43 }
 0x9d3   :  { %v3047_v29 = vld [vmem:[#allocation3 + $0x8] sm:$0xff] }
 0x9d4   :  { %4145 = vmatmul.msk.f32.gmra.mxu3 %vm504_vm2, %v3047_v29 }
 0xa57   :  { %v3084_v23 = vpop.f32.mrf.mxu3 }
 0xa58   :  { %v3085_v51 = vadd.f32 %v4407_v4, %v3084_v23 }
 0xa5a   :  { %4490 = vtanh.f32 %v3085_v51 }
 0xa60   :  { %v4491_v31 = vpop.eup %4490 }
 0xa61   :  { %3090 = vst [vmem:[%s6795_s6 + $0x8] sm:$0xff] %v4491_v31 }
 0xa62   :  { %3099 = vsyncpa [#allocation5], 1 }

</bundles_post_ra>
